<compile_context>
chip_gen: v7x
topology: tpu7x:2x2x1
jax: 0.10.0
libtpu: 0.0.40
codegen_flags: <defaults>
</compile_context>

<pallas_src>
import jax
import jax.numpy as jnp
from jax.experimental import pallas as pl
from jax.experimental.pallas import tpu as pltpu

SCALE_FACTOR = 2.0
CLAMP_MIN = -10.0
CLAMP_MAX = 10.0


def _fused_kernel(x_ref, w_ref, b_ref, o_ref, m_ref, l_ref):
    h = pl.program_id(1)

    @pl.when(h == 0)
    def _():
        m_ref[...] = jnp.full_like(m_ref, -jnp.inf)
        l_ref[...] = jnp.zeros_like(l_ref)

    # Linear tile: (TB, K) @ (K, TH) + (1, TH) on the MXU, f32 accumulation.
    y = jnp.dot(x_ref[...], w_ref[...], preferred_element_type=jnp.float32)
    y = (y + b_ref[...]) * (SCALE_FACTOR * 2.0)          # scale then x + x
    y = jnp.clip(y, CLAMP_MIN, CLAMP_MAX)

    # Online logsumexp over the H (reduction) axis.
    m_prev = m_ref[...]
    m_new = jnp.maximum(m_prev, jnp.max(y, axis=-1, keepdims=True))
    alpha = jnp.exp(m_prev - m_new)                      # 0 at first step
    l_ref[...] = alpha * l_ref[...] + jnp.sum(jnp.exp(y - m_new),
                                              axis=-1, keepdims=True)
    m_ref[...] = m_new

    @pl.when(h == pl.num_programs(1) - 1)
    def _():
        lse = m_ref[...] + jnp.log(l_ref[...])
        # Threshold-stable softplus (safe even if clamp bounds / H change).
        sp = jnp.where(lse > 20.0, lse,
                       jnp.log1p(jnp.exp(jnp.minimum(lse, 20.0))))
        mish = lse * jnp.tanh(sp)
        o_ref[...] = (lse * mish).astype(o_ref.dtype)    # lse * mish(lse)


def fused_forward(x, w, b, *, block_b=128, block_h=512):
    """x: (B, K) f32, w: (K, H) f32 (transposed Linear weight), b: (H,) f32 -> (B, 1) f32."""
    B, K = x.shape
    K2, H = w.shape
    assert K == K2
    assert K % 128 == 0, "input_size must be a multiple of 128"
    assert H % 128 == 0, "hidden_size must be a multiple of 128"

    # H tile (reduction axis, last grid dim).
    if H <= block_h:
        th = H
    else:
        assert H % block_h == 0
        th = block_h

    # B tile: sublane-aligned; pad batch up if needed.
    tb = min(block_b, ((B + 7) // 8) * 8)
    Bp = ((B + tb - 1) // tb) * tb
    if Bp != B:
        x = jnp.pad(x, ((0, Bp - B), (0, 0)))

    grid = (Bp // tb, H // th)
    b2d = b.reshape(1, H)

    cost = pl.CostEstimate(
        flops=2 * Bp * K * H,
        transcendentals=Bp * H,  # exp in the online logsumexp dominates
        bytes_accessed=(Bp * K + K * H + H + Bp) * 4,
    )

    out = pl.pallas_call(
        _fused_kernel,
        out_shape=jax.ShapeDtypeStruct((Bp, 1), jnp.float32),
        grid_spec=pltpu.PrefetchScalarGridSpec(
            num_scalar_prefetch=0,
            grid=grid,
            in_specs=[
                pl.BlockSpec((tb, K), lambda i, h: (i, 0)),   # x: new tile per B step
                pl.BlockSpec((K, th), lambda i, h: (0, h)),   # w: streamed along H
                pl.BlockSpec((1, th), lambda i, h: (0, h)),   # bias: constant along B
            ],
            out_specs=pl.BlockSpec((tb, 1), lambda i, h: (i, 0)),  # resident across H
            scratch_shapes=[
                pltpu.VMEM((tb, 1), jnp.float32),   # running max m
                pltpu.VMEM((tb, 1), jnp.float32),   # running sum l
            ],
        ),
        compiler_params=pltpu.CompilerParams(
            dimension_semantics=("parallel", "arbitrary"),
            vmem_limit_bytes=32 * 1024 * 1024,
        ),
        cost_estimate=cost,
    )(x, w, b2d)

    return out[:B]


def reference_forward(x, w, b):
    y = x @ w + b
    y = y * SCALE_FACTOR
    y = y + y
    y = jnp.clip(y, CLAMP_MIN, CLAMP_MAX)
    y = jax.scipy.special.logsumexp(y, axis=1, keepdims=True)
    return y * (y * jnp.tanh(jnp.log1p(jnp.exp(y))))


if __name__ == "__main__":
    # Shapes from the module spec: input_size=512, hidden_size=1024; batch=128.
    batch_size, input_size, hidden_size = 128, 512, 1024

    key = jax.random.PRNGKey(0)
    kx, kw, kb = jax.random.split(key, 3)

    x = jax.random.normal(kx, (batch_size, input_size), dtype=jnp.float32)
    # nn.Linear-style init: U(-1/sqrt(in), 1/sqrt(in)); stored transposed (K, H)
    bound = 1.0 / (input_size ** 0.5)
    w = jax.random.uniform(kw, (input_size, hidden_size), dtype=jnp.float32,
                           minval=-bound, maxval=bound)
    b = jax.random.uniform(kb, (hidden_size,), dtype=jnp.float32,
                           minval=-bound, maxval=bound)

    out = fused_forward(x, w, b)
    jax.block_until_ready(out)

    ref = reference_forward(x, w, b)
    assert out.shape == (batch_size, 1)
    assert jnp.allclose(out, ref, atol=1e-4, rtol=1e-4), (out, ref)

    print("KERNEL_OK")
</pallas_src>

<mosaic_0001>
module attributes {stable_mosaic.version = 11 : i64} {
  func.func @_fused_kernel(%arg0: i32, %arg1: i32, %arg2: memref<128x512xf32, #tpu.memory_space<vmem>>, %arg3: memref<512x512xf32, #tpu.memory_space<vmem>>, %arg4: memref<1x512xf32, #tpu.memory_space<vmem>>, %arg5: memref<128x1xf32, #tpu.memory_space<vmem>>, %arg6: memref<128x1xf32, #tpu.memory_space<vmem>>, %arg7: memref<128x1xf32, #tpu.memory_space<vmem>>) attributes {dimension_semantics = [#tpu.dimension_semantics<parallel>, #tpu.dimension_semantics<arbitrary>], iteration_bounds = array<i64: 1, 2>, scalar_prefetch = 0 : i64, scratch_operands = 2 : i64, tpu.core_type = #tpu.core_type<tc>, window_params = [{transform_indices = @transform_0, window_bounds = array<i64: 128, 512>}, {transform_indices = @transform_1, window_bounds = array<i64: 512, 512>}, {transform_indices = @transform_2, window_bounds = array<i64: 1, 512>}, {transform_indices = @transform_3, window_bounds = array<i64: 128, 1>}]} {
    %c0_i32 = arith.constant 0 : i32
    %0 = arith.cmpi eq, %arg1, %c0_i32 : i32
    %1 = arith.extui %0 : i1 to i32
    %c0_i32_0 = arith.constant 0 : i32
    %2 = arith.cmpi ne, %1, %c0_i32_0 : i32
    scf.if %2 {
      %cst_20 = arith.constant 0xFF800000 : f32
      %34 = vector.broadcast %cst_20 : f32 to vector<128x1xf32>
      %c0_21 = arith.constant 0 : index
      %c0_22 = arith.constant 0 : index
      %35 = vector.load %arg6[%c0_21, %c0_22] : memref<128x1xf32, #tpu.memory_space<vmem>>, vector<128x1xf32>
      tpu.vector_store %arg6[%c0_21, %c0_22], %34 {strides = array<i32>} : memref<128x1xf32, #tpu.memory_space<vmem>>, vector<128x1xf32>,
      %cst_23 = arith.constant 0.000000e+00 : f32
      %36 = vector.broadcast %cst_23 : f32 to vector<128x1xf32>
      %c0_24 = arith.constant 0 : index
      %c0_25 = arith.constant 0 : index
      %37 = vector.load %arg7[%c0_24, %c0_25] : memref<128x1xf32, #tpu.memory_space<vmem>>, vector<128x1xf32>
      tpu.vector_store %arg7[%c0_24, %c0_25], %36 {strides = array<i32>} : memref<128x1xf32, #tpu.memory_space<vmem>>, vector<128x1xf32>,
    } else {
    }
    %c0 = arith.constant 0 : index
    %c0_1 = arith.constant 0 : index
    %3 = vector.load %arg2[%c0, %c0_1] : memref<128x512xf32, #tpu.memory_space<vmem>>, vector<128x512xf32>
    %c0_2 = arith.constant 0 : index
    %c0_3 = arith.constant 0 : index
    %4 = vector.load %arg3[%c0_2, %c0_3] : memref<512x512xf32, #tpu.memory_space<vmem>>, vector<512x512xf32>
    %cst = arith.constant dense<0.000000e+00> : vector<128x512xf32>
    %5 = tpu.matmul %3, %4, %cst {dimension_numbers = #tpu.dot_dimension_numbers<[1], [0], [0], [1], [0, 0, 1, 1], [], []>} : vector<128x512xf32>, vector<512x512xf32>, vector<128x512xf32> -> vector<128x512xf32>
    %c0_4 = arith.constant 0 : index
    %c0_5 = arith.constant 0 : index
    %6 = vector.load %arg4[%c0_4, %c0_5] : memref<1x512xf32, #tpu.memory_space<vmem>>, vector<1x512xf32>
    %7 = vector.broadcast %6 : vector<1x512xf32> to vector<128x512xf32>
    %8 = arith.addf %5, %7 : vector<128x512xf32>
    %cst_6 = arith.constant 4.000000e+00 : f32
    %9 = vector.broadcast %cst_6 : f32 to vector<128x512xf32>
    %10 = arith.mulf %8, %9 : vector<128x512xf32>
    %cst_7 = arith.constant -1.000000e+01 : f32
    %cst_8 = arith.constant 1.000000e+01 : f32
    %11 = vector.broadcast %cst_7 : f32 to vector<128x512xf32>
    %12 = arith.maximumf %11, %10 : vector<128x512xf32>
    %13 = vector.broadcast %cst_8 : f32 to vector<128x512xf32>
    %14 = arith.minimumf %13, %12 : vector<128x512xf32>
    %c0_9 = arith.constant 0 : index
    %c0_10 = arith.constant 0 : index
    %15 = vector.load %arg6[%c0_9, %c0_10] : memref<128x1xf32, #tpu.memory_space<vmem>>, vector<128x1xf32>
    %cst_11 = arith.constant dense<0xFF800000> : vector<128xf32>
    %16 = vector.multi_reduction <maximumf>, %14, %cst_11 [1] : vector<128x512xf32> to vector<128xf32>
    %17 = vector.shape_cast %16 : vector<128xf32> to vector<128x1xf32>
    %18 = arith.maximumf %15, %17 : vector<128x1xf32>
    %19 = arith.subf %15, %18 : vector<128x1xf32>
    %20 = math.exp %19 : vector<128x1xf32>
    %c0_12 = arith.constant 0 : index
    %c0_13 = arith.constant 0 : index
    %21 = vector.load %arg7[%c0_12, %c0_13] : memref<128x1xf32, #tpu.memory_space<vmem>>, vector<128x1xf32>
    %22 = arith.mulf %20, %21 : vector<128x1xf32>
    %23 = vector.broadcast %18 : vector<128x1xf32> to vector<128x512xf32>
    %24 = arith.subf %14, %23 : vector<128x512xf32>
    %25 = math.exp %24 : vector<128x512xf32>
    %cst_14 = arith.constant dense<0.000000e+00> : vector<128xf32>
    %26 = vector.multi_reduction <add>, %25, %cst_14 [1] : vector<128x512xf32> to vector<128xf32>
    %27 = vector.shape_cast %26 : vector<128xf32> to vector<128x1xf32>
    %28 = arith.addf %22, %27 : vector<128x1xf32>
    %c0_15 = arith.constant 0 : index
    %c0_16 = arith.constant 0 : index
    %29 = vector.load %arg7[%c0_15, %c0_16] : memref<128x1xf32, #tpu.memory_space<vmem>>, vector<128x1xf32>
    tpu.vector_store %arg7[%c0_15, %c0_16], %28 {strides = array<i32>} : memref<128x1xf32, #tpu.memory_space<vmem>>, vector<128x1xf32>,
    %c0_17 = arith.constant 0 : index
    %c0_18 = arith.constant 0 : index
    %30 = vector.load %arg6[%c0_17, %c0_18] : memref<128x1xf32, #tpu.memory_space<vmem>>, vector<128x1xf32>
    tpu.vector_store %arg6[%c0_17, %c0_18], %18 {strides = array<i32>} : memref<128x1xf32, #tpu.memory_space<vmem>>, vector<128x1xf32>,
    %c1_i32 = arith.constant 1 : i32
    %31 = arith.cmpi eq, %arg1, %c1_i32 : i32
    %32 = arith.extui %31 : i1 to i32
    %c0_i32_19 = arith.constant 0 : i32
    %33 = arith.cmpi ne, %32, %c0_i32_19 : i32
    scf.if %33 {
      %c0_20 = arith.constant 0 : index
      %c0_21 = arith.constant 0 : index
      %34 = vector.load %arg6[%c0_20, %c0_21] : memref<128x1xf32, #tpu.memory_space<vmem>>, vector<128x1xf32>
      %c0_22 = arith.constant 0 : index
      %c0_23 = arith.constant 0 : index
      %35 = vector.load %arg7[%c0_22, %c0_23] : memref<128x1xf32, #tpu.memory_space<vmem>>, vector<128x1xf32>
      %36 = math.log %35 : vector<128x1xf32>
      %37 = arith.addf %34, %36 : vector<128x1xf32>
      %cst_24 = arith.constant 2.000000e+01 : f32
      %38 = vector.broadcast %cst_24 : f32 to vector<128x1xf32>
      %39 = arith.cmpf ogt, %37, %38 : vector<128x1xf32>
      %cst_25 = arith.constant 2.000000e+01 : f32
      %40 = vector.broadcast %cst_25 : f32 to vector<128x1xf32>
      %41 = arith.minimumf %37, %40 : vector<128x1xf32>
      %42 = math.exp %41 : vector<128x1xf32>
      %43 = math.log1p %42 : vector<128x1xf32>
      %44 = arith.select %39, %37, %43 : vector<128x1xi1>, vector<128x1xf32>
      %45 = math.tanh %44 : vector<128x1xf32>
      %46 = arith.mulf %37, %45 : vector<128x1xf32>
      %47 = arith.mulf %37, %46 : vector<128x1xf32>
      %c0_26 = arith.constant 0 : index
      %c0_27 = arith.constant 0 : index
      %48 = vector.load %arg5[%c0_26, %c0_27] : memref<128x1xf32, #tpu.memory_space<vmem>>, vector<128x1xf32>
      tpu.vector_store %arg5[%c0_26, %c0_27], %47 {strides = array<i32>} : memref<128x1xf32, #tpu.memory_space<vmem>>, vector<128x1xf32>,
    } else {
    }
    return
  }
  func.func @transform_0(%arg0: i32, %arg1: i32) -> (i32, i32) {
    %c0_i32 = arith.constant 0 : i32
    %c0_i32_0 = arith.constant 0 : i32
    return %arg0, %c0_i32 : i32, i32
  }
  func.func @transform_1(%arg0: i32, %arg1: i32) -> (i32, i32) {
    %c0_i32 = arith.constant 0 : i32
    %c0_i32_0 = arith.constant 0 : i32
    return %c0_i32, %arg1 : i32, i32
  }
  func.func @transform_2(%arg0: i32, %arg1: i32) -> (i32, i32) {
    %c0_i32 = arith.constant 0 : i32
    %c0_i32_0 = arith.constant 0 : i32
    return %c0_i32, %arg1 : i32, i32
  }
  func.func @transform_3(%arg0: i32, %arg1: i32) -> (i32, i32) {
    %c0_i32 = arith.constant 0 : i32
    %c0_i32_0 = arith.constant 0 : i32
    return %arg0, %c0_i32 : i32, i32
  }
}

</mosaic_0001>

<bundles_post_ra>
// kernel: tpu_custom_call.1
= control target key start
LH: loop header
LB: loop body
LE: loop exit
PB: predicated region body
PF: predicated region fallthrough
CT: control target
= control target key end

     0   :  { %8 = vsyncpa [#allocation5], 0  ;;  %s5100_s0 = inlined_call_operand.hbm [shape: f32[128,512], index: 0, kind: input, shape index: {}]   ;;  %s5101_s1 = inlined_call_operand.hbm [shape: f32[512,1024], index: 1, kind: input, shape index: {}]   ;;  %s5102_s2 = inlined_call_operand.hbm [shape: f32[1,1024], index: 2, kind: input, shape index: {}]   ;;  %s5103_s3 = inlined_call_operand.vmem [shape: f32[128,1], index: 3, kind: output, shape index: {}]  }
   0x1   :  { %9 = vsyncpa [#allocation7], 0 }
   0x2   :  { %11 = vsyncpa [#allocation7 + $0x1], 0  ;;  %s3563_s12 = smov 0   ;;  %s3565_s13 = smov 0  }
   0x3   :  { %s3567_s14 = smov 0   ;;  %s3569_s15 = smov 0  }
   0x4   :  { %s3571_s16 = smov 0   ;;  %s3573_s17 = smov 0  }
   0x5 LB: > { %s26_s18 = sadd.s32 1, %s3528_s16  ;;  %s62_s19 = sadd.s32 1, %s3520_s14  ;;  %s3532_s17 = sphi %s3573_s17, %s17_s17   ;;  %s3528_s16 = sphi %s3571_s16, %s5457_s16   ;;  %s3524_s15 = sphi %s3569_s15, %s5456_s15   ;;  %s3520_s14 = sphi %s3567_s14, %s5455_s14   ;;  %s3516_s13 = sphi %s3565_s13, %s5454_s13   ;;  %s3512_s12 = sphi %s3563_s12, %s5453_s12  }
   0x6   : > { %p27_p0 = scmp.ge.s32.totalorder %s26_s18, 2  ;;  %p69_p1 = scmp.ne.s32.totalorder %s3520_s14, %s3516_s13 }
   0x7   : > { %p70_p2 = scmp.eq.s32.totalorder %s3532_s17, 0  ;;  %p3043_p5 = scmp.lt.s32.totalorder %s3532_s17, 2 }
   0x8   : > { %s5459_s18 = smov (%p27_p0, %s26_s18), 0  ;;  %s168_s22 = sand.u32 1, %s3532_s17  }
   0x9   : > { %p3600_p3 = por %p70_p2, %p69_p1  ;;  %s59_s21 = ssub.s32 %s3528_s16, %s5459_s18 }
   0xa   : > { %p60_p4 = scmp.eq.s32.totalorder %s59_s21, 0  ;;  %s170_s23 = sand.u32 1, %s3520_s14  }
   0xb   : > { %s2557_s25 = sshll.u32 %s170_s23, 11  ;;  %s2637_s26 = sshll.u32 %s3528_s16, 9 }
   0xc   : > { %s3610_s24 = scalar_select %p60_p4, %s3520_s14, %s62_s19  }
   0xd   : > { %s3618_s29 = scalar_lea.hbm %s5101_s1, %s2637_s26  ;;  %s172_s30 = scalar_lea.vmem [#allocation6], %s2557_s25 }
   0xe   : > { %s179_s4 = sshll.u32 %s172_s30, 4  ;;  %p3624_p6 = pnand %p3043_p5, %p3600_p3  ;;  %s3620_s4 = int_to_ptr.vmem [resolvable:$true] %s179_s4 }
   0xf   : > { %s3628_s6 = scalar_lea.sflag [#allocation7], %s168_s22  ;;  %s3390_s7 = scalar_lea.hbm %s3618_s29, 32768 }
  0x10   : > { %s5213_s5 = scalar_select %p3624_p6, 1, 0 }
  0x11   : > { %p3391_p7 = scmp.ne.s32.totalorder %s3618_s29, %s3390_s7  ;;  %p5106_p8 = pneg %p3624_p6 }
  0x12   : > { %s3395_s10 = scalar_lea.hbm %s5101_s1, 65536  ;;  %p3396_p11 = scmp.lt.u32.totalorder %s3618_s29, %s5101_s1 }
  0x13   : > { %p3393_p9 = pnand %p5106_p8, %p3391_p7  ;;  %p3397_p12 = scmp.lt.u32.totalorder %s3395_s10, %s3390_s7 }
  0x14   : > { %p3399_p0 = scmp.lt.u32.totalorder %s3390_s7, %s3618_s29 }
  0x15   : > { %p3394_p10 = pneg %p3393_p9  ;;  %p3398_p13 = por %p3397_p12, %p3396_p11 }
  0x17   : > { %p3400_p1 = por %p3399_p0, %p3398_p13 }
  0x19   : > { %p3401_p2 = pnand %p3400_p1, %p3394_p10 }
  0x1b   : > { %3404 = shalt.err (!%p3401_p2)
}
  0x1c   : > { %s3405_s20 = scalar_lea.vmem %s3620_s4, 32768  ;;  %s3534_s21 = smov [#allocation6]  }
  0x1d   : > { %p3406_p3 = scmp.ne.s32.totalorder %s3620_s4, %s3405_s20  ;;  %s3410_s22 = sshll.u32 %s3534_s21, 4  ;;  %s3411_s22 = int_to_ptr.vmem [resolvable:$false] %s3410_s22 }
  0x1e   : > { %s3412_s25 = scalar_lea.vmem %s3411_s22, 65536  ;;  %p3413_p7 = scmp.lt.s32.totalorder %s3620_s4, %s3411_s22 }
  0x1f   : > { %p3408_p4 = pnand %p3406_p3, %p5106_p8  ;;  %p3414_p9 = scmp.lt.s32.totalorder %s3412_s25, %s3405_s20 }
  0x21   : > { %p3409_p5 = pneg %p3408_p4  ;;  %p3415_p11 = por %p3414_p9, %p3413_p7 }
  0x23   : > { %p3416_p12 = pnand %p3415_p11, %p3409_p5 }
  0x25   : > { %3419 = shalt.err (!%p3416_p12)
}
  0x26   : > { %s3535_s26 = smov 1024   ;;  %s5105_s27 = smov 512  }
  0x27   : > { %s3537_s28 = smov 32   ;;  %s5104_s30 = sadd.s32 4294967295, %s3532_s17  }
  0x28   : > { %3038 = dma.hbm_to_vmem [thread:$0]  (!%p3624_p6), %s3618_s29, 32768, %s3620_s4, %s3628_s6, %s3535_s26, %s5105_s27, %s3537_s28  }
  0x29   : > { %p75_p10 = scmp.ne.s32.totalorder %s3516_s13, %s3512_s12  ;;  %p3663_p13 = scmp.eq.s32.totalorder %s5104_s30, 0 }
  0x2a   : > { %p2554_p0 = scmp.ge.s32.totalorder %s3532_s17, 1  ;;  %p138_p1 = scmp.lt.s32.totalorder %s3532_s17, 3 }
  0x2b   : > { %s5214_s7 = scalar_select %p3663_p13, 1, 0 }
  0x2c   : > { %p3671_p2 = por %p3663_p13, %p75_p10  ;;  %p3675_p3 = pnand %p2554_p0, %p138_p1 }
  0x2d   : > { %s3538_s12 = smov [#allocation4]   ;;  %s2560_s4 = sshll.u32 %s170_s23, 2 }
  0x2e   : > { %s5215_s8 = scalar_select %p3671_p2, 1, 0 }
  0x2f   : > { %s5216_s9 = scalar_select %p3675_p3, 1, 0 }
  0x30   : > { %s154_s29 = sshll.u32 %s3538_s12, 4  ;;  %p3031_p4 = pneg %p3675_p3  ;;  %s155_s29 = int_to_ptr.vmem [resolvable:$true] %s154_s29 }
  0x31   : > { %s2638_s10 = sshll.u32 %s3528_s16, 6  ;;  %s193_s11 = scalar_lea.vmem [#allocation8], %s2560_s4 }
  0x32   : > { %s201_s19 = sshll.u32 %s193_s11, 4  ;;  %p3686_p5 = pnand %p3031_p4, %p3663_p13  ;;  %s3695_s19 = int_to_ptr.vmem [resolvable:$true] %s201_s19 }
  0x33   : > { %s3693_s25 = scalar_lea.hbm %s5102_s2, %s2638_s10  ;;  %s3420_s12 = scalar_lea.hbm %s5100_s0, 8192 }
  0x34   : > { %p3421_p7 = scmp.ne.s32.totalorder %s5100_s0, %s3420_s12  ;;  %p3422_p9 = pneg %p3686_p5 }
  0x35   : > { %p3427_p10 = scmp.lt.u32.totalorder %s3420_s12, %s5100_s0 }
  0x36   : > { %p3423_p11 = pnand %p3422_p9, %p3421_p7 }
  0x38   : > { %p3424_p12 = pneg %p3423_p11 }
  0x3a   : > { %p3429_p0 = pnand %p3427_p10, %p3424_p12 }
  0x3c   : > { %3432 = shalt.err (!%p3429_p0)
}
  0x3d   : > { %s3433_s10 = scalar_lea.vmem %s155_s29, 8192  ;;  %p3441_p2 = scmp.lt.s32.totalorder %s155_s29, %s155_s29 }
  0x3e   : > { %p3434_p1 = scmp.ne.s32.totalorder %s155_s29, %s3433_s10  ;;  %p3442_p13 = scmp.lt.s32.totalorder %s3433_s10, %s3433_s10 }
  0x40   : > { %p3436_p4 = pnand %p3434_p1, %p3422_p9  ;;  %p3443_p3 = por %p3442_p13, %p3441_p2 }
  0x42   : > { %p3437_p8 = pneg %p3436_p4 }
  0x44   : > { %p3444_p6 = pnand %p3443_p3, %p3437_p8 }
  0x46   : > { %3447 = shalt.err (!%p3444_p6)
}
  0x47   : > { %s5218_s21 = smov 512   ;;  %s3448_s27 = scalar_lea.hbm %s3693_s25, 64 }
  0x48   : > { %3034 = dma.hbm_to_vmem [thread:$0]  (!%p3686_p5), %s5100_s0, 8192, %s155_s29, [#allocation5], %s5218_s21, %s5218_s21, %s3537_s28  }
  0x49   : > { %p3449_p7 = scmp.ne.s32.totalorder %s3693_s25, %s3448_s27  ;;  %p5219_p9 = scmp.ne.s32.totalorder %s5213_s5, 0 }
  0x4a   : > { %s3453_s26 = scalar_lea.hbm %s5102_s2, 128  ;;  %p3454_p2 = scmp.lt.u32.totalorder %s3693_s25, %s5102_s2 }
  0x4b   : > { %p5220_p13 = pneg %p5219_p9  ;;  %p3455_p3 = scmp.lt.u32.totalorder %s3453_s26, %s3448_s27 }
  0x4c   : > { %p3457_p12 = scmp.lt.u32.totalorder %s3448_s27, %s3693_s25 }
  0x4d   : > { %p3451_p8 = pnand %p3449_p7, %p5220_p13  ;;  %p3456_p11 = por %p3455_p3, %p3454_p2 }
  0x4f   : > { %p3452_p6 = pneg %p3451_p8  ;;  %p3458_p10 = por %p3457_p12, %p3456_p11 }
  0x51   : > { %p3459_p0 = pnand %p3458_p10, %p3452_p6 }
  0x53   : > { %3462 = shalt.err (!%p3459_p0)
}
  0x54   : > { %s3463_s28 = scalar_lea.vmem %s3695_s19, 64  ;;  %p5221_p1 = pmov %p5220_p13 }
  0x55   : > { %p3464_p5 = scmp.ne.s32.totalorder %s3695_s19, %s3463_s28  ;;  %s3539_s29 = smov [#allocation8]  }
  0x56   : > { %s3468_s11 = sshll.u32 %s3539_s29, 4  ;;  %s3469_s11 = int_to_ptr.vmem [resolvable:$false] %s3468_s11 }
  0x57   : > { %p3466_p4 = pnand %p3464_p5, %p5221_p1  ;;  %s3470_s10 = scalar_lea.vmem %s3469_s11, 128 }
  0x58   : > { %p3471_p13 = scmp.lt.s32.totalorder %s3695_s19, %s3469_s11  ;;  %p3472_p8 = scmp.lt.s32.totalorder %s3470_s10, %s3463_s28 }
  0x59   : > { %p3467_p7 = pneg %p3466_p4 }
  0x5a   : > { %p3473_p2 = por %p3472_p8, %p3471_p13 }
  0x5c   : > { %p3474_p3 = pnand %p3473_p2, %p3467_p7 }
  0x5e   : > { %3477 = shalt.err (!%p3474_p3)
}
  0x5f   : > { %3041 = dma.hbm_to_vmem [thread:$0]  (!%p5219_p9), %s3693_s25, 64, %s3695_s19, %s3628_s6  }
  0x60   : > { %p5222_p6 = scmp.ne.s32.totalorder %s5216_s9, 0 }
  0x62   : > { %210 = sbr.rel (%p5222_p6) target bundleno = 1093 (0x445), region = 32 }
  0x69   : > { %p5223_p11 = scmp.ne.s32.totalorder %s5214_s7, 0 }
  0x6b   : > { %3503 = dma.done.wait (%p5223_p11), [#allocation5], 8192  }
  0x6c   : > { %3505 = vsyncadd (%p5223_p11), [#allocation5], 4294959104  ;;  %s5224_s21 = sadd.s32 4294967295, %s3532_s17   ;;  %s218_s23 = sand.u32 1, %s3516_s13  }
  0x6d   : > { %s216_s22 = sand.u32 1, %s5224_s21   ;;  %s2565_s5 = sshll.u32 %s218_s23, 11 }
  0x6e   : > { %s217_s27 = scalar_lea.sflag [#allocation7], %s216_s22  ;;  %s3749_s30 = scalar_lea.vmem [#allocation6], %s2565_s5 }
  0x6f   : > { %p5225_p9 = scmp.ne.s32.totalorder %s5215_s8, 0 }
  0x71   : > { %3507 = dma.done.wait (%p5225_p9), %s217_s27, 32832  }
  0x72   : > { %3509 = vsyncadd (%p5225_p9), %s217_s27, 4294934464  ;;  %s3755_s6 = sshll.u32 %s218_s23, 2  ;;  %p2567_p12 = scmp.ne.s32.totalorder %s3524_s15, 0 }
  0x73   : > { %s229_s7 = scalar_lea.vmem [#allocation8], %s3755_s6  ;;  %vm270_vm0 = vcmask (!%p2567_p12), 7168   ;;  %v3540_v0 = vmov (!%p2567_p12), -inf   ;;  %v3541_v1 = vmov (!%p2567_p12), 0.0  }
  0x74   : > { %269 = sbr.rel (%p2567_p12) target bundleno = 132 (0x84), region = 48  ;;  %271 = vst.msk [vmem:[#allocation2] sm:$0xff] (!%p2567_p12), %vm270_vm0, %v3540_v0  ;;  %272 = vst.msk [vmem:[#allocation2 + $0x8] sm:$0xff] (!%p2567_p12), %vm270_vm0, %v3540_v0 }
  0x75   : > { %273 = vst.msk [vmem:[#allocation2 + $0x10] sm:$0xff] (!%p2567_p12), %vm270_vm0, %v3540_v0  ;;  %274 = vst.msk [vmem:[#allocation2 + $0x18] sm:$0xff] (!%p2567_p12), %vm270_vm0, %v3540_v0 }
  0x76   : > { %275 = vst.msk [vmem:[#allocation2 + $0x20] sm:$0xff] (!%p2567_p12), %vm270_vm0, %v3540_v0  ;;  %276 = vst.msk [vmem:[#allocation2 + $0x28] sm:$0xff] (!%p2567_p12), %vm270_vm0, %v3540_v0 }
  0x77   : > { %277 = vst.msk [vmem:[#allocation2 + $0x30] sm:$0xff] (!%p2567_p12), %vm270_vm0, %v3540_v0  ;;  %278 = vst.msk [vmem:[#allocation2 + $0x38] sm:$0xff] (!%p2567_p12), %vm270_vm0, %v3540_v0 }
  0x78   : > { %279 = vst.msk [vmem:[#allocation2 + $0x40] sm:$0xff] (!%p2567_p12), %vm270_vm0, %v3540_v0  ;;  %280 = vst.msk [vmem:[#allocation2 + $0x48] sm:$0xff] (!%p2567_p12), %vm270_vm0, %v3540_v0 }
  0x79   : > { %281 = vst.msk [vmem:[#allocation2 + $0x50] sm:$0xff] (!%p2567_p12), %vm270_vm0, %v3540_v0  ;;  %282 = vst.msk [vmem:[#allocation2 + $0x58] sm:$0xff] (!%p2567_p12), %vm270_vm0, %v3540_v0 }
  0x7a   : > { %283 = vst.msk [vmem:[#allocation2 + $0x60] sm:$0xff] (!%p2567_p12), %vm270_vm0, %v3540_v0  ;;  %284 = vst.msk [vmem:[#allocation2 + $0x68] sm:$0xff] (!%p2567_p12), %vm270_vm0, %v3540_v0 }
  0x7b   : > { %285 = vst.msk [vmem:[#allocation2 + $0x70] sm:$0xff] %vm270_vm0, %v3540_v0  ;;  %286 = vst.msk [vmem:[#allocation2 + $0x78] sm:$0xff] %vm270_vm0, %v3540_v0 }
  0x7c   : > { %287 = vst.msk [vmem:[#allocation3] sm:$0xff] %vm270_vm0, %v3541_v1  ;;  %288 = vst.msk [vmem:[#allocation3 + $0x8] sm:$0xff] %vm270_vm0, %v3541_v1 }
  0x7d   : > { %289 = vst.msk [vmem:[#allocation3 + $0x10] sm:$0xff] %vm270_vm0, %v3541_v1  ;;  %290 = vst.msk [vmem:[#allocation3 + $0x18] sm:$0xff] %vm270_vm0, %v3541_v1 }
  0x7e   : > { %291 = vst.msk [vmem:[#allocation3 + $0x20] sm:$0xff] %vm270_vm0, %v3541_v1  ;;  %292 = vst.msk [vmem:[#allocation3 + $0x28] sm:$0xff] %vm270_vm0, %v3541_v1 }
  0x7f   : > { %293 = vst.msk [vmem:[#allocation3 + $0x30] sm:$0xff] %vm270_vm0, %v3541_v1  ;;  %294 = vst.msk [vmem:[#allocation3 + $0x38] sm:$0xff] %vm270_vm0, %v3541_v1 }
  0x80   : > { %295 = vst.msk [vmem:[#allocation3 + $0x40] sm:$0xff] %vm270_vm0, %v3541_v1  ;;  %296 = vst.msk [vmem:[#allocation3 + $0x48] sm:$0xff] %vm270_vm0, %v3541_v1 }
  0x81   : > { %297 = vst.msk [vmem:[#allocation3 + $0x50] sm:$0xff] %vm270_vm0, %v3541_v1  ;;  %298 = vst.msk [vmem:[#allocation3 + $0x58] sm:$0xff] %vm270_vm0, %v3541_v1 }
  0x82   : > { %299 = vst.msk [vmem:[#allocation3 + $0x60] sm:$0xff] %vm270_vm0, %v3541_v1  ;;  %300 = vst.msk [vmem:[#allocation3 + $0x68] sm:$0xff] %vm270_vm0, %v3541_v1 }
  0x83   : > { %301 = vst.msk [vmem:[#allocation3 + $0x70] sm:$0xff] %vm270_vm0, %v3541_v1  ;;  %302 = vst.msk [vmem:[#allocation3 + $0x78] sm:$0xff] %vm270_vm0, %v3541_v1 }
  0x84 PF: > { %v368_v2 = vld [vmem:[%s3749_s30 + $0x8] sm:$0xff]  ;;  %v370_v4 = vld [vmem:[%s3749_s30 + $0x18] sm:$0xff]  ;;  %v367_v7 = vld [vmem:[%s3749_s30] sm:$0xff]  ;;  %vm5211_vm1 = vcmask 7168   ;;  %p2632_p10 = scmp.ne.s32.totalorder %s3524_s15, 1 }
  0x85   : > { %v372_v3 = vld [vmem:[%s3749_s30 + $0x28] sm:$0xff]  ;;  %v374_v6 = vld [vmem:[%s3749_s30 + $0x38] sm:$0xff]  ;;  %v371_v8 = vld [vmem:[%s3749_s30 + $0x20] sm:$0xff] }
  0x86   : > { %v2639_v5 = vpack.c.bf16 %v372_v3, %v368_v2  ;;  %v2767_v9 = vpack.c.bf16 %v374_v6, %v370_v4  ;;  %v2641_v10 = vpack.c.bf16 %v371_v8, %v367_v7  ;;  %v369_v11 = vld [vmem:[%s3749_s30 + $0x10] sm:$0xff]  ;;  %v376_v13 = vld [vmem:[%s3749_s30 + $0x48] sm:$0xff]  ;;  %v378_v16 = vld [vmem:[%s3749_s30 + $0x58] sm:$0xff] }
  0x87   : > { %v373_v12 = vld [vmem:[%s3749_s30 + $0x30] sm:$0xff]  ;;  %v380_v15 = vld [vmem:[%s3749_s30 + $0x68] sm:$0xff]  ;;  %v382_v17 = vld [vmem:[%s3749_s30 + $0x78] sm:$0xff] }
  0x88   : > { %2640 = vmatprep.subr.bf16.mxu0 %v2639_v5  ;;  %v2769_v14 = vpack.c.bf16 %v373_v12, %v369_v11  ;;  %2768 = vmatprep.subr.bf16.mxu1 %v2767_v9  ;;  %v2643_v18 = vpack.c.bf16 %v380_v15, %v376_v13  ;;  %v2771_v19 = vpack.c.bf16 %v382_v17, %v378_v16  ;;  %v375_v20 = vld [vmem:[%s3749_s30 + $0x40] sm:$0xff]  ;;  %v377_v22 = vld [vmem:[%s3749_s30 + $0x50] sm:$0xff]  ;;  %v384_v25 = vld [vmem:[%s3749_s30 + $0x88] sm:$0xff] }
  0x89   : > { %2642 = vmatpush1.bf16.msra.mxu0 %v2641_v10  ;;  %v379_v21 = vld [vmem:[%s3749_s30 + $0x60] sm:$0xff]  ;;  %v381_v24 = vld [vmem:[%s3749_s30 + $0x70] sm:$0xff]  ;;  %v388_v26 = vld [vmem:[%s3749_s30 + $0xa8] sm:$0xff] }
  0x8a   : > { %2770 = vmatpush1.bf16.msra.mxu1 %v2769_v14  ;;  %v2645_v23 = vpack.c.bf16 %v379_v21, %v375_v20  ;;  %2644 = vmatprep.subr.bf16.mxu0 %v2643_v18  ;;  %v2773_v27 = vpack.c.bf16 %v381_v24, %v377_v22  ;;  %v2647_v28 = vpack.c.bf16 %v388_v26, %v384_v25  ;;  %v386_v29 = vld [vmem:[%s3749_s30 + $0x98] sm:$0xff]  ;;  %v383_v31 = vld [vmem:[%s3749_s30 + $0x80] sm:$0xff]  ;;  %v385_v34 = vld [vmem:[%s3749_s30 + $0x90] sm:$0xff] }
  0x8b   : > { %2772 = vmatprep.subr.bf16.mxu1 %v2771_v19  ;;  %v390_v30 = vld [vmem:[%s3749_s30 + $0xb8] sm:$0xff]  ;;  %v387_v33 = vld [vmem:[%s3749_s30 + $0xa0] sm:$0xff]  ;;  %v389_v35 = vld [vmem:[%s3749_s30 + $0xb0] sm:$0xff] }
  0x8c   : > { %v2775_v32 = vpack.c.bf16 %v390_v30, %v386_v29  ;;  %v2649_v36 = vpack.c.bf16 %v387_v33, %v383_v31  ;;  %v392_v37 = vld [vmem:[%s3749_s30 + $0xc8] sm:$0xff]  ;;  %v394_v39 = vld [vmem:[%s3749_s30 + $0xd8] sm:$0xff]  ;;  %v2777_v40 = vpack.c.bf16 %v389_v35, %v385_v34  ;;  %v391_v43 = vld [vmem:[%s3749_s30 + $0xc0] sm:$0xff] }
  0x8d   : > { %2646 = vmatpush1.bf16.msra.mxu0 %v2645_v23  ;;  %v396_v38 = vld [vmem:[%s3749_s30 + $0xe8] sm:$0xff]  ;;  %v398_v42 = vld [vmem:[%s3749_s30 + $0xf8] sm:$0xff]  ;;  %v395_v44 = vld [vmem:[%s3749_s30 + $0xe0] sm:$0xff] }
  0x8e   : > { %2774 = vmatpush1.bf16.msra.mxu1 %v2773_v27  ;;  %2648 = vmatprep.subr.bf16.mxu0 %v2647_v28  ;;  %v2651_v41 = vpack.c.bf16 %v396_v38, %v392_v37  ;;  %v2779_v45 = vpack.c.bf16 %v398_v42, %v394_v39  ;;  %v393_v46 = vld [vmem:[%s3749_s30 + $0xd0] sm:$0xff]  ;;  %v400_v48 = vld [vmem:[%s3749_s30 + $0x108] sm:$0xff]  ;;  %v402_v50 = vld [vmem:[%s3749_s30 + $0x118] sm:$0xff]  ;;  %v2653_v52 = vpack.c.bf16 %v395_v44, %v391_v43 }
  0x8f   : > { %2776 = vmatprep.subr.bf16.mxu1 %v2775_v32  ;;  %v397_v47 = vld [vmem:[%s3749_s30 + $0xf0] sm:$0xff]  ;;  %v404_v49 = vld [vmem:[%s3749_s30 + $0x128] sm:$0xff]  ;;  %v406_v51 = vld [vmem:[%s3749_s30 + $0x138] sm:$0xff] }
  0x90   : > { %v2781_v53 = vpack.c.bf16 %v397_v47, %v393_v46  ;;  %v2655_v54 = vpack.c.bf16 %v404_v49, %v400_v48  ;;  %v399_v55 = vld [vmem:[%s3749_s30 + $0x100] sm:$0xff]  ;;  %v401_v57 = vld [vmem:[%s3749_s30 + $0x110] sm:$0xff]  ;;  %v2783_v58 = vpack.c.bf16 %v406_v51, %v402_v50  ;;  %v408_v60 = vld [vmem:[%s3749_s30 + $0x148] sm:$0xff] }
  0x91   : > { %2650 = vmatpush1.bf16.msra.mxu0 %v2649_v36  ;;  %v403_v56 = vld [vmem:[%s3749_s30 + $0x120] sm:$0xff]  ;;  %v405_v59 = vld [vmem:[%s3749_s30 + $0x130] sm:$0xff]  ;;  %v412_v61 = vld [vmem:[%s3749_s30 + $0x168] sm:$0xff] }
  0x92   : > { %2778 = vmatpush1.bf16.msra.mxu1 %v2777_v40  ;;  %2652 = vmatprep.subr.bf16.mxu0 %v2651_v41  ;;  %v410_v62 = vld [vmem:[%s3749_s30 + $0x158] sm:$0xff]  ;;  %v2657_v0 = vpack.c.bf16 %v403_v56, %v399_v55  ;;  %v2785_v1 = vpack.c.bf16 %v405_v59, %v401_v57  ;;  %v2659_v2 = vpack.c.bf16 %v412_v61, %v408_v60  ;;  %v407_v3 = vld [vmem:[%s3749_s30 + $0x140] sm:$0xff]  ;;  %v409_v5 = vld [vmem:[%s3749_s30 + $0x150] sm:$0xff] }
  0x93   : > { %2780 = vmatprep.subr.bf16.mxu1 %v2779_v45  ;;  %v414_v63 = vld [vmem:[%s3749_s30 + $0x178] sm:$0xff]  ;;  %v411_v4 = vld [vmem:[%s3749_s30 + $0x160] sm:$0xff]  ;;  %v413_v7 = vld [vmem:[%s3749_s30 + $0x170] sm:$0xff] }
  0x94   : > { %v2787_v6 = vpack.c.bf16 %v414_v63, %v410_v62  ;;  %v416_v8 = vld [vmem:[%s3749_s30 + $0x188] sm:$0xff]  ;;  %v418_v10 = vld [vmem:[%s3749_s30 + $0x198] sm:$0xff]  ;;  %v2661_v12 = vpack.c.bf16 %v411_v4, %v407_v3  ;;  %v2789_v13 = vpack.c.bf16 %v413_v7, %v409_v5  ;;  %v415_v15 = vld [vmem:[%s3749_s30 + $0x180] sm:$0xff] }
  0x95   : > { %2654 = vmatpush1.bf16.msra.mxu0 %v2653_v52  ;;  %v420_v9 = vld [vmem:[%s3749_s30 + $0x1a8] sm:$0xff]  ;;  %v422_v11 = vld [vmem:[%s3749_s30 + $0x1b8] sm:$0xff]  ;;  %v419_v16 = vld [vmem:[%s3749_s30 + $0x1a0] sm:$0xff] }
  0x96   : > { %2782 = vmatpush1.bf16.msra.mxu1 %v2781_v53  ;;  %2656 = vmatprep.subr.bf16.mxu0 %v2655_v54  ;;  %v2663_v14 = vpack.c.bf16 %v420_v9, %v416_v8  ;;  %v417_v17 = vld [vmem:[%s3749_s30 + $0x190] sm:$0xff]  ;;  %v2791_v18 = vpack.c.bf16 %v422_v11, %v418_v10  ;;  %v424_v20 = vld [vmem:[%s3749_s30 + $0x1c8] sm:$0xff]  ;;  %v426_v22 = vld [vmem:[%s3749_s30 + $0x1d8] sm:$0xff]  ;;  %v2665_v24 = vpack.c.bf16 %v419_v16, %v415_v15 }
  0x97   : > { %2784 = vmatprep.subr.bf16.mxu1 %v2783_v58  ;;  %v421_v19 = vld [vmem:[%s3749_s30 + $0x1b0] sm:$0xff]  ;;  %v428_v21 = vld [vmem:[%s3749_s30 + $0x1e8] sm:$0xff]  ;;  %v430_v23 = vld [vmem:[%s3749_s30 + $0x1f8] sm:$0xff] }
  0x98   : > { %v2793_v25 = vpack.c.bf16 %v421_v19, %v417_v17  ;;  %v2667_v26 = vpack.c.bf16 %v428_v21, %v424_v20  ;;  %v423_v27 = vld [vmem:[%s3749_s30 + $0x1c0] sm:$0xff]  ;;  %v425_v29 = vld [vmem:[%s3749_s30 + $0x1d0] sm:$0xff]  ;;  %v2795_v30 = vpack.c.bf16 %v430_v23, %v426_v22  ;;  %v432_v32 = vld [vmem:[%s3749_s30 + $0x208] sm:$0xff] }
  0x99   : > { %2658 = vmatpush1.bf16.msra.mxu0 %v2657_v0  ;;  %v427_v28 = vld [vmem:[%s3749_s30 + $0x1e0] sm:$0xff]  ;;  %v429_v31 = vld [vmem:[%s3749_s30 + $0x1f0] sm:$0xff]  ;;  %v436_v33 = vld [vmem:[%s3749_s30 + $0x228] sm:$0xff] }
  0x9a   : > { %2786 = vmatpush1.bf16.msra.mxu1 %v2785_v1  ;;  %2660 = vmatprep.subr.bf16.mxu0 %v2659_v2  ;;  %v434_v34 = vld [vmem:[%s3749_s30 + $0x218] sm:$0xff]  ;;  %v2669_v36 = vpack.c.bf16 %v427_v28, %v423_v27  ;;  %v2797_v37 = vpack.c.bf16 %v429_v31, %v425_v29  ;;  %v2671_v38 = vpack.c.bf16 %v436_v33, %v432_v32  ;;  %v431_v39 = vld [vmem:[%s3749_s30 + $0x200] sm:$0xff]  ;;  %v433_v41 = vld [vmem:[%s3749_s30 + $0x210] sm:$0xff] }
  0x9b   : > { %2788 = vmatprep.subr.bf16.mxu1 %v2787_v6  ;;  %v438_v35 = vld [vmem:[%s3749_s30 + $0x238] sm:$0xff]  ;;  %v435_v40 = vld [vmem:[%s3749_s30 + $0x220] sm:$0xff]  ;;  %v437_v43 = vld [vmem:[%s3749_s30 + $0x230] sm:$0xff] }
  0x9c   : > { %v2799_v42 = vpack.c.bf16 %v438_v35, %v434_v34  ;;  %v440_v44 = vld [vmem:[%s3749_s30 + $0x248] sm:$0xff]  ;;  %v442_v46 = vld [vmem:[%s3749_s30 + $0x258] sm:$0xff]  ;;  %v2673_v48 = vpack.c.bf16 %v435_v40, %v431_v39  ;;  %v2801_v49 = vpack.c.bf16 %v437_v43, %v433_v41  ;;  %v439_v51 = vld [vmem:[%s3749_s30 + $0x240] sm:$0xff] }
  0x9d   : > { %2662 = vmatpush1.bf16.msra.mxu0 %v2661_v12  ;;  %v444_v45 = vld [vmem:[%s3749_s30 + $0x268] sm:$0xff]  ;;  %v446_v47 = vld [vmem:[%s3749_s30 + $0x278] sm:$0xff]  ;;  %v443_v52 = vld [vmem:[%s3749_s30 + $0x260] sm:$0xff] }
  0x9e   : > { %2790 = vmatpush1.bf16.msra.mxu1 %v2789_v13  ;;  %2664 = vmatprep.subr.bf16.mxu0 %v2663_v14  ;;  %v2675_v50 = vpack.c.bf16 %v444_v45, %v440_v44  ;;  %v441_v53 = vld [vmem:[%s3749_s30 + $0x250] sm:$0xff]  ;;  %v2803_v54 = vpack.c.bf16 %v446_v47, %v442_v46  ;;  %v448_v56 = vld [vmem:[%s3749_s30 + $0x288] sm:$0xff]  ;;  %v450_v58 = vld [vmem:[%s3749_s30 + $0x298] sm:$0xff]  ;;  %v2677_v60 = vpack.c.bf16 %v443_v52, %v439_v51 }
  0x9f   : > { %2792 = vmatprep.subr.bf16.mxu1 %v2791_v18  ;;  %v445_v55 = vld [vmem:[%s3749_s30 + $0x270] sm:$0xff]  ;;  %v452_v57 = vld [vmem:[%s3749_s30 + $0x2a8] sm:$0xff]  ;;  %v454_v59 = vld [vmem:[%s3749_s30 + $0x2b8] sm:$0xff] }
  0xa0   : > { %v2805_v61 = vpack.c.bf16 %v445_v55, %v441_v53  ;;  %v2679_v62 = vpack.c.bf16 %v452_v57, %v448_v56  ;;  %v447_v63 = vld [vmem:[%s3749_s30 + $0x280] sm:$0xff]  ;;  %v449_v1 = vld [vmem:[%s3749_s30 + $0x290] sm:$0xff]  ;;  %v2807_v2 = vpack.c.bf16 %v454_v59, %v450_v58  ;;  %v456_v4 = vld [vmem:[%s3749_s30 + $0x2c8] sm:$0xff] }
  0xa1   : > { %2666 = vmatpush1.bf16.msra.mxu0 %v2665_v24  ;;  %v451_v0 = vld [vmem:[%s3749_s30 + $0x2a0] sm:$0xff]  ;;  %v453_v3 = vld [vmem:[%s3749_s30 + $0x2b0] sm:$0xff]  ;;  %v460_v5 = vld [vmem:[%s3749_s30 + $0x2e8] sm:$0xff] }
  0xa2   : > { %2794 = vmatpush1.bf16.msra.mxu1 %v2793_v25  ;;  %2668 = vmatprep.subr.bf16.mxu0 %v2667_v26  ;;  %v458_v6 = vld [vmem:[%s3749_s30 + $0x2d8] sm:$0xff]  ;;  %v2681_v8 = vpack.c.bf16 %v451_v0, %v447_v63  ;;  %v455_v9 = vld [vmem:[%s3749_s30 + $0x2c0] sm:$0xff]  ;;  %v2809_v10 = vpack.c.bf16 %v453_v3, %v449_v1  ;;  %v2683_v11 = vpack.c.bf16 %v460_v5, %v456_v4  ;;  %v457_v13 = vld [vmem:[%s3749_s30 + $0x2d0] sm:$0xff] }
  0xa3   : > { %2796 = vmatprep.subr.bf16.mxu1 %v2795_v30  ;;  %v462_v7 = vld [vmem:[%s3749_s30 + $0x2f8] sm:$0xff]  ;;  %v459_v12 = vld [vmem:[%s3749_s30 + $0x2e0] sm:$0xff]  ;;  %v461_v14 = vld [vmem:[%s3749_s30 + $0x2f0] sm:$0xff] }
  0xa4   : > { %v2811_v15 = vpack.c.bf16 %v462_v7, %v458_v6  ;;  %v464_v16 = vld [vmem:[%s3749_s30 + $0x308] sm:$0xff]  ;;  %v466_v19 = vld [vmem:[%s3749_s30 + $0x318] sm:$0xff]  ;;  %v2685_v21 = vpack.c.bf16 %v459_v12, %v455_v9  ;;  %v2813_v22 = vpack.c.bf16 %v461_v14, %v457_v13  ;;  %v463_v24 = vld [vmem:[%s3749_s30 + $0x300] sm:$0xff] }
  0xa5   : > { %2670 = vmatpush1.bf16.msra.mxu0 %v2669_v36  ;;  %v468_v17 = vld [vmem:[%s3749_s30 + $0x328] sm:$0xff]  ;;  %v470_v20 = vld [vmem:[%s3749_s30 + $0x338] sm:$0xff]  ;;  %v467_v25 = vld [vmem:[%s3749_s30 + $0x320] sm:$0xff] }
  0xa6   : > { %2798 = vmatpush1.bf16.msra.mxu1 %v2797_v37  ;;  %2672 = vmatprep.subr.bf16.mxu0 %v2671_v38  ;;  %v304_v18 = vld [vmem:[#allocation4 + $0x8] sm:$0xff]  ;;  %v2687_v23 = vpack.c.bf16 %v468_v17, %v464_v16  ;;  %v465_v26 = vld [vmem:[%s3749_s30 + $0x310] sm:$0xff]  ;;  %v2815_v27 = vpack.c.bf16 %v470_v20, %v466_v19  ;;  %v474_v31 = vld [vmem:[%s3749_s30 + $0x358] sm:$0xff]  ;;  %v2689_v33 = vpack.c.bf16 %v467_v25, %v463_v24 }
  0xa7   : > { %2800 = vmatprep.subr.bf16.mxu1 %v2799_v42  ;;  %709 = vmatprep.mubr.f32.mxu0 %v304_v18  ;;  %v469_v28 = vld [vmem:[%s3749_s30 + $0x330] sm:$0xff]  ;;  %v472_v29 = vld [vmem:[%s3749_s30 + $0x348] sm:$0xff]  ;;  %v478_v32 = vld [vmem:[%s3749_s30 + $0x378] sm:$0xff] }
  0xa8   : > { %1031 = vmatprep.mubr.f32.mxu1 %v304_v18  ;;  %v476_v30 = vld [vmem:[%s3749_s30 + $0x368] sm:$0xff]  ;;  %v2817_v34 = vpack.c.bf16 %v469_v28, %v465_v26  ;;  %v471_v36 = vld [vmem:[%s3749_s30 + $0x340] sm:$0xff]  ;;  %v473_v38 = vld [vmem:[%s3749_s30 + $0x350] sm:$0xff]  ;;  %v2819_v39 = vpack.c.bf16 %v478_v32, %v474_v31 }
  0xa9   : > { %2674 = vmatpush1.bf16.msra.mxu0 %v2673_v48  ;;  %v2691_v35 = vpack.c.bf16 %v476_v30, %v472_v29  ;;  %v475_v37 = vld [vmem:[%s3749_s30 + $0x360] sm:$0xff]  ;;  %v477_v40 = vld [vmem:[%s3749_s30 + $0x370] sm:$0xff]  ;;  %v480_v41 = vld [vmem:[%s3749_s30 + $0x388] sm:$0xff] }
  0xaa   : > { %2802 = vmatpush1.bf16.msra.mxu1 %v2801_v49  ;;  %2676 = vmatprep.subr.bf16.mxu0 %v2675_v50  ;;  %v484_v42 = vld [vmem:[%s3749_s30 + $0x3a8] sm:$0xff]  ;;  %v482_v43 = vld [vmem:[%s3749_s30 + $0x398] sm:$0xff]  ;;  %v2693_v45 = vpack.c.bf16 %v475_v37, %v471_v36  ;;  %v2821_v46 = vpack.c.bf16 %v477_v40, %v473_v38  ;;  %v479_v48 = vld [vmem:[%s3749_s30 + $0x380] sm:$0xff] }
  0xab   : > { %2804 = vmatprep.subr.bf16.mxu1 %v2803_v54  ;;  %v486_v44 = vld [vmem:[%s3749_s30 + $0x3b8] sm:$0xff]  ;;  %v2695_v47 = vpack.c.bf16 %v484_v42, %v480_v41  ;;  %v483_v49 = vld [vmem:[%s3749_s30 + $0x3a0] sm:$0xff]  ;;  %v481_v50 = vld [vmem:[%s3749_s30 + $0x390] sm:$0xff] }
  0xac   : > { %v2823_v51 = vpack.c.bf16 %v486_v44, %v482_v43  ;;  %v485_v52 = vld [vmem:[%s3749_s30 + $0x3b0] sm:$0xff]  ;;  %v488_v53 = vld [vmem:[%s3749_s30 + $0x3c8] sm:$0xff]  ;;  %v490_v55 = vld [vmem:[%s3749_s30 + $0x3d8] sm:$0xff]  ;;  %v2697_v57 = vpack.c.bf16 %v483_v49, %v479_v48 }
  0xad   : > { %2678 = vmatpush1.bf16.msra.mxu0 %v2677_v60  ;;  %v492_v54 = vld [vmem:[%s3749_s30 + $0x3e8] sm:$0xff]  ;;  %v494_v56 = vld [vmem:[%s3749_s30 + $0x3f8] sm:$0xff]  ;;  %v2825_v58 = vpack.c.bf16 %v485_v52, %v481_v50  ;;  %v487_v60 = vld [vmem:[%s3749_s30 + $0x3c0] sm:$0xff] }
  0xae   : > { %2806 = vmatpush1.bf16.msra.mxu1 %v2805_v61  ;;  %2680 = vmatprep.subr.bf16.mxu0 %v2679_v62  ;;  %v2699_v59 = vpack.c.bf16 %v492_v54, %v488_v53  ;;  %v491_v61 = vld [vmem:[%s3749_s30 + $0x3e0] sm:$0xff]  ;;  %v489_v62 = vld [vmem:[%s3749_s30 + $0x3d0] sm:$0xff]  ;;  %v2827_v63 = vpack.c.bf16 %v494_v56, %v490_v55  ;;  %v496_v1 = vld [vmem:[%s3749_s30 + $0x408] sm:$0xff] }
  0xaf   : > { %2808 = vmatprep.subr.bf16.mxu1 %v2807_v2  ;;  %v493_v0 = vld [vmem:[%s3749_s30 + $0x3f0] sm:$0xff]  ;;  %v500_v2 = vld [vmem:[%s3749_s30 + $0x428] sm:$0xff]  ;;  %v498_v3 = vld [vmem:[%s3749_s30 + $0x418] sm:$0xff]  ;;  %v2701_v5 = vpack.c.bf16 %v491_v61, %v487_v60 }
  0xb0   : > { %v502_v4 = vld [vmem:[%s3749_s30 + $0x438] sm:$0xff]  ;;  %v2829_v6 = vpack.c.bf16 %v493_v0, %v489_v62  ;;  %v2703_v7 = vpack.c.bf16 %v500_v2, %v496_v1  ;;  %v499_v9 = vld [vmem:[%s3749_s30 + $0x420] sm:$0xff]  ;;  %v501_v12 = vld [vmem:[%s3749_s30 + $0x430] sm:$0xff] }
  0xb1   : > { %2682 = vmatpush1.bf16.msra.mxu0 %v2681_v8  ;;  %v495_v8 = vld [vmem:[%s3749_s30 + $0x400] sm:$0xff]  ;;  %v504_v13 = vld [vmem:[%s3749_s30 + $0x448] sm:$0xff]  ;;  %v506_v17 = vld [vmem:[%s3749_s30 + $0x458] sm:$0xff] }
  0xb2   : > { %2810 = vmatpush1.bf16.msra.mxu1 %v2809_v10  ;;  %2684 = vmatprep.subr.bf16.mxu0 %v2683_v11  ;;  %v2831_v10 = vpack.c.bf16 %v502_v4, %v498_v3  ;;  %v497_v11 = vld [vmem:[%s3749_s30 + $0x410] sm:$0xff]  ;;  %v508_v14 = vld [vmem:[%s3749_s30 + $0x468] sm:$0xff]  ;;  %v2705_v16 = vpack.c.bf16 %v499_v9, %v495_v8  ;;  %v510_v18 = vld [vmem:[%s3749_s30 + $0x478] sm:$0xff] }
  0xb3   : > { %2812 = vmatprep.subr.bf16.mxu1 %v2811_v15  ;;  %v303_v15 = vld [vmem:[#allocation4] sm:$0xff]  ;;  %v2833_v19 = vpack.c.bf16 %v501_v12, %v497_v11  ;;  %v505_v24 = vld [vmem:[%s3749_s30 + $0x450] sm:$0xff]  ;;  %v2835_v26 = vpack.c.bf16 %v510_v18, %v506_v17  ;;  %v516_v28 = vld [vmem:[%s3749_s30 + $0x4a8] sm:$0xff] }
  0xb4   : > { %v503_v20 = vld [vmem:[%s3749_s30 + $0x440] sm:$0xff]  ;;  %v509_v25 = vld [vmem:[%s3749_s30 + $0x470] sm:$0xff]  ;;  %v514_v31 = vld [vmem:[%s3749_s30 + $0x498] sm:$0xff] }
  0xb5   : > { %2686 = vmatpush1.bf16.msra.mxu0 %v2685_v21  ;;  %v507_v21 = vld [vmem:[%s3749_s30 + $0x460] sm:$0xff]  ;;  %v518_v32 = vld [vmem:[%s3749_s30 + $0x4b8] sm:$0xff]  ;;  %v312_v36 = vld [vmem:[#allocation4 + $0x48] sm:$0xff] }
  0xb6   : > { %2814 = vmatpush1.bf16.msra.mxu1 %v2813_v22  ;;  %2688 = vmatprep.subr.bf16.mxu0 %v2687_v23  ;;  %v308_v22 = vld [vmem:[#allocation4 + $0x28] sm:$0xff]  ;;  %v2707_v23 = vpack.c.bf16 %v508_v14, %v504_v13  ;;  %v307_v29 = vld [vmem:[#allocation4 + $0x20] sm:$0xff]  ;;  %v2709_v30 = vpack.c.bf16 %v507_v21, %v503_v20  ;;  %v513_v38 = vld [vmem:[%s3749_s30 + $0x490] sm:$0xff]  ;;  %v2839_v40 = vpack.c.bf16 %v518_v32, %v514_v31 }
  0xb7   : > { %2816 = vmatprep.subr.bf16.mxu1 %v2815_v27  ;;  %v512_v27 = vld [vmem:[%s3749_s30 + $0x488] sm:$0xff]  ;;  %v311_v43 = vld [vmem:[#allocation4 + $0x40] sm:$0xff]  ;;  %v521_v52 = vld [vmem:[%s3749_s30 + $0x4d0] sm:$0xff] }
  0xb8   : > { %v2711_v37 = vpack.c.bf16 %v516_v28, %v512_v27  ;;  %v520_v41 = vld [vmem:[%s3749_s30 + $0x4c8] sm:$0xff]  ;;  %v519_v48 = vld [vmem:[%s3749_s30 + $0x4c0] sm:$0xff]  ;;  %v525_v53 = vld [vmem:[%s3749_s30 + $0x4f0] sm:$0xff] }
  0xb9   : > { %2690 = vmatpush1.bf16.msra.mxu0 %v2689_v33  ;;  %v2837_v33 = vpack.c.bf16 %v509_v25, %v505_v24  ;;  %v524_v42 = vld [vmem:[%s3749_s30 + $0x4e8] sm:$0xff]  ;;  %v523_v49 = vld [vmem:[%s3749_s30 + $0x4e0] sm:$0xff]  ;;  %v534_v60 = vld [vmem:[%s3749_s30 + $0x538] sm:$0xff]  ;;  %v2845_v61 = vpack.c.bf16 %v525_v53, %v521_v52 }
  0xba   : > { %2818 = vmatpush1.bf16.msra.mxu1 %v2817_v34  ;;  %2692 = vmatprep.subr.bf16.mxu0 %v2691_v35  ;;  %v511_v34 = vld [vmem:[%s3749_s30 + $0x480] sm:$0xff]  ;;  %v316_v50 = vld [vmem:[#allocation4 + $0x68] sm:$0xff]  ;;  %v529_v2 = vld [vmem:[%s3749_s30 + $0x510] sm:$0xff] }
  0xbb   : > { %2820 = vmatprep.subr.bf16.mxu1 %v2819_v39  ;;  %v515_v35 = vld [vmem:[%s3749_s30 + $0x4a0] sm:$0xff]  ;;  %v517_v39 = vld [vmem:[%s3749_s30 + $0x4b0] sm:$0xff]  ;;  %v528_v55 = vld [vmem:[%s3749_s30 + $0x508] sm:$0xff] }
  0xbc   : > { %v2713_v44 = vpack.c.bf16 %v515_v35, %v511_v34  ;;  %v532_v56 = vld [vmem:[%s3749_s30 + $0x528] sm:$0xff]  ;;  %v527_v62 = vld [vmem:[%s3749_s30 + $0x500] sm:$0xff]  ;;  %v533_v3 = vld [vmem:[%s3749_s30 + $0x530] sm:$0xff] }
  0xbd   : > { %2694 = vmatpush1.bf16.msra.mxu0 %v2693_v45  ;;  %v522_v45 = vld [vmem:[%s3749_s30 + $0x4d8] sm:$0xff]  ;;  %v320_v0 = vld [vmem:[#allocation4 + $0x88] sm:$0xff]  ;;  %v2719_v1 = vpack.c.bf16 %v532_v56, %v528_v55  ;;  %v2849_v11 = vpack.c.bf16 %v533_v3, %v529_v2  ;;  %v535_v12 = vld [vmem:[%s3749_s30 + $0x540] sm:$0xff] }
  0xbe   : > { %2822 = vmatpush1.bf16.msra.mxu1 %v2821_v46  ;;  %2696 = vmatprep.subr.bf16.mxu0 %v2695_v47  ;;  %v526_v46 = vld [vmem:[%s3749_s30 + $0x4f8] sm:$0xff]  ;;  %v2841_v47 = vpack.c.bf16 %v517_v39, %v513_v38  ;;  %v539_v13 = vld [vmem:[%s3749_s30 + $0x560] sm:$0xff]  ;;  %v324_v14 = vld [vmem:[#allocation4 + $0xa8] sm:$0xff] }
  0xbf   : > { %2824 = vmatprep.subr.bf16.mxu1 %v2823_v51  ;;  %v2715_v51 = vpack.c.bf16 %v524_v42, %v520_v41  ;;  %v2843_v54 = vpack.c.bf16 %v526_v46, %v522_v45  ;;  %v538_v9 = vld [vmem:[%s3749_s30 + $0x558] sm:$0xff]  ;;  %v541_v17 = vld [vmem:[%s3749_s30 + $0x570] sm:$0xff]  ;;  %v548_v20 = vld [vmem:[%s3749_s30 + $0x5a8] sm:$0xff] }
  0xc0   : > { %v323_v21 = vld [vmem:[#allocation4 + $0xa0] sm:$0xff]  ;;  %v550_v24 = vld [vmem:[%s3749_s30 + $0x5b8] sm:$0xff]  ;;  %v328_v28 = vld [vmem:[#allocation4 + $0xc8] sm:$0xff] }
  0xc1   : > { %2698 = vmatpush1.bf16.msra.mxu0 %v2697_v57  ;;  %v315_v57 = vld [vmem:[#allocation4 + $0x60] sm:$0xff]  ;;  %v549_v31 = vld [vmem:[%s3749_s30 + $0x5b0] sm:$0xff]  ;;  %v556_v34 = vld [vmem:[%s3749_s30 + $0x5e8] sm:$0xff] }
  0xc2   : > { %2826 = vmatpush1.bf16.msra.mxu1 %v2825_v58  ;;  %2700 = vmatprep.subr.bf16.mxu0 %v2699_v59  ;;  %v2717_v58 = vpack.c.bf16 %v523_v49, %v519_v48  ;;  %v530_v59 = vld [vmem:[%s3749_s30 + $0x518] sm:$0xff]  ;;  %v547_v27 = vld [vmem:[%s3749_s30 + $0x5a0] sm:$0xff]  ;;  %v332_v42 = vld [vmem:[#allocation4 + $0xe8] sm:$0xff] }
  0xc3   : > { %2828 = vmatprep.subr.bf16.mxu1 %v2827_v63  ;;  %v531_v63 = vld [vmem:[%s3749_s30 + $0x520] sm:$0xff]  ;;  %v2847_v4 = vpack.c.bf16 %v534_v60, %v530_v59  ;;  %v558_v38 = vld [vmem:[%s3749_s30 + $0x5f8] sm:$0xff]  ;;  %v557_v45 = vld [vmem:[%s3749_s30 + $0x5f0] sm:$0xff] }
  0xc4   : > { %v2721_v8 = vpack.c.bf16 %v531_v63, %v527_v62  ;;  %v327_v35 = vld [vmem:[#allocation4 + $0xc0] sm:$0xff]  ;;  %v564_v48 = vld [vmem:[%s3749_s30 + $0x628] sm:$0xff]  ;;  %v566_v52 = vld [vmem:[%s3749_s30 + $0x638] sm:$0xff] }
  0xc5   : > { %2702 = vmatpush1.bf16.msra.mxu0 %v2701_v5  ;;  %v536_v5 = vld [vmem:[%s3749_s30 + $0x548] sm:$0xff]  ;;  %v555_v41 = vld [vmem:[%s3749_s30 + $0x5e0] sm:$0xff]  ;;  %v565_v59 = vld [vmem:[%s3749_s30 + $0x630] sm:$0xff] }
  0xc6   : > { %2830 = vmatpush1.bf16.msra.mxu1 %v2829_v6  ;;  %2704 = vmatprep.subr.bf16.mxu0 %v2703_v7  ;;  %v540_v6 = vld [vmem:[%s3749_s30 + $0x568] sm:$0xff]  ;;  %v319_v7 = vld [vmem:[#allocation4 + $0x80] sm:$0xff]  ;;  %v574_v2 = vld [vmem:[%s3749_s30 + $0x678] sm:$0xff] }
  0xc7   : > { %2832 = vmatprep.subr.bf16.mxu1 %v2831_v10  ;;  %v542_v10 = vld [vmem:[%s3749_s30 + $0x578] sm:$0xff]  ;;  %v331_v49 = vld [vmem:[#allocation4 + $0xe0] sm:$0xff]  ;;  %v336_v56 = vld [vmem:[#allocation4 + $0x108] sm:$0xff] }
  0xc8   : > { %710 = vmatmul.mubr.f32.vlgmr.msra.gmra.mrb[0].mxu0 %v303_v15  ;;  %v2851_v18 = vpack.c.bf16 %v542_v10, %v538_v9  ;;  %v563_v55 = vld [vmem:[%s3749_s30 + $0x620] sm:$0xff]  ;;  %v572_v62 = vld [vmem:[%s3749_s30 + $0x668] sm:$0xff]  ;;  %v573_v9 = vld [vmem:[%s3749_s30 + $0x670] sm:$0xff] }
  0xc9   : > { %1032 = vmatmul.mubr.f32.vlgmr.msra.gmra.mrb[0].mxu1 %v303_v15  ;;  %2706 = vmatpush1.bf16.msra.mxu0 %v2705_v16  ;;  %v2723_v15 = vpack.c.bf16 %v540_v6, %v536_v5  ;;  %v537_v16 = vld [vmem:[%s3749_s30 + $0x550] sm:$0xff]  ;;  %v335_v63 = vld [vmem:[#allocation4 + $0x100] sm:$0xff]  ;;  %v340_v6 = vld [vmem:[#allocation4 + $0x128] sm:$0xff] }
  0xca   : > { %2834 = vmatpush1.bf16.msra.mxu1 %v2833_v19  ;;  %715 = vmatprep.mubr.f32.mxu0 %v308_v22  ;;  %v544_v19 = vld [vmem:[%s3749_s30 + $0x588] sm:$0xff]  ;;  %v2853_v25 = vpack.c.bf16 %v541_v17, %v537_v16  ;;  %v571_v5 = vld [vmem:[%s3749_s30 + $0x660] sm:$0xff]  ;;  %v582_v16 = vld [vmem:[%s3749_s30 + $0x6b8] sm:$0xff] }
  0xcb   : > { %1037 = vmatprep.mubr.f32.mxu1 %v308_v22  ;;  %2708 = vmatprep.subr.bf16.mxu0 %v2707_v23  ;;  %v2725_v22 = vpack.c.bf16 %v539_v13, %v535_v12  ;;  %v546_v23 = vld [vmem:[%s3749_s30 + $0x598] sm:$0xff]  ;;  %v580_v12 = vld [vmem:[%s3749_s30 + $0x6a8] sm:$0xff]  ;;  %v339_v13 = vld [vmem:[#allocation4 + $0x120] sm:$0xff] }
  0xcc   : > { %716 = vmatmul.mubr.f32.gmra.mrb[2].mxu0 %v307_v29  ;;  %2836 = vmatprep.subr.bf16.mxu1 %v2835_v26  ;;  %v543_v26 = vld [vmem:[%s3749_s30 + $0x580] sm:$0xff]  ;;  %v2855_v32 = vpack.c.bf16 %v550_v24, %v546_v23  ;;  %v581_v23 = vld [vmem:[%s3749_s30 + $0x6b0] sm:$0xff] }
  0xcd   : > { %1038 = vmatmul.mubr.f32.gmra.mrb[2].mxu1 %v307_v29  ;;  %2710 = vmatpush1.bf16.msra.mxu0 %v2709_v30  ;;  %v2727_v29 = vpack.c.bf16 %v548_v20, %v544_v19  ;;  %v545_v30 = vld [vmem:[%s3749_s30 + $0x590] sm:$0xff]  ;;  %v579_v19 = vld [vmem:[%s3749_s30 + $0x6a0] sm:$0xff]  ;;  %v344_v20 = vld [vmem:[#allocation4 + $0x148] sm:$0xff] }
  0xce   : > { %2838 = vmatpush1.bf16.msra.mxu1 %v2837_v33  ;;  %721 = vmatprep.mubr.f32.mxu0 %v312_v36  ;;  %v552_v33 = vld [vmem:[%s3749_s30 + $0x5c8] sm:$0xff]  ;;  %v2857_v39 = vpack.c.bf16 %v549_v31, %v545_v30  ;;  %v590_v30 = vld [vmem:[%s3749_s30 + $0x6f8] sm:$0xff] }
  0xcf   : > { %1043 = vmatprep.mubr.f32.mxu1 %v312_v36  ;;  %2712 = vmatprep.subr.bf16.mxu0 %v2711_v37  ;;  %v2729_v36 = vpack.c.bf16 %v547_v27, %v543_v26  ;;  %v554_v37 = vld [vmem:[%s3749_s30 + $0x5d8] sm:$0xff]  ;;  %v588_v26 = vld [vmem:[%s3749_s30 + $0x6e8] sm:$0xff]  ;;  %v343_v27 = vld [vmem:[#allocation4 + $0x140] sm:$0xff] }
  0xd0   : > { %722 = vmatmul.mubr.f32.gmra.mrb[4].mxu0 %v311_v43  ;;  %2840 = vmatprep.subr.bf16.mxu1 %v2839_v40  ;;  %v551_v40 = vld [vmem:[%s3749_s30 + $0x5c0] sm:$0xff]  ;;  %v2859_v46 = vpack.c.bf16 %v558_v38, %v554_v37  ;;  %v589_v37 = vld [vmem:[%s3749_s30 + $0x6f0] sm:$0xff] }
  0xd1   : > { %1044 = vmatmul.mubr.f32.gmra.mrb[4].mxu1 %v311_v43  ;;  %2714 = vmatpush1.bf16.msra.mxu0 %v2713_v44  ;;  %v2731_v43 = vpack.c.bf16 %v556_v34, %v552_v33  ;;  %v553_v44 = vld [vmem:[%s3749_s30 + $0x5d0] sm:$0xff]  ;;  %v587_v33 = vld [vmem:[%s3749_s30 + $0x6e0] sm:$0xff]  ;;  %v348_v34 = vld [vmem:[#allocation4 + $0x168] sm:$0xff] }
  0xd2   : > { %2842 = vmatpush1.bf16.msra.mxu1 %v2841_v47  ;;  %727 = vmatprep.mubr.f32.mxu0 %v316_v50  ;;  %v560_v47 = vld [vmem:[%s3749_s30 + $0x608] sm:$0xff]  ;;  %v2861_v53 = vpack.c.bf16 %v557_v45, %v553_v44  ;;  %v598_v44 = vld [vmem:[%s3749_s30 + $0x738] sm:$0xff] }
  0xd3   : > { %1049 = vmatprep.mubr.f32.mxu1 %v316_v50  ;;  %2716 = vmatprep.subr.bf16.mxu0 %v2715_v51  ;;  %v2733_v50 = vpack.c.bf16 %v555_v41, %v551_v40  ;;  %v562_v51 = vld [vmem:[%s3749_s30 + $0x618] sm:$0xff]  ;;  %v596_v40 = vld [vmem:[%s3749_s30 + $0x728] sm:$0xff]  ;;  %v347_v41 = vld [vmem:[#allocation4 + $0x160] sm:$0xff] }
  0xd4   : > { %728 = vmatmul.mubr.f32.gmra.mrb[6].mxu0 %v315_v57  ;;  %2844 = vmatprep.subr.bf16.mxu1 %v2843_v54  ;;  %v559_v54 = vld [vmem:[%s3749_s30 + $0x600] sm:$0xff]  ;;  %v2863_v60 = vpack.c.bf16 %v566_v52, %v562_v51  ;;  %v597_v51 = vld [vmem:[%s3749_s30 + $0x730] sm:$0xff] }
  0xd5   : > { %1050 = vmatmul.mubr.f32.gmra.mrb[6].mxu1 %v315_v57  ;;  %2718 = vmatpush1.bf16.msra.mxu0 %v2717_v58  ;;  %v2735_v57 = vpack.c.bf16 %v564_v48, %v560_v47  ;;  %v561_v58 = vld [vmem:[%s3749_s30 + $0x610] sm:$0xff]  ;;  %v595_v47 = vld [vmem:[%s3749_s30 + $0x720] sm:$0xff]  ;;  %v352_v48 = vld [vmem:[#allocation4 + $0x188] sm:$0xff] }
  0xd6   : > { %2846 = vmatpush1.bf16.msra.mxu1 %v2845_v61  ;;  %733 = vmatprep.mubr.f32.mxu0 %v320_v0  ;;  %v568_v61 = vld [vmem:[%s3749_s30 + $0x648] sm:$0xff]  ;;  %v2865_v3 = vpack.c.bf16 %v565_v59, %v561_v58  ;;  %v606_v58 = vld [vmem:[%s3749_s30 + $0x778] sm:$0xff] }
  0xd7   : > { %1055 = vmatprep.mubr.f32.mxu1 %v320_v0  ;;  %2720 = vmatprep.subr.bf16.mxu0 %v2719_v1  ;;  %v2737_v0 = vpack.c.bf16 %v563_v55, %v559_v54  ;;  %v570_v1 = vld [vmem:[%s3749_s30 + $0x658] sm:$0xff]  ;;  %v604_v54 = vld [vmem:[%s3749_s30 + $0x768] sm:$0xff]  ;;  %v351_v55 = vld [vmem:[#allocation4 + $0x180] sm:$0xff] }
  0xd8   : > { %734 = vmatmul.mubr.f32.gmra.mrb[8].mxu0 %v319_v7  ;;  %2848 = vmatprep.subr.bf16.mxu1 %v2847_v4  ;;  %v567_v4 = vld [vmem:[%s3749_s30 + $0x640] sm:$0xff]  ;;  %v2867_v10 = vpack.c.bf16 %v574_v2, %v570_v1  ;;  %v605_v1 = vld [vmem:[%s3749_s30 + $0x770] sm:$0xff] }
  0xd9   : > { %1056 = vmatmul.mubr.f32.gmra.mrb[8].mxu1 %v319_v7  ;;  %2722 = vmatpush1.bf16.msra.mxu0 %v2721_v8  ;;  %v2739_v7 = vpack.c.bf16 %v572_v62, %v568_v61  ;;  %v569_v8 = vld [vmem:[%s3749_s30 + $0x650] sm:$0xff]  ;;  %v603_v61 = vld [vmem:[%s3749_s30 + $0x760] sm:$0xff]  ;;  %v356_v62 = vld [vmem:[#allocation4 + $0x1a8] sm:$0xff] }
  0xda   : > { %2850 = vmatpush1.bf16.msra.mxu1 %v2849_v11  ;;  %739 = vmatprep.mubr.f32.mxu0 %v324_v14  ;;  %v576_v11 = vld [vmem:[%s3749_s30 + $0x688] sm:$0xff]  ;;  %v2869_v17 = vpack.c.bf16 %v573_v9, %v569_v8  ;;  %v614_v8 = vld [vmem:[%s3749_s30 + $0x7b8] sm:$0xff] }
  0xdb   : > { %1061 = vmatprep.mubr.f32.mxu1 %v324_v14  ;;  %2724 = vmatprep.subr.bf16.mxu0 %v2723_v15  ;;  %v2741_v14 = vpack.c.bf16 %v571_v5, %v567_v4  ;;  %v578_v15 = vld [vmem:[%s3749_s30 + $0x698] sm:$0xff]  ;;  %v612_v4 = vld [vmem:[%s3749_s30 + $0x7a8] sm:$0xff]  ;;  %v355_v5 = vld [vmem:[#allocation4 + $0x1a0] sm:$0xff] }
  0xdc   : > { %740 = vmatmul.mubr.f32.gmra.mrb[10].mxu0 %v323_v21  ;;  %2852 = vmatprep.subr.bf16.mxu1 %v2851_v18  ;;  %v575_v18 = vld [vmem:[%s3749_s30 + $0x680] sm:$0xff]  ;;  %v2871_v24 = vpack.c.bf16 %v582_v16, %v578_v15  ;;  %v613_v15 = vld [vmem:[%s3749_s30 + $0x7b0] sm:$0xff] }
  0xdd   : > { %1062 = vmatmul.mubr.f32.gmra.mrb[10].mxu1 %v323_v21  ;;  %2726 = vmatpush1.bf16.msra.mxu0 %v2725_v22  ;;  %v2743_v21 = vpack.c.bf16 %v580_v12, %v576_v11  ;;  %v577_v22 = vld [vmem:[%s3749_s30 + $0x690] sm:$0xff]  ;;  %v611_v11 = vld [vmem:[%s3749_s30 + $0x7a0] sm:$0xff]  ;;  %v360_v12 = vld [vmem:[#allocation4 + $0x1c8] sm:$0xff] }
  0xde   : > { %2854 = vmatpush1.bf16.msra.mxu1 %v2853_v25  ;;  %745 = vmatprep.mubr.f32.mxu0 %v328_v28  ;;  %v584_v25 = vld [vmem:[%s3749_s30 + $0x6c8] sm:$0xff]  ;;  %v2873_v31 = vpack.c.bf16 %v581_v23, %v577_v22  ;;  %v622_v22 = vld [vmem:[%s3749_s30 + $0x7f8] sm:$0xff] }
  0xdf   : > { %1067 = vmatprep.mubr.f32.mxu1 %v328_v28  ;;  %2728 = vmatprep.subr.bf16.mxu0 %v2727_v29  ;;  %v2745_v28 = vpack.c.bf16 %v579_v19, %v575_v18  ;;  %v586_v29 = vld [vmem:[%s3749_s30 + $0x6d8] sm:$0xff]  ;;  %v620_v18 = vld [vmem:[%s3749_s30 + $0x7e8] sm:$0xff]  ;;  %v359_v19 = vld [vmem:[#allocation4 + $0x1c0] sm:$0xff] }
  0xe0   : > { %746 = vmatmul.mubr.f32.gmra.mrb[12].mxu0 %v327_v35  ;;  %2856 = vmatprep.subr.bf16.mxu1 %v2855_v32  ;;  %v583_v32 = vld [vmem:[%s3749_s30 + $0x6c0] sm:$0xff]  ;;  %v2875_v38 = vpack.c.bf16 %v590_v30, %v586_v29  ;;  %v621_v29 = vld [vmem:[%s3749_s30 + $0x7f0] sm:$0xff] }
  0xe1   : > { %1068 = vmatmul.mubr.f32.gmra.mrb[12].mxu1 %v327_v35  ;;  %2730 = vmatpush1.bf16.msra.mxu0 %v2729_v36  ;;  %v2747_v35 = vpack.c.bf16 %v588_v26, %v584_v25  ;;  %v585_v36 = vld [vmem:[%s3749_s30 + $0x6d0] sm:$0xff]  ;;  %v619_v25 = vld [vmem:[%s3749_s30 + $0x7e0] sm:$0xff]  ;;  %v364_v26 = vld [vmem:[#allocation4 + $0x1e8] sm:$0xff] }
  0xe2   : > { %2858 = vmatpush1.bf16.msra.mxu1 %v2857_v39  ;;  %751 = vmatprep.mubr.f32.mxu0 %v332_v42  ;;  %v592_v39 = vld [vmem:[%s3749_s30 + $0x708] sm:$0xff]  ;;  %v2877_v45 = vpack.c.bf16 %v589_v37, %v585_v36  ;;  %v310_v36 = vld [vmem:[#allocation4 + $0x38] sm:$0xff]  ;;  %v309_v37 = vld [vmem:[#allocation4 + $0x30] sm:$0xff] }
  0xe3   : > { %1073 = vmatprep.mubr.f32.mxu1 %v332_v42  ;;  %2732 = vmatprep.subr.bf16.mxu0 %v2731_v43  ;;  %v2749_v42 = vpack.c.bf16 %v587_v33, %v583_v32  ;;  %v594_v43 = vld [vmem:[%s3749_s30 + $0x718] sm:$0xff] }
  0xe4   : > { %752 = vmatmul.mubr.f32.gmra.mrb[14].mxu0 %v331_v49  ;;  %2860 = vmatprep.subr.bf16.mxu1 %v2859_v46  ;;  %v591_v46 = vld [vmem:[%s3749_s30 + $0x700] sm:$0xff]  ;;  %v2879_v52 = vpack.c.bf16 %v598_v44, %v594_v43  ;;  %v321_v43 = vld [vmem:[#allocation4 + $0x90] sm:$0xff]  ;;  %v326_v44 = vld [vmem:[#allocation4 + $0xb8] sm:$0xff] }
  0xe5   : > { %1074 = vmatmul.mubr.f32.gmra.mrb[14].mxu1 %v331_v49  ;;  %2734 = vmatpush1.bf16.msra.mxu0 %v2733_v50  ;;  %v2751_v49 = vpack.c.bf16 %v596_v40, %v592_v39  ;;  %v593_v50 = vld [vmem:[%s3749_s30 + $0x710] sm:$0xff]  ;;  %v318_v40 = vld [vmem:[#allocation4 + $0x78] sm:$0xff] }
  0xe6   : > { %2862 = vmatpush1.bf16.msra.mxu1 %v2861_v53  ;;  %757 = vmatprep.mubr.f32.mxu0 %v336_v56  ;;  %v600_v53 = vld [vmem:[%s3749_s30 + $0x748] sm:$0xff]  ;;  %v2881_v59 = vpack.c.bf16 %v597_v51, %v593_v50  ;;  %v313_v39 = vld [vmem:[#allocation4 + $0x50] sm:$0xff]  ;;  %v338_v50 = vld [vmem:[#allocation4 + $0x118] sm:$0xff] }
  0xe7   : > { %1079 = vmatprep.mubr.f32.mxu1 %v336_v56  ;;  %2736 = vmatprep.subr.bf16.mxu0 %v2735_v57  ;;  %v2753_v56 = vpack.c.bf16 %v595_v47, %v591_v46  ;;  %v602_v57 = vld [vmem:[%s3749_s30 + $0x758] sm:$0xff]  ;;  %v329_v47 = vld [vmem:[#allocation4 + $0xd0] sm:$0xff] }
  0xe8   : > { %758 = vmatmul.mubr.f32.gmra.mrb[16].mxu0 %v335_v63  ;;  %2864 = vmatprep.subr.bf16.mxu1 %v2863_v60  ;;  %v599_v60 = vld [vmem:[%s3749_s30 + $0x740] sm:$0xff]  ;;  %v2883_v2 = vpack.c.bf16 %v606_v58, %v602_v57  ;;  %v330_v46 = vld [vmem:[#allocation4 + $0xd8] sm:$0xff]  ;;  %v337_v51 = vld [vmem:[#allocation4 + $0x110] sm:$0xff] }
  0xe9   : > { %1080 = vmatmul.mubr.f32.gmra.mrb[16].mxu1 %v335_v63  ;;  %2738 = vmatpush1.bf16.msra.mxu0 %v2737_v0  ;;  %v2755_v63 = vpack.c.bf16 %v604_v54, %v600_v53  ;;  %v601_v0 = vld [vmem:[%s3749_s30 + $0x750] sm:$0xff]  ;;  %v346_v54 = vld [vmem:[#allocation4 + $0x158] sm:$0xff] }
  0xea   : > { %2866 = vmatpush1.bf16.msra.mxu1 %v2865_v3  ;;  %763 = vmatprep.mubr.f32.mxu0 %v340_v6  ;;  %v608_v3 = vld [vmem:[%s3749_s30 + $0x788] sm:$0xff]  ;;  %v2885_v9 = vpack.c.bf16 %v605_v1, %v601_v0  ;;  %v341_v53 = vld [vmem:[#allocation4 + $0x130] sm:$0xff]  ;;  %v354_v58 = vld [vmem:[#allocation4 + $0x198] sm:$0xff] }
  0xeb   : > { %1085 = vmatprep.mubr.f32.mxu1 %v340_v6  ;;  %2740 = vmatprep.subr.bf16.mxu0 %v2739_v7  ;;  %v2757_v6 = vpack.c.bf16 %v603_v61, %v599_v60  ;;  %v610_v7 = vld [vmem:[%s3749_s30 + $0x798] sm:$0xff]  ;;  %v349_v57 = vld [vmem:[#allocation4 + $0x170] sm:$0xff] }
  0xec   : > { %764 = vmatmul.mubr.f32.gmra.mrb[18].mxu0 %v339_v13  ;;  %2868 = vmatprep.subr.bf16.mxu1 %v2867_v10  ;;  %v607_v10 = vld [vmem:[%s3749_s30 + $0x780] sm:$0xff]  ;;  %v2887_v16 = vpack.c.bf16 %v614_v8, %v610_v7  ;;  %v358_v60 = vld [vmem:[#allocation4 + $0x1b8] sm:$0xff]  ;;  %v357_v61 = vld [vmem:[#allocation4 + $0x1b0] sm:$0xff] }
  0xed   : > { %1086 = vmatmul.mubr.f32.gmra.mrb[18].mxu1 %v339_v13  ;;  %2742 = vmatpush1.bf16.msra.mxu0 %v2741_v14  ;;  %v2759_v13 = vpack.c.bf16 %v612_v4, %v608_v3  ;;  %v609_v14 = vld [vmem:[%s3749_s30 + $0x790] sm:$0xff]  ;;  %v366_v0 = vld [vmem:[#allocation4 + $0x1f8] sm:$0xff] }
  0xee   : > { %2870 = vmatpush1.bf16.msra.mxu1 %v2869_v17  ;;  %769 = vmatprep.mubr.f32.mxu0 %v344_v20  ;;  %v616_v17 = vld [vmem:[%s3749_s30 + $0x7c8] sm:$0xff]  ;;  %v2889_v23 = vpack.c.bf16 %v613_v15, %v609_v14  ;;  %v365_v1 = vld [vmem:[#allocation4 + $0x1f0] sm:$0xff] }
  0xef   : > { %1091 = vmatprep.mubr.f32.mxu1 %v344_v20  ;;  %2744 = vmatprep.subr.bf16.mxu0 %v2743_v21  ;;  %v2761_v20 = vpack.c.bf16 %v611_v11, %v607_v10  ;;  %v618_v21 = vld [vmem:[%s3749_s30 + $0x7d8] sm:$0xff] }
  0xf0   : > { %770 = vmatmul.mubr.f32.gmra.mrb[20].mxu0 %v343_v27  ;;  %2872 = vmatprep.subr.bf16.mxu1 %v2871_v24  ;;  %v615_v24 = vld [vmem:[%s3749_s30 + $0x7c0] sm:$0xff]  ;;  %v2891_v30 = vpack.c.bf16 %v622_v22, %v618_v21 }
  0xf1   : > { %1092 = vmatmul.mubr.f32.gmra.mrb[20].mxu1 %v343_v27  ;;  %2746 = vmatpush1.bf16.msra.mxu0 %v2745_v28  ;;  %v2763_v27 = vpack.c.bf16 %v620_v18, %v616_v17  ;;  %v617_v28 = vld [vmem:[%s3749_s30 + $0x7d0] sm:$0xff]  ;;  %v2765_v32 = vpack.c.bf16 %v619_v25, %v615_v24 }
  0xf2   : > { %2874 = vmatpush1.bf16.msra.mxu1 %v2873_v31  ;;  %775 = vmatprep.mubr.f32.mxu0 %v348_v34  ;;  %v363_v31 = vld [vmem:[#allocation4 + $0x1e0] sm:$0xff]  ;;  %v2893_v33 = vpack.c.bf16 %v621_v29, %v617_v28 }
  0xf3   : > { %1097 = vmatprep.mubr.f32.mxu1 %v348_v34  ;;  %2748 = vmatprep.subr.bf16.mxu0 %v2747_v35  ;;  %v306_v34 = vld [vmem:[#allocation4 + $0x18] sm:$0xff]  ;;  %v305_v35 = vld [vmem:[#allocation4 + $0x10] sm:$0xff] }
  0xf4   : > { %776 = vmatmul.mubr.f32.gmra.mrb[22].mxu0 %v347_v41  ;;  %2876 = vmatprep.subr.bf16.mxu1 %v2875_v38  ;;  %v314_v38 = vld [vmem:[#allocation4 + $0x58] sm:$0xff] }
  0xf5   : > { %1098 = vmatmul.mubr.f32.gmra.mrb[22].mxu1 %v347_v41  ;;  %2750 = vmatpush1.bf16.msra.mxu0 %v2749_v42  ;;  %v317_v41 = vld [vmem:[#allocation4 + $0x70] sm:$0xff]  ;;  %v322_v42 = vld [vmem:[#allocation4 + $0x98] sm:$0xff] }
  0xf6   : > { %2878 = vmatpush1.bf16.msra.mxu1 %v2877_v45  ;;  %781 = vmatprep.mubr.f32.mxu0 %v352_v48  ;;  %v325_v45 = vld [vmem:[#allocation4 + $0xb0] sm:$0xff] }
  0xf7   : > { %1103 = vmatprep.mubr.f32.mxu1 %v352_v48  ;;  %2752 = vmatprep.subr.bf16.mxu0 %v2751_v49  ;;  %v334_v48 = vld [vmem:[#allocation4 + $0xf8] sm:$0xff]  ;;  %v333_v49 = vld [vmem:[#allocation4 + $0xf0] sm:$0xff] }
  0xf8   : > { %782 = vmatmul.mubr.f32.gmra.mrb[24].mxu0 %v351_v55  ;;  %2880 = vmatprep.subr.bf16.mxu1 %v2879_v52  ;;  %v342_v52 = vld [vmem:[#allocation4 + $0x138] sm:$0xff] }
  0xf9   : > { %1104 = vmatmul.mubr.f32.gmra.mrb[24].mxu1 %v351_v55  ;;  %2754 = vmatpush1.bf16.msra.mxu0 %v2753_v56  ;;  %v345_v55 = vld [vmem:[#allocation4 + $0x150] sm:$0xff]  ;;  %v350_v56 = vld [vmem:[#allocation4 + $0x178] sm:$0xff] }
  0xfa   : > { %2882 = vmatpush1.bf16.msra.mxu1 %v2881_v59  ;;  %787 = vmatprep.mubr.f32.mxu0 %v356_v62  ;;  %v353_v59 = vld [vmem:[#allocation4 + $0x190] sm:$0xff] }
  0xfb   : > { %1109 = vmatprep.mubr.f32.mxu1 %v356_v62  ;;  %2756 = vmatprep.subr.bf16.mxu0 %v2755_v63  ;;  %v362_v62 = vld [vmem:[#allocation4 + $0x1d8] sm:$0xff]  ;;  %v361_v63 = vld [vmem:[#allocation4 + $0x1d0] sm:$0xff] }
  0xfc   : > { %788 = vmatmul.mubr.f32.gmra.mrb[26].mxu0 %v355_v5  ;;  %2884 = vmatprep.subr.bf16.mxu1 %v2883_v2  ;;  %v625_v2 = vlaneseq }
  0xfd   : > { %1110 = vmatmul.mubr.f32.gmra.mrb[26].mxu1 %v355_v5  ;;  %2758 = vmatpush1.bf16.msra.mxu0 %v2757_v6  ;;  %v623_v5 = vld [vmem:[%s229_s7] sm:$0xf] }
  0xfe   : > { %2886 = vmatpush1.bf16.msra.mxu1 %v2885_v9  ;;  %793 = vmatprep.mubr.f32.mxu0 %v360_v12  ;;  %v626_v3 = vshrl.u32 %v625_v2, 7 }
  0xff   : > { %1115 = vmatprep.mubr.f32.mxu1 %v360_v12  ;;  %2760 = vmatprep.subr.bf16.mxu0 %v2759_v13 }
 0x100   : > { %794 = vmatmul.mubr.f32.gmra.mrb[28].mxu0 %v359_v19  ;;  %2888 = vmatprep.subr.bf16.mxu1 %v2887_v16  ;;  %v627_v4 = vsub.s32 0, %v626_v3  ;;  %v635_v6 = vsub.s32 2, %v626_v3  ;;  %v631_v7 = vsub.s32 1, %v626_v3  ;;  %v639_v8 = vsub.s32 3, %v626_v3 }
 0x101   : > { %1116 = vmatmul.mubr.f32.gmra.mrb[28].mxu1 %v359_v19  ;;  %2762 = vmatpush1.bf16.msra.mxu0 %v2761_v20 }
 0x102   : > { %2890 = vmatpush1.bf16.msra.mxu1 %v2889_v23  ;;  %799 = vmatprep.mubr.f32.mxu0 %v364_v26  ;;  %v4049_v9 = vrot.slane %v623_v5, %v627_v4  ;;  %v4051_v10 = vrot.slane %v623_v5, %v635_v6  ;;  %v4053_v11 = vrot.slane %v623_v5, %v631_v7 }
 0x103   : > { %1121 = vmatprep.mubr.f32.mxu1 %v364_v26  ;;  %2764 = vmatprep.subr.bf16.mxu0 %v2763_v27  ;;  %v4055_v12 = vrot.slane %v623_v5, %v639_v8 }
 0x104   : > { %800 = vmatmul.mubr.f32.gmra.mrb[30].mxu0 %v363_v31  ;;  %2892 = vmatprep.subr.bf16.mxu1 %v2891_v30 }
 0x105   : > { %1122 = vmatmul.mubr.f32.gmra.mrb[30].mxu1 %v363_v31  ;;  %2766 = vmatpush1.bf16.msra.mxu0 %v2765_v32 }
 0x106   : > { %2894 = vmatpush1.bf16.msra.mxu1 %v2893_v33  ;;  %870 = vmatprep.mubr.f32.mxu0 %v306_v34 }
 0x107   : > { %1192 = vmatprep.mubr.f32.mxu1 %v306_v34 }
 0x108   : > { %871 = vmatmul.mubr.f32.vlgmr.msra.gmra.mrb[0].mxu0 %v305_v35 }
 0x109   : > { %1193 = vmatmul.mubr.f32.vlgmr.msra.gmra.mrb[0].mxu1 %v305_v35  ;;  %876 = vmatprep.mubr.f32.mxu0 %v310_v36 }
 0x10a   : > { %1198 = vmatprep.mubr.f32.mxu1 %v310_v36 }
 0x10c   : > { %877 = vmatmul.mubr.f32.gmra.mrb[2].mxu0 %v309_v37 }
 0x10d   : > { %1199 = vmatmul.mubr.f32.gmra.mrb[2].mxu1 %v309_v37  ;;  %882 = vmatprep.mubr.f32.mxu0 %v314_v38 }
 0x10e   : > { %1204 = vmatprep.mubr.f32.mxu1 %v314_v38 }
 0x110   : > { %883 = vmatmul.mubr.f32.gmra.mrb[4].mxu0 %v313_v39 }
 0x111   : > { %1205 = vmatmul.mubr.f32.gmra.mrb[4].mxu1 %v313_v39  ;;  %888 = vmatprep.mubr.f32.mxu0 %v318_v40 }
 0x112   : > { %1210 = vmatprep.mubr.f32.mxu1 %v318_v40 }
 0x114   : > { %889 = vmatmul.mubr.f32.gmra.mrb[6].mxu0 %v317_v41 }
 0x115   : > { %1211 = vmatmul.mubr.f32.gmra.mrb[6].mxu1 %v317_v41  ;;  %894 = vmatprep.mubr.f32.mxu0 %v322_v42 }
 0x116   : > { %1216 = vmatprep.mubr.f32.mxu1 %v322_v42 }
 0x118   : > { %895 = vmatmul.mubr.f32.gmra.mrb[8].mxu0 %v321_v43 }
 0x119   : > { %1217 = vmatmul.mubr.f32.gmra.mrb[8].mxu1 %v321_v43  ;;  %900 = vmatprep.mubr.f32.mxu0 %v326_v44 }
 0x11a   : > { %1222 = vmatprep.mubr.f32.mxu1 %v326_v44 }
 0x11c   : > { %901 = vmatmul.mubr.f32.gmra.mrb[10].mxu0 %v325_v45 }
 0x11d   : > { %1223 = vmatmul.mubr.f32.gmra.mrb[10].mxu1 %v325_v45  ;;  %906 = vmatprep.mubr.f32.mxu0 %v330_v46 }
 0x11e   : > { %1228 = vmatprep.mubr.f32.mxu1 %v330_v46 }
 0x120   : > { %907 = vmatmul.mubr.f32.gmra.mrb[12].mxu0 %v329_v47 }
 0x121   : > { %1229 = vmatmul.mubr.f32.gmra.mrb[12].mxu1 %v329_v47  ;;  %912 = vmatprep.mubr.f32.mxu0 %v334_v48 }
 0x122   : > { %1234 = vmatprep.mubr.f32.mxu1 %v334_v48 }
 0x124   : > { %913 = vmatmul.mubr.f32.gmra.mrb[14].mxu0 %v333_v49 }
 0x125   : > { %1235 = vmatmul.mubr.f32.gmra.mrb[14].mxu1 %v333_v49  ;;  %918 = vmatprep.mubr.f32.mxu0 %v338_v50 }
 0x126   : > { %1240 = vmatprep.mubr.f32.mxu1 %v338_v50 }
 0x128   : > { %919 = vmatmul.mubr.f32.gmra.mrb[16].mxu0 %v337_v51 }
 0x129   : > { %1241 = vmatmul.mubr.f32.gmra.mrb[16].mxu1 %v337_v51  ;;  %924 = vmatprep.mubr.f32.mxu0 %v342_v52 }
 0x12a   : > { %1246 = vmatprep.mubr.f32.mxu1 %v342_v52 }
 0x12c   : > { %925 = vmatmul.mubr.f32.gmra.mrb[18].mxu0 %v341_v53 }
 0x12d   : > { %1247 = vmatmul.mubr.f32.gmra.mrb[18].mxu1 %v341_v53  ;;  %930 = vmatprep.mubr.f32.mxu0 %v346_v54 }
 0x12e   : > { %1252 = vmatprep.mubr.f32.mxu1 %v346_v54 }
 0x130   : > { %931 = vmatmul.mubr.f32.gmra.mrb[20].mxu0 %v345_v55 }
 0x131   : > { %1253 = vmatmul.mubr.f32.gmra.mrb[20].mxu1 %v345_v55  ;;  %936 = vmatprep.mubr.f32.mxu0 %v350_v56 }
 0x132   : > { %1258 = vmatprep.mubr.f32.mxu1 %v350_v56 }
 0x134   : > { %937 = vmatmul.mubr.f32.gmra.mrb[22].mxu0 %v349_v57 }
 0x135   : > { %1259 = vmatmul.mubr.f32.gmra.mrb[22].mxu1 %v349_v57  ;;  %942 = vmatprep.mubr.f32.mxu0 %v354_v58 }
 0x136   : > { %1264 = vmatprep.mubr.f32.mxu1 %v354_v58 }
 0x138   : > { %943 = vmatmul.mubr.f32.gmra.mrb[24].mxu0 %v353_v59 }
 0x139   : > { %1265 = vmatmul.mubr.f32.gmra.mrb[24].mxu1 %v353_v59  ;;  %948 = vmatprep.mubr.f32.mxu0 %v358_v60 }
 0x13a   : > { %1270 = vmatprep.mubr.f32.mxu1 %v358_v60 }
 0x13c   : > { %949 = vmatmul.mubr.f32.gmra.mrb[26].mxu0 %v357_v61 }
 0x13d   : > { %1271 = vmatmul.mubr.f32.gmra.mrb[26].mxu1 %v357_v61  ;;  %954 = vmatprep.mubr.f32.mxu0 %v362_v62 }
 0x13e   : > { %1276 = vmatprep.mubr.f32.mxu1 %v362_v62 }
 0x140   : > { %955 = vmatmul.mubr.f32.gmra.mrb[28].mxu0 %v361_v63 }
 0x141   : > { %1277 = vmatmul.mubr.f32.gmra.mrb[28].mxu1 %v361_v63  ;;  %960 = vmatprep.mubr.f32.mxu0 %v366_v0 }
 0x142   : > { %1282 = vmatprep.mubr.f32.mxu1 %v366_v0 }
 0x144   : > { %961 = vmatmul.mubr.f32.gmra.mrb[30].mxu0 %v365_v1 }
 0x145   : > { %1283 = vmatmul.mubr.f32.gmra.mrb[30].mxu1 %v365_v1 }
 0x1db   : > { %v872_v13 = vpop.f32.mrb[0].mxu0 }
 0x1dc   : > { %v2895_v14 = vadd.f32 %v872_v13, %v4049_v9  ;;  %v1194_v15 = vpop.f32.mrb[0].mxu1  ;;  %v874_v16 = vpop.f32.mrb[1].mxu0 }
 0x1dd   : > { %v2927_v17 = vadd.f32 %v1194_v15, %v4051_v10  ;;  %v2896_v18 = vadd.f32 %v874_v16, %v4053_v11  ;;  %v1196_v19 = vpop.f32.mrb[1].mxu1 }
 0x1de   : > { %v4060_v20 = vmul.f32 4.0, %v2895_v14  ;;  %v2928_v21 = vadd.f32 %v1196_v19, %v4055_v12 }
 0x1df   : > { %v4063_v22 = vmul.f32 4.0, %v2896_v18  ;;  %v878_v23 = vpop.f32.mrb[2].mxu0  ;;  %v4066_v25 = vmul.f32 4.0, %v2927_v17 }
 0x1e0   : > { %v5147_v24 = vclamps-f32 %v4060_v20, 10.0  ;;  %v2897_v26 = vadd.f32 %v878_v23, %v4049_v9  ;;  %v1200_v27 = vpop.f32.mrb[2].mxu1  ;;  %v880_v28 = vpop.f32.mrb[3].mxu0  ;;  %v4070_v30 = vmul.f32 4.0, %v2928_v21 }
 0x1e1   : > { %v5145_v29 = vclamps-f32 %v4063_v22, 10.0  ;;  %v2929_v31 = vadd.f32 %v1200_v27, %v4051_v10  ;;  %v2898_v32 = vadd.f32 %v880_v28, %v4053_v11  ;;  %v1202_v33 = vpop.f32.mrb[3].mxu1  ;;  %v5143_v39 = vclamps-f32 %v4066_v25, 10.0 }
 0x1e2   : > { %v4074_v34 = vmul.f32 4.0, %v2897_v26  ;;  %v2930_v35 = vadd.f32 %v1202_v33, %v4055_v12  ;;  %v5142_v45 = vclamps-f32 %v4070_v30, 10.0 }
 0x1e3   : > { %v1497_v36 = vmax.f32 %v5147_v24, %v5145_v29  ;;  %v4081_v37 = vmul.f32 4.0, %v2898_v32  ;;  %v884_v38 = vpop.f32.mrb[4].mxu0  ;;  %v4085_v41 = vmul.f32 4.0, %v2929_v31 }
 0x1e4   : > { %v5139_v40 = vclamps-f32 %v4074_v34, 10.0  ;;  %v2899_v42 = vadd.f32 %v884_v38, %v4049_v9  ;;  %v1206_v43 = vpop.f32.mrb[4].mxu1  ;;  %v886_v44 = vpop.f32.mrb[5].mxu0  ;;  %v4092_v50 = vmul.f32 4.0, %v2930_v35 }
 0x1e5   : > { %v5137_v46 = vclamps-f32 %v4081_v37, 10.0  ;;  %v2931_v47 = vadd.f32 %v1206_v43, %v4051_v10  ;;  %v2900_v48 = vadd.f32 %v886_v44, %v4053_v11  ;;  %v1208_v49 = vpop.f32.mrb[5].mxu1  ;;  %v1498_v53 = vmax.f32 %v1497_v36, %v5143_v39 }
 0x1e6   : > { %v4094_v51 = vmul.f32 4.0, %v2899_v42  ;;  %v2932_v52 = vadd.f32 %v1208_v49, %v4055_v12  ;;  %v5135_v58 = vclamps-f32 %v4085_v41, 10.0  ;;  %v5134_v5 = vclamps-f32 %v4092_v50, 10.0 }
 0x1e7   : > { %v1502_v54 = vmax.f32 %v5139_v40, %v5137_v46  ;;  %v4103_v55 = vmul.f32 4.0, %v2931_v47  ;;  %v4105_v56 = vmul.f32 4.0, %v2900_v48  ;;  %v890_v57 = vpop.f32.mrb[6].mxu0  ;;  %v1499_v63 = vmax.f32 %v1498_v53, %v5142_v45 }
 0x1e8   : > { %v5131_v59 = vclamps-f32 %v4094_v51, 10.0  ;;  %v2901_v60 = vadd.f32 %v890_v57, %v4049_v9  ;;  %v1212_v61 = vpop.f32.mrb[6].mxu1  ;;  %v892_v62 = vpop.f32.mrb[7].mxu0  ;;  %v4113_v1 = vmul.f32 4.0, %v2932_v52 }
 0x1e9   : > { %v5129_v0 = vclamps-f32 %v4105_v56, 10.0  ;;  %v2933_v2 = vadd.f32 %v1212_v61, %v4051_v10  ;;  %v2902_v3 = vadd.f32 %v892_v62, %v4053_v11  ;;  %v1214_v4 = vpop.f32.mrb[7].mxu1  ;;  %1500 = vmax.xlane.f32.xlu0 %v1499_v63  ;;  %v1503_v8 = vmax.f32 %v1502_v54, %v5135_v58 }
 0x1ea   : > { %v4118_v6 = vmul.f32 4.0, %v2901_v60  ;;  %v2934_v7 = vadd.f32 %v1214_v4, %v4055_v12  ;;  %v5127_v13 = vclamps-f32 %v4103_v55, 10.0  ;;  %v5126_v27 = vclamps-f32 %v4113_v1, 10.0 }
 0x1eb   : > { %v1507_v14 = vmax.f32 %v5131_v59, %v5129_v0  ;;  %v4128_v15 = vmul.f32 4.0, %v2902_v3  ;;  %v896_v16 = vpop.f32.mrb[8].mxu0  ;;  %v4131_v18 = vmul.f32 4.0, %v2933_v2  ;;  %v1504_v26 = vmax.f32 %v1503_v8, %v5134_v5 }
 0x1ec   : > { %v5123_v17 = vclamps-f32 %v4118_v6, 10.0  ;;  %v2903_v19 = vadd.f32 %v896_v16, %v4049_v9  ;;  %v1218_v21 = vpop.f32.mrb[8].mxu1  ;;  %v898_v23 = vpop.f32.mrb[9].mxu0  ;;  %v4140_v35 = vmul.f32 4.0, %v2934_v7 }
 0x1ed   : > { %v5121_v28 = vclamps-f32 %v4128_v15, 10.0  ;;  %v2935_v31 = vadd.f32 %v1218_v21, %v4051_v10  ;;  %v2904_v32 = vadd.f32 %v898_v23, %v4053_v11  ;;  %v1220_v33 = vpop.f32.mrb[9].mxu1  ;;  %1505 = vmax.xlane.f32.xlu0 %v1504_v26  ;;  %v1508_v42 = vmax.f32 %v1507_v14, %v5127_v13 }
 0x1ee   : > { %v4142_v36 = vmul.f32 4.0, %v2903_v19  ;;  %v2936_v38 = vadd.f32 %v1220_v33, %v4055_v12  ;;  %v5119_v49 = vclamps-f32 %v4131_v18, 10.0  ;;  %v5118_v4 = vclamps-f32 %v4140_v35, 10.0 }
 0x1ef   : > { %v1512_v43 = vmax.f32 %v5123_v17, %v5121_v28  ;;  %v4151_v44 = vmul.f32 4.0, %v2935_v31  ;;  %v4153_v47 = vmul.f32 4.0, %v2904_v32  ;;  %v902_v48 = vpop.f32.mrb[10].mxu0  ;;  %v1509_v60 = vmax.f32 %v1508_v42, %v5126_v27 }
 0x1f0   : > { %v5115_v52 = vclamps-f32 %v4142_v36, 10.0  ;;  %v2905_v53 = vadd.f32 %v902_v48, %v4049_v9  ;;  %v1224_v54 = vpop.f32.mrb[10].mxu1  ;;  %v904_v57 = vpop.f32.mrb[11].mxu0  ;;  %v4161_v62 = vmul.f32 4.0, %v2936_v38 }
 0x1f1   : > { %v5113_v61 = vclamps-f32 %v4153_v47, 10.0  ;;  %v2937_v63 = vadd.f32 %v1224_v54, %v4051_v10  ;;  %v2906_v2 = vadd.f32 %v904_v57, %v4053_v11  ;;  %v1226_v3 = vpop.f32.mrb[11].mxu1  ;;  %1510 = vmax.xlane.f32.xlu1 %v1509_v60  ;;  %v1513_v14 = vmax.f32 %v1512_v43, %v5119_v49 }
 0x1f2   : > { %v4166_v7 = vmul.f32 4.0, %v2905_v53  ;;  %v2938_v8 = vadd.f32 %v1226_v3, %v4055_v12  ;;  %v5114_v16 = vclamps-f32 %v4151_v44, 10.0  ;;  %v5120_v43 = vclamps-f32 %v4161_v62, 10.0 }
 0x1f3   : > { %v1517_v19 = vmax.f32 %v5115_v52, %v5113_v61  ;;  %v4176_v21 = vmul.f32 4.0, %v2906_v2  ;;  %v908_v23 = vpop.f32.mrb[12].mxu0  ;;  %v4179_v31 = vmul.f32 4.0, %v2937_v63  ;;  %v1514_v42 = vmax.f32 %v1513_v14, %v5118_v4 }
 0x1f4   : > { %v5117_v26 = vclamps-f32 %v4166_v7, 10.0  ;;  %v2907_v32 = vadd.f32 %v908_v23, %v4049_v9  ;;  %v1230_v33 = vpop.f32.mrb[12].mxu1  ;;  %v910_v38 = vpop.f32.mrb[13].mxu0  ;;  %v4188_v60 = vmul.f32 4.0, %v2938_v8 }
 0x1f5   : > { %v5116_v48 = vclamps-f32 %v4176_v21, 10.0  ;;  %v2939_v53 = vadd.f32 %v1230_v33, %v4051_v10  ;;  %v2908_v54 = vadd.f32 %v910_v38, %v4053_v11  ;;  %v1232_v57 = vpop.f32.mrb[13].mxu1  ;;  %1515 = vmax.xlane.f32.xlu1 %v1514_v42  ;;  %v1518_v3 = vmax.f32 %v1517_v19, %v5114_v16 }
 0x1f6   : > { %v4190_v63 = vmul.f32 4.0, %v2907_v32  ;;  %v2940_v2 = vadd.f32 %v1232_v57, %v4055_v12  ;;  %v5122_v8 = vclamps-f32 %v4179_v31, 10.0 }
 0x1f7   : > { %v1522_v14 = vmax.f32 %v5117_v26, %v5116_v48  ;;  %v4199_v23 = vmul.f32 4.0, %v2939_v53  ;;  %v4201_v33 = vmul.f32 4.0, %v2908_v54  ;;  %v914_v38 = vpop.f32.mrb[14].mxu0  ;;  %v1519_v19 = vmax.f32 %v1518_v3, %v5120_v43 }
 0x1f8   : > { %v5125_v32 = vclamps-f32 %v4190_v63, 10.0  ;;  %v2909_v57 = vadd.f32 %v914_v38, %v4049_v9  ;;  %v1236_v42 = vpop.f32.mrb[14].mxu1  ;;  %v916_v61 = vpop.f32.mrb[15].mxu0  ;;  %v4209_v52 = vmul.f32 4.0, %v2940_v2  ;;  %v5128_v26 = vclamps-f32 %v4188_v60, 10.0 }
 0x1f9   : > { %v5124_v16 = vclamps-f32 %v4201_v33, 10.0  ;;  %v2941_v53 = vadd.f32 %v1236_v42, %v4051_v10  ;;  %v2910_v54 = vadd.f32 %v916_v61, %v4053_v11  ;;  %v1238_v48 = vpop.f32.mrb[15].mxu1  ;;  %1520 = vmax.xlane.f32.xlu0 %v1519_v19  ;;  %v1523_v49 = vmax.f32 %v1522_v14, %v5122_v8 }
 0x1fa   : > { %v4214_v4 = vmul.f32 4.0, %v2909_v57  ;;  %v2942_v38 = vadd.f32 %v1238_v48, %v4055_v12  ;;  %v5130_v3 = vclamps-f32 %v4199_v23, 10.0  ;;  %v3542_v8 = vmov 0  }
 0x1fb   : > { %v1527_v2 = vmax.f32 %v5125_v32, %v5124_v16  ;;  %v4224_v42 = vmul.f32 4.0, %v2910_v54  ;;  %v920_v61 = vpop.f32.mrb[16].mxu0  ;;  %v4227_v57 = vmul.f32 4.0, %v2941_v53  ;;  %v1524_v14 = vmax.f32 %v1523_v49, %v5128_v26  ;;  %3100 = vset.pattern.permute.xlu0 %v3542_v8  ;;  %3101 = vset.pattern.permute.xlu1 %v3542_v8 }
 0x1fc   : > { %v5133_v43 = vclamps-f32 %v4214_v4, 10.0  ;;  %v2911_v48 = vadd.f32 %v920_v61, %v4049_v9  ;;  %v1242_v19 = vpop.f32.mrb[16].mxu1  ;;  %v922_v28 = vpop.f32.mrb[17].mxu0  ;;  %v5136_v17 = vclamps-f32 %v4209_v52, 10.0  ;;  %v4236_v27 = vmul.f32 4.0, %v2942_v38 }
 0x1fd   : > { %v5132_v54 = vclamps-f32 %v4224_v42, 10.0  ;;  %v2943_v16 = vadd.f32 %v1242_v19, %v4051_v10  ;;  %v2912_v32 = vadd.f32 %v922_v28, %v4053_v11  ;;  %v1244_v53 = vpop.f32.mrb[17].mxu1  ;;  %1525 = vmax.xlane.f32.xlu1 %v1524_v14  ;;  %v1528_v49 = vmax.f32 %v1527_v2, %v5130_v3 }
 0x1fe   : > { %v4238_v61 = vmul.f32 4.0, %v2911_v48  ;;  %v2944_v13 = vadd.f32 %v1244_v53, %v4055_v12  ;;  %v5138_v38 = vclamps-f32 %v4227_v57, 10.0 }
 0x1ff   : > { %v1532_v8 = vmax.f32 %v5133_v43, %v5132_v54  ;;  %v4247_v26 = vmul.f32 4.0, %v2943_v16  ;;  %v4249_v19 = vmul.f32 4.0, %v2912_v32  ;;  %v926_v28 = vpop.f32.mrb[18].mxu0  ;;  %v1529_v2 = vmax.f32 %v1528_v49, %v5136_v17 }
 0x200   : > { %v5141_v48 = vclamps-f32 %v4238_v61, 10.0  ;;  %v2913_v53 = vadd.f32 %v926_v28, %v4049_v9  ;;  %v1248_v14 = vpop.f32.mrb[18].mxu1  ;;  %v928_v0 = vpop.f32.mrb[19].mxu0  ;;  %v4257_v59 = vmul.f32 4.0, %v2944_v13  ;;  %v5144_v43 = vclamps-f32 %v4236_v27, 10.0 }
 0x201   : > { %v5140_v3 = vclamps-f32 %v4249_v19, 10.0  ;;  %v2945_v16 = vadd.f32 %v1248_v14, %v4051_v10  ;;  %v2914_v32 = vadd.f32 %v928_v0, %v4053_v11  ;;  %v1250_v54 = vpop.f32.mrb[19].mxu1  ;;  %1530 = vmax.xlane.f32.xlu0 %v1529_v2  ;;  %v1533_v58 = vmax.f32 %v1532_v8, %v5138_v38 }
 0x202   : > { %v4262_v5 = vmul.f32 4.0, %v2913_v53  ;;  %v2946_v28 = vadd.f32 %v1250_v54, %v4055_v12  ;;  %v5146_v49 = vclamps-f32 %v4247_v26, 10.0  ;;  %v5151_v38 = vclamps-f32 %v4257_v59, 10.0 }
 0x203   : > { %v1537_v13 = vmax.f32 %v5141_v48, %v5140_v3  ;;  %v4272_v14 = vmul.f32 4.0, %v2914_v32  ;;  %v932_v0 = vpop.f32.mrb[20].mxu0  ;;  %v4275_v53 = vmul.f32 4.0, %v2945_v16  ;;  %v1534_v8 = vmax.f32 %v1533_v58, %v5144_v43 }
 0x204   : > { %5226 = vst [vmem:[#allocation11_spill] sm:$0xff] %v4262_v5  ;;  %v5149_v17 = vclamps-f32 %v4262_v5, 10.0  ;;  %v2915_v54 = vadd.f32 %v932_v0, %v4049_v9  ;;  %v1254_v2 = vpop.f32.mrb[20].mxu1  ;;  %v934_v46 = vpop.f32.mrb[21].mxu0  ;;  %v4284_v45 = vmul.f32 4.0, %v2946_v28 }
 0x205   : > { %5227 = vst [vmem:[#allocation12_spill] sm:$0xff] %v4272_v14  ;;  %5228 = vst [vmem:[#allocation13_spill] sm:$0xff] %v4275_v53  ;;  %v5148_v40 = vclamps-f32 %v4272_v14, 10.0  ;;  %v2947_v3 = vadd.f32 %v1254_v2, %v4051_v10  ;;  %v2916_v32 = vadd.f32 %v934_v46, %v4053_v11  ;;  %v1256_v48 = vpop.f32.mrb[21].mxu1  ;;  %1535 = vmax.xlane.f32.xlu1 %v1534_v8 }
 0x206   : > { %5229 = vst [vmem:[#allocation14_spill] sm:$0xff] %v4284_v45  ;;  %v4286_v16 = vmul.f32 4.0, %v2915_v54  ;;  %v2948_v0 = vadd.f32 %v1256_v48, %v4055_v12  ;;  %v1538_v39 = vmax.f32 %v1537_v13, %v5146_v49  ;;  %v5235_v54 = vclamps-f32 %v4275_v53, 10.0 }
 0x207   : > { %v1542_v58 = vmax.f32 %v5149_v17, %v5148_v40  ;;  %v4295_v43 = vmul.f32 4.0, %v2947_v3  ;;  %v4297_v2 = vmul.f32 4.0, %v2916_v32  ;;  %v938_v46 = vpop.f32.mrb[22].mxu0 }
 0x208   : > { %5230 = vst [vmem:[#allocation15_spill] sm:$0xff] %v4286_v16  ;;  %v2917_v48 = vadd.f32 %v938_v46, %v4049_v9  ;;  %v1260_v8 = vpop.f32.mrb[22].mxu1  ;;  %v940_v29 = vpop.f32.mrb[23].mxu0  ;;  %v1539_v13 = vmax.f32 %v1538_v39, %v5151_v38  ;;  %v4305_v24 = vmul.f32 4.0, %v2948_v0  ;;  %v5236_v0 = vclamps-f32 %v4286_v16, 10.0 }
 0x209   : > { %5231 = vst [vmem:[#allocation16_spill] sm:$0xff] %v4295_v43  ;;  %5232 = vst [vmem:[#allocation17_spill] sm:$0xff] %v4297_v2  ;;  %v5154_v49 = vclamps-f32 %v4297_v2, 10.0  ;;  %v2949_v3 = vadd.f32 %v1260_v8, %v4051_v10  ;;  %v2918_v32 = vadd.f32 %v940_v29, %v4053_v11  ;;  %v1262_v40 = vpop.f32.mrb[23].mxu1  ;;  %v1543_v14 = vmax.f32 %v1542_v58, %v5235_v54 }
 0x20a   : > { %5233 = vst [vmem:[#allocation18_spill] sm:$0xff] %v4305_v24  ;;  %v4310_v28 = vmul.f32 4.0, %v2917_v48  ;;  %v2950_v46 = vadd.f32 %v1262_v40, %v4055_v12  ;;  %1540 = vmax.xlane.f32.xlu0 %v1539_v13  ;;  %v5239_v58 = vclamps-f32 %v4284_v45, 10.0  ;;  %v5242_v17 = vclamps-f32 %v4295_v43, 10.0 }
 0x20b   : > { %v1547_v8 = vmax.f32 %v5236_v0, %v5154_v49  ;;  %v4320_v38 = vmul.f32 4.0, %v2918_v32  ;;  %v944_v29 = vpop.f32.mrb[24].mxu0  ;;  %v4323_v48 = vmul.f32 4.0, %v2949_v3 }
 0x20c   : > { %5234 = vst [vmem:[#allocation19_spill] sm:$0xff] %v4310_v28  ;;  %v2919_v40 = vadd.f32 %v944_v29, %v4049_v9  ;;  %v1266_v13 = vpop.f32.mrb[24].mxu1  ;;  %v946_v5 = vpop.f32.mrb[25].mxu0  ;;  %v1544_v54 = vmax.f32 %v1543_v14, %v5239_v58  ;;  %v4332_v16 = vmul.f32 4.0, %v2950_v46  ;;  %v5243_v14 = vclamps-f32 %v4310_v28, 10.0 }
 0x20d   : > { %5237 = vst [vmem:[#allocation20_spill] sm:$0xff] %v4320_v38  ;;  %5238 = vst [vmem:[#allocation21_spill] sm:$0xff] %v4323_v48  ;;  %v5160_v2 = vclamps-f32 %v4320_v38, 10.0  ;;  %v2951_v0 = vadd.f32 %v1266_v13, %v4051_v10  ;;  %v2920_v32 = vadd.f32 %v946_v5, %v4053_v11  ;;  %v1268_v49 = vpop.f32.mrb[25].mxu1  ;;  %v1548_v45 = vmax.f32 %v1547_v8, %v5242_v17 }
 0x20e   : > { %5240 = vst [vmem:[#allocation22_spill] sm:$0xff] %v4332_v16  ;;  %v4334_v3 = vmul.f32 4.0, %v2919_v40  ;;  %v2952_v29 = vadd.f32 %v1268_v49, %v4055_v12  ;;  %1545 = vmax.xlane.f32.xlu1 %v1544_v54  ;;  %v5245_v17 = vclamps-f32 %v4305_v24, 10.0  ;;  %v5247_v40 = vclamps-f32 %v4323_v48, 10.0 }
 0x20f   : > { %v1552_v58 = vmax.f32 %v5243_v14, %v5160_v2  ;;  %v4343_v39 = vmul.f32 4.0, %v2951_v0  ;;  %v4345_v13 = vmul.f32 4.0, %v2920_v32  ;;  %v950_v5 = vpop.f32.mrb[26].mxu0 }
 0x210   : > { %5241 = vst [vmem:[#allocation23_spill] sm:$0xff] %v4334_v3  ;;  %v2921_v49 = vadd.f32 %v950_v5, %v4049_v9  ;;  %v1272_v54 = vpop.f32.mrb[26].mxu1  ;;  %v952_v53 = vpop.f32.mrb[27].mxu0  ;;  %v1549_v8 = vmax.f32 %v1548_v45, %v5245_v17  ;;  %v4353_v28 = vmul.f32 4.0, %v2952_v29  ;;  %v5248_v29 = vclamps-f32 %v4334_v3, 10.0 }
 0x211   : > { %5244 = vst [vmem:[#allocation24_spill] sm:$0xff] %v4345_v13  ;;  %v5164_v38 = vclamps-f32 %v4345_v13, 10.0  ;;  %v2953_v0 = vadd.f32 %v1272_v54, %v4051_v10  ;;  %v2922_v32 = vadd.f32 %v952_v53, %v4053_v11  ;;  %v1274_v14 = vpop.f32.mrb[27].mxu1  ;;  %v1553_v24 = vmax.f32 %v1552_v58, %v5247_v40 }
 0x212   : > { %v4358_v46 = vmul.f32 4.0, %v2921_v49  ;;  %v2954_v5 = vadd.f32 %v1274_v14, %v4055_v12  ;;  %1550 = vmax.xlane.f32.xlu0 %v1549_v8  ;;  %v5250_v58 = vclamps-f32 %v4332_v16, 10.0  ;;  %v5251_v2 = vclamps-f32 %v4343_v39, 10.0 }
 0x213   : > { %v1557_v54 = vmax.f32 %v5248_v29, %v5164_v38  ;;  %v4368_v17 = vmul.f32 4.0, %v2922_v32  ;;  %v956_v53 = vpop.f32.mrb[28].mxu0  ;;  %v4371_v49 = vmul.f32 4.0, %v2953_v0 }
 0x214   : > { %5246 = vst [vmem:[#allocation25_spill] sm:$0xff] %v4358_v46  ;;  %v2923_v14 = vadd.f32 %v956_v53, %v4049_v9  ;;  %v1278_v8 = vpop.f32.mrb[28].mxu1  ;;  %v958_v43 = vpop.f32.mrb[29].mxu0  ;;  %v1554_v40 = vmax.f32 %v1553_v24, %v5250_v58  ;;  %v4380_v3 = vmul.f32 4.0, %v2954_v5  ;;  %v5252_v24 = vclamps-f32 %v4358_v46, 10.0 }
 0x215   : > { %5249 = vst [vmem:[#allocation26_spill] sm:$0xff] %v4368_v17  ;;  %v5170_v13 = vclamps-f32 %v4368_v17, 10.0  ;;  %v2955_v29 = vadd.f32 %v1278_v8, %v4051_v10  ;;  %v2924_v32 = vadd.f32 %v958_v43, %v4053_v11  ;;  %v1280_v38 = vpop.f32.mrb[29].mxu1  ;;  %v1558_v16 = vmax.f32 %v1557_v54, %v5251_v2 }
 0x216   : > { %v4382_v0 = vmul.f32 4.0, %v2923_v14  ;;  %v2956_v53 = vadd.f32 %v1280_v38, %v4055_v12  ;;  %1555 = vmax.xlane.f32.xlu1 %v1554_v40  ;;  %v5253_v2 = vclamps-f32 %v4353_v28, 10.0 }
 0x217   : > { %v1562_v58 = vmax.f32 %v5252_v24, %v5170_v13  ;;  %v4391_v45 = vmul.f32 4.0, %v2955_v29  ;;  %v4393_v8 = vmul.f32 4.0, %v2924_v32  ;;  %v962_v43 = vpop.f32.mrb[30].mxu0  ;;  %v5178_v13 = vclamps-f32 %v4380_v3, 10.0 }
 0x218   : > { %v2925_v38 = vadd.f32 %v962_v43, %v4049_v9  ;;  %v1284_v40 = vpop.f32.mrb[30].mxu1  ;;  %v964_v48 = vpop.f32.mrb[31].mxu0  ;;  %v1559_v54 = vmax.f32 %v1558_v16, %v5253_v2  ;;  %v4401_v46 = vmul.f32 4.0, %v2956_v53  ;;  %v5254_v43 = vclamps-f32 %v4371_v49, 10.0 }
 0x219   : > { %v5177_v17 = vclamps-f32 %v4393_v8, 10.0  ;;  %v2957_v29 = vadd.f32 %v1284_v40, %v4051_v10  ;;  %v2926_v32 = vadd.f32 %v964_v48, %v4053_v11  ;;  %v1286_v24 = vpop.f32.mrb[31].mxu1  ;;  %v5176_v16 = vclamps-f32 %v4391_v45, 10.0 }
 0x21a   : > { %v4406_v5 = vmul.f32 4.0, %v2925_v38  ;;  %v2958_v9 = vadd.f32 %v1286_v24, %v4055_v12  ;;  %1560 = vmax.xlane.f32.xlu0 %v1559_v54  ;;  %v1563_v14 = vmax.f32 %v1562_v58, %v5254_v43  ;;  %v5255_v53 = vclamps-f32 %v4382_v0, 10.0 }
 0x21b   : > { %v4416_v40 = vmul.f32 4.0, %v2957_v29  ;;  %v4418_v11 = vmul.f32 4.0, %v2926_v32  ;;  %v5175_v38 = vclamps-f32 %v4401_v46, 10.0 }
 0x21c   : > { %v1567_v10 = vmax.f32 %v5255_v53, %v5177_v17  ;;  %v5174_v48 = vclamps-f32 %v4406_v5, 10.0  ;;  %v1564_v12 = vmax.f32 %v1563_v14, %v5178_v13  ;;  %v4425_v2 = vmul.f32 4.0, %v2958_v9  ;;  %v4441_v53 = vld [vmem:[#allocation2] sm:$0xff]  ;;  %v4496_v13 = vld [vmem:[#allocation2 + $0x30] sm:$0xff] }
 0x21d   : > { %v5171_v58 = vclamps-f32 %v4418_v11, 10.0  ;;  %v5173_v29 = vclamps-f32 %v4416_v40, 10.0  ;;  %5256 = vst [vmem:[#allocation27_spill] sm:$0xff] %v4441_v53  ;;  %5268 = vst [vmem:[#allocation39_spill] sm:$0xff] %v4496_v13 }
 0x21e   : > { %v1568_v54 = vmax.f32 %v1567_v10, %v5176_v16  ;;  %1565 = vmax.xlane.f32.xlu1 %v1564_v12  ;;  %v5172_v24 = vclamps-f32 %v4425_v2, 10.0  ;;  %v4486_v16 = vld [vmem:[#allocation2 + $0x28] sm:$0xff] }
 0x21f   : > { %v1572_v32 = vmax.f32 %v5174_v48, %v5171_v58  ;;  %v4446_v58 = vld [vmem:[#allocation2 + $0x8] sm:$0xff]  ;;  %v4476_v48 = vld [vmem:[#allocation2 + $0x20] sm:$0xff]  ;;  %5266 = vst [vmem:[#allocation37_spill] sm:$0xff] %v4486_v16 }
 0x220   : > { %v1569_v14 = vmax.f32 %v1568_v54, %v5175_v38  ;;  %5258 = vst [vmem:[#allocation29_spill] sm:$0xff] %v4446_v58  ;;  %5264 = vst [vmem:[#allocation35_spill] sm:$0xff] %v4476_v48 }
 0x221   : > { %v1573_v9 = vmax.f32 %v1572_v32, %v5173_v29 }
 0x222   : > { %1570 = vmax.xlane.f32.xlu0 %v1569_v14 }
 0x223   : > { %v1574_v43 = vmax.f32 %v1573_v9, %v5172_v24  ;;  %v4456_v9 = vld [vmem:[#allocation2 + $0x10] sm:$0xff]  ;;  %v4466_v24 = vld [vmem:[#allocation2 + $0x18] sm:$0xff] }
 0x224   : > { %5260 = vst [vmem:[#allocation31_spill] sm:$0xff] %v4456_v9  ;;  %5262 = vst [vmem:[#allocation33_spill] sm:$0xff] %v4466_v24 }
 0x225   : > { %1575 = vmax.xlane.f32.xlu1 %v1574_v43 }
 0x276   : > { %v1501_v10 = vpop.xlane.xlu0 %1500 }
 0x277   : > { %v4444_v12 = vmax.f32 %v4441_v53, %v1501_v10 }
 0x279   : > { %5257 = vst [vmem:[#allocation28_spill] sm:$0xff] %v4444_v12  ;;  %2058 = vst.msk [vmem:[#allocation2] sm:$0xff] %vm5211_vm1, %v4444_v12  ;;  %1675 = vperm.xlu0 %3100, %v4444_v12  }
 0x27a   : > { %v1506_v32 = vpop.xlane.xlu0 %1505 }
 0x27b   : > { %v4454_v14 = vmax.f32 %v4446_v58, %v1506_v32 }
 0x27d   : > { %5259 = vst [vmem:[#allocation30_spill] sm:$0xff] %v4454_v14  ;;  %2059 = vst.msk [vmem:[#allocation2 + $0x8] sm:$0xff] %vm5211_vm1, %v4454_v14  ;;  %1680 = vperm.xlu1 %3101, %v4454_v14  }
 0x27e   : > { %v1511_v10 = vpop.xlane.xlu1 %1510 }
 0x27f   : > { %v4464_v54 = vmax.f32 %v4456_v9, %v1511_v10 }
 0x281   : > { %5261 = vst [vmem:[#allocation32_spill] sm:$0xff] %v4464_v54  ;;  %2060 = vst.msk [vmem:[#allocation2 + $0x10] sm:$0xff] %vm5211_vm1, %v4464_v54  ;;  %1685 = vperm.xlu1 %3101, %v4464_v54  }
 0x282   : > { %v1516_v43 = vpop.xlane.xlu1 %1515 }
 0x283   : > { %v4474_v29 = vmax.f32 %v4466_v24, %v1516_v43 }
 0x285   : > { %5263 = vst [vmem:[#allocation34_spill] sm:$0xff] %v4474_v29  ;;  %2061 = vst.msk [vmem:[#allocation2 + $0x18] sm:$0xff] %vm5211_vm1, %v4474_v29  ;;  %1690 = vperm.xlu1 %3101, %v4474_v29   ;;  %v4506_v29 = vld [vmem:[#allocation2 + $0x38] sm:$0xff] }
 0x286   : > { %v1521_v32 = vpop.xlane.xlu0 %1520  ;;  %5270 = vst [vmem:[#allocation41_spill] sm:$0xff] %v4506_v29 }
 0x287   : > { %v4484_v38 = vmax.f32 %v4476_v48, %v1521_v32 }
 0x289   : > { %5265 = vst [vmem:[#allocation36_spill] sm:$0xff] %v4484_v38  ;;  %2062 = vst.msk [vmem:[#allocation2 + $0x20] sm:$0xff] %vm5211_vm1, %v4484_v38  ;;  %1695 = vperm.xlu1 %3101, %v4484_v38   ;;  %v4516_v38 = vld [vmem:[#allocation2 + $0x40] sm:$0xff] }
 0x28a   : > { %v1526_v10 = vpop.xlane.xlu1 %1525  ;;  %5272 = vst [vmem:[#allocation43_spill] sm:$0xff] %v4516_v38 }
 0x28b   : > { %v4494_v17 = vmax.f32 %v4486_v16, %v1526_v10 }
 0x28d   : > { %5267 = vst [vmem:[#allocation38_spill] sm:$0xff] %v4494_v17  ;;  %2063 = vst.msk [vmem:[#allocation2 + $0x28] sm:$0xff] %vm5211_vm1, %v4494_v17  ;;  %1700 = vperm.xlu1 %3101, %v4494_v17   ;;  %v4526_v17 = vld [vmem:[#allocation2 + $0x48] sm:$0xff] }
 0x28e   : > { %v1531_v43 = vpop.xlane.xlu0 %1530  ;;  %5274 = vst [vmem:[#allocation45_spill] sm:$0xff] %v4526_v17 }
 0x28f   : > { %v4504_v48 = vmax.f32 %v4496_v13, %v1531_v43 }
 0x291   : > { %5269 = vst [vmem:[#allocation40_spill] sm:$0xff] %v4504_v48  ;;  %2064 = vst.msk [vmem:[#allocation2 + $0x30] sm:$0xff] %vm5211_vm1, %v4504_v48  ;;  %1705 = vperm.xlu1 %3101, %v4504_v48   ;;  %v4536_v48 = vld [vmem:[#allocation2 + $0x50] sm:$0xff] }
 0x292   : > { %v1536_v32 = vpop.xlane.xlu1 %1535  ;;  %5276 = vst [vmem:[#allocation47_spill] sm:$0xff] %v4536_v48 }
 0x293   : > { %v4514_v16 = vmax.f32 %v4506_v29, %v1536_v32 }
 0x295   : > { %5271 = vst [vmem:[#allocation42_spill] sm:$0xff] %v4514_v16  ;;  %2065 = vst.msk [vmem:[#allocation2 + $0x38] sm:$0xff] %vm5211_vm1, %v4514_v16  ;;  %1710 = vperm.xlu1 %3101, %v4514_v16   ;;  %v4546_v16 = vld [vmem:[#allocation2 + $0x58] sm:$0xff] }
 0x296   : > { %5278 = vst [vmem:[#allocation49_spill] sm:$0xff] %v4546_v16 }
 0x297   : > { %v1541_v10 = vpop.xlane.xlu0 %1540 }
 0x298   : > { %v4524_v13 = vmax.f32 %v4516_v38, %v1541_v10 }
 0x29a   : > { %5273 = vst [vmem:[#allocation44_spill] sm:$0xff] %v4524_v13  ;;  %2066 = vst.msk [vmem:[#allocation2 + $0x40] sm:$0xff] %vm5211_vm1, %v4524_v13  ;;  %1715 = vperm.xlu1 %3101, %v4524_v13   ;;  %v4556_v13 = vld [vmem:[#allocation2 + $0x60] sm:$0xff] }
 0x29b   : > { %v1546_v43 = vpop.xlane.xlu1 %1545  ;;  %5280 = vst [vmem:[#allocation51_spill] sm:$0xff] %v4556_v13 }
 0x29c   : > { %v4534_v29 = vmax.f32 %v4526_v17, %v1546_v43 }
 0x29e   : > { %5275 = vst [vmem:[#allocation46_spill] sm:$0xff] %v4534_v29  ;;  %2067 = vst.msk [vmem:[#allocation2 + $0x48] sm:$0xff] %vm5211_vm1, %v4534_v29  ;;  %1720 = vperm.xlu0 %3100, %v4534_v29   ;;  %v4566_v29 = vld [vmem:[#allocation2 + $0x68] sm:$0xff] }
 0x29f   : > { %v1551_v32 = vpop.xlane.xlu0 %1550  ;;  %5282 = vst [vmem:[#allocation53_spill] sm:$0xff] %v4566_v29 }
 0x2a0   : > { %v4544_v38 = vmax.f32 %v4536_v48, %v1551_v32 }
 0x2a2   : > { %5277 = vst [vmem:[#allocation48_spill] sm:$0xff] %v4544_v38  ;;  %2068 = vst.msk [vmem:[#allocation2 + $0x50] sm:$0xff] %vm5211_vm1, %v4544_v38  ;;  %1725 = vperm.xlu1 %3101, %v4544_v38   ;;  %v4576_v38 = vld [vmem:[#allocation2 + $0x70] sm:$0xff] }
 0x2a3   : > { %v1556_v10 = vpop.xlane.xlu1 %1555  ;;  %5284 = vst [vmem:[#allocation55_spill] sm:$0xff] %v4576_v38 }
 0x2a4   : > { %v4554_v17 = vmax.f32 %v4546_v16, %v1556_v10 }
 0x2a6   : > { %5279 = vst [vmem:[#allocation50_spill] sm:$0xff] %v4554_v17  ;;  %2069 = vst.msk [vmem:[#allocation2 + $0x58] sm:$0xff] %vm5211_vm1, %v4554_v17  ;;  %1730 = vperm.xlu0 %3100, %v4554_v17   ;;  %v4586_v17 = vld [vmem:[#allocation2 + $0x78] sm:$0xff] }
 0x2a7   : > { %v1561_v43 = vpop.xlane.xlu0 %1560  ;;  %5286 = vst [vmem:[#allocation57_spill] sm:$0xff] %v4586_v17 }
 0x2a8   : > { %v4564_v48 = vmax.f32 %v4556_v13, %v1561_v43 }
 0x2aa   : > { %5281 = vst [vmem:[#allocation52_spill] sm:$0xff] %v4564_v48  ;;  %2070 = vst.msk [vmem:[#allocation2 + $0x60] sm:$0xff] %vm5211_vm1, %v4564_v48  ;;  %1735 = vperm.xlu1 %3101, %v4564_v48   ;;  %v5289_v48 = vclamps-f32 %v4063_v22, 10.0  ;;  %v5294_v22 = vclamps-f32 %v4085_v41, 10.0  ;;  %v5298_v41 = vclamps-f32 %v4103_v55, 10.0  ;;  %v5302_v55 = vclamps-f32 %v4131_v18, 10.0 }
 0x2ab   : > { %v1566_v32 = vpop.xlane.xlu1 %1565  ;;  %v5305_v18 = vclamps-f32 %v4153_v47, 10.0 }
 0x2ac   : > { %v4574_v16 = vmax.f32 %v4566_v29, %v1566_v32  ;;  %v5288_v32 = vclamps-f32 %v4060_v20, 10.0  ;;  %v5293_v20 = vclamps-f32 %v4081_v37, 10.0  ;;  %v5297_v37 = vclamps-f32 %v4105_v56, 10.0 }
 0x2ad   : > { %v5301_v56 = vclamps-f32 %v4128_v15, 10.0  ;;  %v5304_v15 = vclamps-f32 %v4142_v36, 10.0 }
 0x2ae   : > { %5283 = vst [vmem:[#allocation54_spill] sm:$0xff] %v4574_v16  ;;  %2071 = vst.msk [vmem:[#allocation2 + $0x68] sm:$0xff] %vm5211_vm1, %v4574_v16  ;;  %1740 = vperm.xlu0 %3100, %v4574_v16  }
 0x2af   : > { %v1571_v10 = vpop.xlane.xlu0 %1570 }
 0x2b0   : > { %v4584_v13 = vmax.f32 %v4576_v38, %v1571_v10 }
 0x2b2   : > { %5285 = vst [vmem:[#allocation56_spill] sm:$0xff] %v4584_v13  ;;  %2072 = vst.msk [vmem:[#allocation2 + $0x70] sm:$0xff] %vm5211_vm1, %v4584_v13  ;;  %1745 = vperm.xlu1 %3101, %v4584_v13   ;;  %v1576_v43 = vpop.xlane.xlu1 %1575  ;;  %v5290_v13 = vclamps-f32 %v4066_v25, 10.0  ;;  %v5295_v25 = vclamps-f32 %v4092_v50, 10.0  ;;  %v5299_v50 = vclamps-f32 %v4113_v1, 10.0  ;;  %v5303_v1 = vclamps-f32 %v4140_v35, 10.0 }
 0x2b3   : > { %v4594_v29 = vmax.f32 %v4586_v17, %v1576_v43  ;;  %v5291_v43 = vclamps-f32 %v4070_v30, 10.0  ;;  %v5306_v35 = vclamps-f32 %v4151_v44, 10.0  ;;  %v5308_v44 = vclamps-f32 %v4166_v7, 10.0 }
 0x2b5   : > { %5287 = vst [vmem:[#allocation58_spill] sm:$0xff] %v4594_v29  ;;  %2073 = vst.msk [vmem:[#allocation2 + $0x78] sm:$0xff] %vm5211_vm1, %v4594_v29  ;;  %1750 = vperm.xlu0 %3100, %v4594_v29   ;;  %v5292_v29 = vclamps-f32 %v4074_v34, 10.0  ;;  %v5296_v34 = vclamps-f32 %v4094_v51, 10.0  ;;  %v5300_v51 = vclamps-f32 %v4118_v6, 10.0 }
 0x2f8   : > { %v1676_v10 = vpop.permute.xlu0 %1675 }
 0x2f9   : > { %v1753_v38 = vsub.f32 %v5288_v32, %v1676_v10  ;;  %v1754_v24 = vsub.f32 %v5289_v48, %v1676_v10  ;;  %v1755_v54 = vsub.f32 %v5290_v13, %v1676_v10  ;;  %v1756_v9 = vsub.f32 %v5291_v43, %v1676_v10 }
 0x2fb   : > { %v1817_v14 = vmul.f32 1.442695, %v1753_v38  ;;  %v1819_v16 = vmul.f32 1.442695, %v1754_v24  ;;  %v1821_v17 = vmul.f32 1.442695, %v1755_v54 }
 0x2fc   : > { %v1823_v58 = vmul.f32 1.442695, %v1756_v9  ;;  %v1681_v12 = vpop.permute.xlu1 %1680 }
 0x2fd   : > { %3102 = vpow2.f32 %v1817_v14  ;;  %v1757_v53 = vsub.f32 %v5292_v29, %v1681_v12  ;;  %v1758_v32 = vsub.f32 %v5293_v20, %v1681_v12  ;;  %v1759_v48 = vsub.f32 %v5294_v22, %v1681_v12 }
 0x2fe   : > { %3104 = vpow2.f32 %v1819_v16  ;;  %v1760_v30 = vsub.f32 %v5295_v25, %v1681_v12 }
 0x2ff   : > { %3106 = vpow2.f32 %v1821_v17  ;;  %v1825_v13 = vmul.f32 1.442695, %v1757_v53  ;;  %v1827_v38 = vmul.f32 1.442695, %v1758_v32  ;;  %v1829_v24 = vmul.f32 1.442695, %v1759_v48 }
 0x300   : > { %3108 = vpow2.f32 %v1823_v58  ;;  %v1831_v54 = vmul.f32 1.442695, %v1760_v30  ;;  %v1686_v14 = vpop.permute.xlu1 %1685 }
 0x301   : > { %3110 = vpow2.f32 %v1825_v13  ;;  %v1761_v29 = vsub.f32 %v5296_v34, %v1686_v14  ;;  %v1762_v9 = vsub.f32 %v5297_v37, %v1686_v14  ;;  %v1763_v16 = vsub.f32 %v5298_v41, %v1686_v14 }
 0x302   : > { %3112 = vpow2.f32 %v1827_v38  ;;  %v1764_v17 = vsub.f32 %v5299_v50, %v1686_v14  ;;  %v5307_v41 = vclamps-f32 %v4161_v62, 10.0 }
 0x303   : > { %3114 = vpow2.f32 %v1829_v24  ;;  %v1833_v53 = vmul.f32 1.442695, %v1761_v29  ;;  %v1835_v12 = vmul.f32 1.442695, %v1762_v9  ;;  %v1837_v58 = vmul.f32 1.442695, %v1763_v16 }
 0x304   : > { %3116 = vpow2.f32 %v1831_v54  ;;  %v1839_v10 = vmul.f32 1.442695, %v1764_v17  ;;  %v1691_v43 = vpop.permute.xlu1 %1690 }
 0x305   : > { %3118 = vpow2.f32 %v1833_v53  ;;  %v1765_v20 = vsub.f32 %v5300_v51, %v1691_v43  ;;  %v1766_v32 = vsub.f32 %v5301_v56, %v1691_v43  ;;  %v1767_v22 = vsub.f32 %v5302_v55, %v1691_v43 }
 0x306   : > { %3120 = vpow2.f32 %v1835_v12  ;;  %v1768_v48 = vsub.f32 %v5303_v1, %v1691_v43  ;;  %v5309_v56 = vclamps-f32 %v4176_v21, 10.0  ;;  %v5311_v1 = vclamps-f32 %v4188_v60, 10.0 }
 0x307   : > { %v3103_v25 = vpop.eup %3102  ;;  %3122 = vpow2.f32 %v1837_v58  ;;  %v1841_v30 = vmul.f32 1.442695, %v1765_v20  ;;  %v1843_v13 = vmul.f32 1.442695, %v1766_v32  ;;  %v1845_v38 = vmul.f32 1.442695, %v1767_v22 }
 0x308   : > { %v3105_v24 = vpop.eup %3104  ;;  %3124 = vpow2.f32 %v1839_v10  ;;  %v1847_v54 = vmul.f32 1.442695, %v1768_v48  ;;  %v1696_v6 = vpop.permute.xlu1 %1695  ;;  %v5310_v32 = vclamps-f32 %v4179_v31, 10.0  ;;  %v5313_v60 = vclamps-f32 %v4201_v33, 10.0 }
 0x309   : > { %v3107_v14 = vpop.eup %3106  ;;  %3126 = vpow2.f32 %v1841_v30  ;;  %v1769_v34 = vsub.f32 %v5304_v15, %v1696_v6  ;;  %v1770_v29 = vsub.f32 %v5305_v18, %v1696_v6  ;;  %v1771_v37 = vsub.f32 %v5306_v35, %v1696_v6 }
 0x30a   : > { %v3109_v9 = vpop.eup %3108  ;;  %3128 = vpow2.f32 %v1843_v13  ;;  %v1772_v16 = vsub.f32 %v5307_v41, %v1696_v6  ;;  %v1945_v50 = vadd.f32 %v3105_v24, %v3103_v25  ;;  %v5312_v15 = vclamps-f32 %v4190_v63, 10.0 }
 0x30b   : > { %v3111_v17 = vpop.eup %3110  ;;  %3130 = vpow2.f32 %v1845_v38  ;;  %v1849_v53 = vmul.f32 1.442695, %v1769_v34  ;;  %v1851_v12 = vmul.f32 1.442695, %v1770_v29  ;;  %v1853_v58 = vmul.f32 1.442695, %v1771_v37 }
 0x30c   : > { %v3113_v10 = vpop.eup %3112  ;;  %3132 = vpow2.f32 %v1847_v54  ;;  %v1855_v36 = vmul.f32 1.442695, %v1772_v16  ;;  %v1701_v43 = vpop.permute.xlu1 %1700  ;;  %v1946_v47 = vadd.f32 %v3107_v14, %v1945_v50  ;;  %v5314_v29 = vclamps-f32 %v4199_v23, 10.0 }
 0x30d   : > { %v3115_v51 = vpop.eup %3114  ;;  %3134 = vpow2.f32 %v1849_v53  ;;  %v1773_v20 = vsub.f32 %v5308_v44, %v1701_v43  ;;  %v1774_v62 = vsub.f32 %v5309_v56, %v1701_v43  ;;  %v1775_v55 = vsub.f32 %v5310_v32, %v1701_v43 }
 0x30e   : > { %v3117_v22 = vpop.eup %3116  ;;  %3136 = vpow2.f32 %v1851_v12  ;;  %v1776_v48 = vsub.f32 %v5311_v1, %v1701_v43  ;;  %v1947_v25 = vadd.f32 %v3109_v9, %v1946_v47  ;;  %v1950_v30 = vadd.f32 %v3113_v10, %v3111_v17 }
 0x30f   : > { %v3119_v13 = vpop.eup %3118  ;;  %3138 = vpow2.f32 %v1853_v58  ;;  %v1857_v38 = vmul.f32 1.442695, %v1773_v20  ;;  %v1859_v24 = vmul.f32 1.442695, %v1774_v62  ;;  %v1861_v54 = vmul.f32 1.442695, %v1775_v55 }
 0x310   : > { %v3121_v7 = vpop.eup %3120  ;;  %3140 = vpow2.f32 %v1855_v36  ;;  %v1863_v6 = vmul.f32 1.442695, %v1776_v48  ;;  %1948 = vadd.xlane.f32.xlu1 %v1947_v25  ;;  %v1706_v21 = vpop.permute.xlu1 %1705  ;;  %v1951_v14 = vadd.f32 %v3115_v51, %v1950_v30  ;;  %v5315_v9 = vclamps-f32 %v4209_v52, 10.0 }
 0x311   : > { %v3123_v31 = vpop.eup %3122  ;;  %3142 = vpow2.f32 %v1857_v38  ;;  %v1777_v34 = vsub.f32 %v5312_v15, %v1706_v21  ;;  %v1778_v18 = vsub.f32 %v5313_v60, %v1706_v21  ;;  %v1779_v35 = vsub.f32 %v5314_v29, %v1706_v21 }
 0x312   : > { %v3125_v37 = vpop.eup %3124  ;;  %3144 = vpow2.f32 %v1859_v24  ;;  %v1780_v41 = vsub.f32 %v5315_v9, %v1706_v21  ;;  %v1952_v16 = vadd.f32 %v3117_v22, %v1951_v14  ;;  %v1955_v50 = vadd.f32 %v3121_v7, %v3119_v13 }
 0x313   : > { %v3127_v17 = vpop.eup %3126  ;;  %3146 = vpow2.f32 %v1861_v54  ;;  %v1865_v53 = vmul.f32 1.442695, %v1777_v34  ;;  %v1867_v12 = vmul.f32 1.442695, %v1778_v18  ;;  %v1869_v58 = vmul.f32 1.442695, %v1779_v35 }
 0x314   : > { %v3129_v63 = vpop.eup %3128  ;;  %3148 = vpow2.f32 %v1863_v6  ;;  %v1871_v10 = vmul.f32 1.442695, %v1780_v41  ;;  %1953 = vadd.xlane.f32.xlu0 %v1952_v16  ;;  %v1711_v33 = vpop.permute.xlu1 %1710  ;;  %v1956_v36 = vadd.f32 %v3123_v31, %v1955_v50  ;;  %v5316_v43 = vclamps-f32 %v4214_v4, 10.0  ;;  %v5324_v16 = vld [vmem:[#allocation11_spill] sm:$0xff] }
 0x315   : > { %v3131_v23 = vpop.eup %3130  ;;  %3150 = vpow2.f32 %v1865_v53  ;;  %v5317_v52 = vclamps-f32 %v4224_v42, 10.0  ;;  %v5318_v44 = vclamps-f32 %v4227_v57, 10.0  ;;  %v5319_v62 = vclamps-f32 %v4236_v27, 10.0 }
 0x316   : > { %v1781_v47 = vsub.f32 %v5316_v43, %v1711_v33  ;;  %v3133_v56 = vpop.eup %3132  ;;  %3152 = vpow2.f32 %v1867_v12  ;;  %v1957_v55 = vadd.f32 %v3125_v37, %v1956_v36  ;;  %v1960_v22 = vadd.f32 %v3129_v63, %v3127_v17  ;;  %v5330_v36 = vld [vmem:[#allocation14_spill] sm:$0xff] }
 0x317   : > { %v1782_v51 = vsub.f32 %v5317_v52, %v1711_v33  ;;  %v1783_v20 = vsub.f32 %v5318_v44, %v1711_v33  ;;  %v1784_v32 = vsub.f32 %v5319_v62, %v1711_v33  ;;  %v3135_v1 = vpop.eup %3134  ;;  %3154 = vpow2.f32 %v1869_v58  ;;  %v5328_v58 = vld [vmem:[#allocation13_spill] sm:$0xff] }
 0x318   : > { %v1873_v48 = vmul.f32 1.442695, %v1781_v47  ;;  %v3137_v4 = vpop.eup %3136  ;;  %3156 = vpow2.f32 %v1871_v10  ;;  %1958 = vadd.xlane.f32.xlu0 %v1957_v55  ;;  %v1961_v38 = vadd.f32 %v3131_v23, %v1960_v22  ;;  %v5320_v24 = vclamps-f32 %v4238_v61, 10.0 }
 0x319   : > { %v1875_v25 = vmul.f32 1.442695, %v1782_v51  ;;  %v1877_v30 = vmul.f32 1.442695, %v1783_v20  ;;  %v1879_v13 = vmul.f32 1.442695, %v1784_v32  ;;  %v1716_v42 = vpop.permute.xlu1 %1715  ;;  %v3139_v57 = vpop.eup %3138  ;;  %v1965_v60 = vadd.f32 %v3137_v4, %v3135_v1 }
 0x31a   : > { %3158 = vpow2.f32 %v1873_v48  ;;  %v1785_v54 = vsub.f32 %v5320_v24, %v1716_v42  ;;  %v5321_v27 = vclamps-f32 %v4249_v19, 10.0  ;;  %v5322_v6 = vclamps-f32 %v4247_v26, 10.0  ;;  %v3141_v14 = vpop.eup %3140  ;;  %v5332_v48 = vld [vmem:[#allocation15_spill] sm:$0xff]  ;;  %v5334_v4 = vld [vmem:[#allocation17_spill] sm:$0xff] }
 0x31b   : > { %3160 = vpow2.f32 %v1875_v25  ;;  %v5323_v31 = vclamps-f32 %v4257_v59, 10.0  ;;  %v1962_v34 = vadd.f32 %v3133_v56, %v1961_v38  ;;  %v3143_v18 = vpop.eup %3142  ;;  %v1966_v41 = vadd.f32 %v3139_v57, %v1965_v60  ;;  %v5326_v59 = vld [vmem:[#allocation12_spill] sm:$0xff] }
 0x31c   : > { %v1786_v7 = vsub.f32 %v5321_v27, %v1716_v42  ;;  %v1787_v21 = vsub.f32 %v5322_v6, %v1716_v42  ;;  %3162 = vpow2.f32 %v1877_v30  ;;  %v1881_v29 = vmul.f32 1.442695, %v1785_v54  ;;  %v3145_v61 = vpop.eup %3144  ;;  %v5336_v38 = vld [vmem:[#allocation16_spill] sm:$0xff]  ;;  %v5338_v27 = vld [vmem:[#allocation18_spill] sm:$0xff] }
 0x31d   : > { %v1788_v15 = vsub.f32 %v5323_v31, %v1716_v42  ;;  %3164 = vpow2.f32 %v1879_v13  ;;  %1963 = vadd.xlane.f32.xlu1 %v1962_v34  ;;  %v1721_v19 = vpop.permute.xlu0 %1720  ;;  %v3147_v26 = vpop.eup %3146  ;;  %v5325_v50 = vclamps-f32 %v5324_v16, 10.0  ;;  %v5327_v53 = vclamps-f32 %v5326_v59, 10.0 }
 0x31e   : > { %v1883_v35 = vmul.f32 1.442695, %v1786_v7  ;;  %v1885_v37 = vmul.f32 1.442695, %v1787_v21  ;;  %3166 = vpow2.f32 %v1881_v29  ;;  %v5329_v63 = vclamps-f32 %v5328_v58, 10.0  ;;  %v3149_v33 = vpop.eup %3148  ;;  %v5346_v58 = vld [vmem:[#allocation22_spill] sm:$0xff] }
 0x31f   : > { %v1887_v9 = vmul.f32 1.442695, %v1788_v15  ;;  %v1789_v17 = vsub.f32 %v5325_v50, %v1721_v19  ;;  %v1790_v12 = vsub.f32 %v5327_v53, %v1721_v19  ;;  %v5331_v23 = vclamps-f32 %v5330_v36, 10.0  ;;  %v3151_v51 = vpop.eup %3150 }
 0x320   : > { %v1791_v10 = vsub.f32 %v5329_v63, %v1721_v19  ;;  %3168 = vpow2.f32 %v1883_v35  ;;  %v1967_v47 = vadd.f32 %v3141_v14, %v1966_v41  ;;  %v1970_v52 = vadd.f32 %v3145_v61, %v3143_v18  ;;  %v3153_v62 = vpop.eup %3152 }
 0x321   : > { %v1792_v43 = vsub.f32 %v5331_v23, %v1721_v19  ;;  %3170 = vpow2.f32 %v1885_v37  ;;  %v1889_v44 = vmul.f32 1.442695, %v1789_v17  ;;  %v1891_v20 = vmul.f32 1.442695, %v1790_v12  ;;  %v1726_v55 = vpop.permute.xlu1 %1725  ;;  %v3155_v1 = vpop.eup %3154  ;;  %v5344_v17 = vld [vmem:[#allocation21_spill] sm:$0xff] }
 0x322   : > { %v1893_v56 = vmul.f32 1.442695, %v1791_v10  ;;  %3172 = vpow2.f32 %v1887_v9  ;;  %1968 = vadd.xlane.f32.xlu0 %v1967_v47  ;;  %v1971_v22 = vadd.f32 %v3147_v26, %v1970_v52  ;;  %v5333_v25 = vclamps-f32 %v5332_v48, 10.0  ;;  %v3157_v54 = vpop.eup %3156  ;;  %v5340_v9 = vld [vmem:[#allocation19_spill] sm:$0xff]  ;;  %v5342_v26 = vld [vmem:[#allocation20_spill] sm:$0xff] }
 0x323   : > { %v1895_v32 = vmul.f32 1.442695, %v1792_v43  ;;  %3174 = vpow2.f32 %v1889_v44  ;;  %v5335_v13 = vclamps-f32 %v5334_v4, 10.0  ;;  %v5337_v57 = vclamps-f32 %v5336_v38, 10.0 }
 0x324   : > { %v1793_v30 = vsub.f32 %v5333_v25, %v1726_v55  ;;  %3176 = vpow2.f32 %v1891_v20  ;;  %v5339_v7 = vclamps-f32 %v5338_v27, 10.0  ;;  %v1972_v21 = vadd.f32 %v3149_v33, %v1971_v22  ;;  %v3159_v31 = vpop.eup %3158 }
 0x325   : > { %v1794_v42 = vsub.f32 %v5335_v13, %v1726_v55  ;;  %v1795_v24 = vsub.f32 %v5337_v57, %v1726_v55  ;;  %v1975_v14 = vadd.f32 %v3153_v62, %v3151_v51  ;;  %3178 = vpow2.f32 %v1893_v56  ;;  %v3161_v18 = vpop.eup %3160  ;;  %v1731_v35 = vpop.permute.xlu0 %1730 }
 0x326   : > { %v1796_v6 = vsub.f32 %v5339_v7, %v1726_v55  ;;  %v1897_v15 = vmul.f32 1.442695, %v1793_v30  ;;  %3180 = vpow2.f32 %v1895_v32  ;;  %1973 = vadd.xlane.f32.xlu1 %v1972_v21  ;;  %v3163_v61 = vpop.eup %3162  ;;  %v5341_v19 = vclamps-f32 %v5340_v9, 10.0  ;;  %v5348_v32 = vld [vmem:[#allocation23_spill] sm:$0xff] }
 0x327   : > { %v1899_v34 = vmul.f32 1.442695, %v1794_v42  ;;  %v1901_v60 = vmul.f32 1.442695, %v1795_v24  ;;  %v1976_v37 = vadd.f32 %v3155_v1, %v1975_v14  ;;  %v5343_v16 = vclamps-f32 %v5342_v26, 10.0  ;;  %v3165_v12 = vpop.eup %3164  ;;  %v5350_v1 = vld [vmem:[#allocation24_spill] sm:$0xff] }
 0x328   : > { %v1903_v29 = vmul.f32 1.442695, %v1796_v6  ;;  %3182 = vpow2.f32 %v1897_v15  ;;  %v1797_v41 = vsub.f32 %v5341_v19, %v1731_v35  ;;  %v5345_v59 = vclamps-f32 %v5344_v17, 10.0  ;;  %v3167_v23 = vpop.eup %3166 }
 0x329   : > { %v1798_v50 = vsub.f32 %v5343_v16, %v1731_v35  ;;  %3184 = vpow2.f32 %v1899_v34  ;;  %v5347_v63 = vclamps-f32 %v5346_v58, 10.0  ;;  %v1977_v33 = vadd.f32 %v3157_v54, %v1976_v37  ;;  %v1736_v20 = vpop.permute.xlu1 %1735  ;;  %v5354_v34 = vld [vmem:[#allocation25_spill] sm:$0xff] }
 0x32a   : > { %v1799_v53 = vsub.f32 %v5345_v59, %v1731_v35  ;;  %v1980_v36 = vadd.f32 %v3161_v18, %v3159_v31  ;;  %3186 = vpow2.f32 %v1901_v60  ;;  %v1905_v43 = vmul.f32 1.442695, %v1797_v41  ;;  %v3169_v51 = vpop.eup %3168 }
 0x32b   : > { %v1800_v10 = vsub.f32 %v5347_v63, %v1731_v35  ;;  %v1907_v47 = vmul.f32 1.442695, %v1798_v50  ;;  %3188 = vpow2.f32 %v1903_v29  ;;  %1978 = vadd.xlane.f32.xlu0 %v1977_v33  ;;  %v3171_v62 = vpop.eup %3170  ;;  %v5349_v55 = vclamps-f32 %v5348_v32, 10.0 }
 0x32c   : > { %v1909_v52 = vmul.f32 1.442695, %v1799_v53  ;;  %v1981_v56 = vadd.f32 %v3163_v61, %v1980_v36  ;;  %3190 = vpow2.f32 %v1905_v43  ;;  %v5351_v48 = vclamps-f32 %v5350_v1, 10.0  ;;  %v3173_v13 = vpop.eup %3172 }
 0x32d   : > { %v1911_v44 = vmul.f32 1.442695, %v1800_v10  ;;  %v1801_v22 = vsub.f32 %v5349_v55, %v1736_v20  ;;  %v5352_v30 = vclamps-f32 %v4343_v39, 10.0  ;;  %3192 = vpow2.f32 %v1907_v47  ;;  %v3175_v54 = vpop.eup %3174  ;;  %v1741_v31 = vpop.permute.xlu0 %1740 }
 0x32e   : > { %v1802_v25 = vsub.f32 %v5351_v48, %v1736_v20  ;;  %v5353_v42 = vclamps-f32 %v4353_v28, 10.0  ;;  %v1982_v57 = vadd.f32 %v3165_v12, %v1981_v56  ;;  %v1985_v24 = vadd.f32 %v3169_v51, %v3167_v23  ;;  %v3177_v21 = vpop.eup %3176  ;;  %v5356_v28 = vld [vmem:[#allocation26_spill] sm:$0xff] }
 0x32f   : > { %v1803_v4 = vsub.f32 %v5352_v30, %v1736_v20  ;;  %3194 = vpow2.f32 %v1909_v52  ;;  %v1913_v27 = vmul.f32 1.442695, %v1801_v22  ;;  %v3179_v39 = vpop.eup %3178  ;;  %v5355_v60 = vclamps-f32 %v5354_v34, 10.0 }
 0x330   : > { %v1804_v38 = vsub.f32 %v5353_v42, %v1736_v20  ;;  %v1915_v7 = vmul.f32 1.442695, %v1802_v25  ;;  %3196 = vpow2.f32 %v1911_v44  ;;  %1983 = vadd.xlane.f32.xlu1 %v1982_v57  ;;  %v1986_v15 = vadd.f32 %v3171_v62, %v1985_v24  ;;  %v3181_v9 = vpop.eup %3180 }
 0x331   : > { %v1917_v6 = vmul.f32 1.442695, %v1803_v4  ;;  %3198 = vpow2.f32 %v1913_v27  ;;  %v1805_v18 = vsub.f32 %v5355_v60, %v1741_v31  ;;  %v5357_v29 = vclamps-f32 %v5356_v28, 10.0  ;;  %v1746_v12 = vpop.permute.xlu1 %1745 }
 0x332   : > { %v1919_v14 = vmul.f32 1.442695, %v1804_v38  ;;  %v5358_v37 = vclamps-f32 %v4371_v49, 10.0  ;;  %3200 = vpow2.f32 %v1915_v7  ;;  %v5359_v19 = vclamps-f32 %v4380_v3, 10.0  ;;  %v3183_v50 = vpop.eup %3182 }
 0x333   : > { %v1806_v35 = vsub.f32 %v5357_v29, %v1741_v31  ;;  %v1987_v26 = vadd.f32 %v3173_v13, %v1986_v15  ;;  %v1990_v16 = vadd.f32 %v3177_v21, %v3175_v54  ;;  %3202 = vpow2.f32 %v1917_v6  ;;  %v3185_v58 = vpop.eup %3184 }
 0x334   : > { %v1807_v61 = vsub.f32 %v5358_v37, %v1741_v31  ;;  %v1808_v41 = vsub.f32 %v5359_v19, %v1741_v31  ;;  %v1921_v17 = vmul.f32 1.442695, %v1805_v18  ;;  %3204 = vpow2.f32 %v1919_v14  ;;  %v3187_v3 = vpop.eup %3186  ;;  %v1751_v22 = vpop.permute.xlu0 %1750 }
 0x335   : > { %v1923_v59 = vmul.f32 1.442695, %v1806_v35  ;;  %1988 = vadd.xlane.f32.xlu0 %v1987_v26  ;;  %v5360_v49 = vclamps-f32 %v4382_v0, 10.0  ;;  %v5361_v33 = vclamps-f32 %v4393_v8, 10.0  ;;  %v5362_v23 = vclamps-f32 %v4391_v45, 10.0  ;;  %v3189_v44 = vpop.eup %3188 }
 0x336   : > { %v1925_v53 = vmul.f32 1.442695, %v1807_v61  ;;  %v1927_v63 = vmul.f32 1.442695, %v1808_v41  ;;  %3206 = vpow2.f32 %v1921_v17  ;;  %v5363_v47 = vclamps-f32 %v4401_v46, 10.0  ;;  %v3191_v32 = vpop.eup %3190 }
 0x337   : > { %v1809_v10 = vsub.f32 %v5360_v49, %v1746_v12  ;;  %v1810_v36 = vsub.f32 %v5361_v33, %v1746_v12  ;;  %v1811_v43 = vsub.f32 %v5362_v23, %v1746_v12  ;;  %v1991_v51 = vadd.f32 %v3179_v39, %v1990_v16  ;;  %v3193_v1 = vpop.eup %3192 }
 0x338   : > { %v1812_v52 = vsub.f32 %v5363_v47, %v1746_v12  ;;  %3208 = vpow2.f32 %v1923_v59  ;;  %v1995_v62 = vadd.f32 %v3185_v58, %v3183_v50  ;;  %v5364_v45 = vclamps-f32 %v4406_v5, 10.0  ;;  %v5371_v47 = vld [vmem:[#allocation29_spill] sm:$0xff] }
 0x339   : > { %v1929_v20 = vmul.f32 1.442695, %v1809_v10  ;;  %v1931_v56 = vmul.f32 1.442695, %v1810_v36  ;;  %3210 = vpow2.f32 %v1925_v53  ;;  %v1933_v0 = vmul.f32 1.442695, %v1811_v43  ;;  %v3195_v13 = vpop.eup %3194 }
 0x33a   : > { %v1935_v55 = vmul.f32 1.442695, %v1812_v52  ;;  %v1992_v8 = vadd.f32 %v3181_v9, %v1991_v51  ;;  %3212 = vpow2.f32 %v1927_v63  ;;  %v1813_v48 = vsub.f32 %v5364_v45, %v1751_v22  ;;  %v3197_v57 = vpop.eup %3196  ;;  %v5368_v36 = vld [vmem:[#allocation27_spill] sm:$0xff]  ;;  %v5372_v52 = vld [vmem:[#allocation30_spill] sm:$0xff] }
 0x33b   : > { %v5365_v46 = vclamps-f32 %v4418_v11, 10.0  ;;  %v5366_v30 = vclamps-f32 %v4416_v40, 10.0  ;;  %3214 = vpow2.f32 %v1929_v20  ;;  %v1996_v42 = vadd.f32 %v3187_v3, %v1995_v62  ;;  %v3199_v5 = vpop.eup %3198  ;;  %v5369_v3 = vld [vmem:[#allocation28_spill] sm:$0xff]  ;;  %v5374_v20 = vld [vmem:[#allocation31_spill] sm:$0xff]  ;;  %v1641_v45 = vld [vmem:[#allocation3] sm:$0xff] }
 0x33c   : > { %1993 = vadd.xlane.f32.xlu1 %v1992_v8  ;;  %v2000_v38 = vadd.f32 %v3193_v1, %v3191_v32  ;;  %3216 = vpow2.f32 %v1931_v56  ;;  %v5367_v24 = vclamps-f32 %v4425_v2, 10.0  ;;  %v1937_v27 = vmul.f32 1.442695, %v1813_v48  ;;  %v3201_v21 = vpop.eup %3200  ;;  %v5375_v56 = vld [vmem:[#allocation32_spill] sm:$0xff]  ;;  %v5380_v48 = vld [vmem:[#allocation35_spill] sm:$0xff] }
 0x33d   : > { %v1814_v25 = vsub.f32 %v5365_v46, %v1751_v22  ;;  %v1815_v4 = vsub.f32 %v5366_v30, %v1751_v22  ;;  %3218 = vpow2.f32 %v1933_v0  ;;  %v1997_v6 = vadd.f32 %v3189_v44, %v1996_v42  ;;  %v3203_v14 = vpop.eup %3202  ;;  %v5377_v0 = vld [vmem:[#allocation33_spill] sm:$0xff]  ;;  %v5381_v46 = vld [vmem:[#allocation36_spill] sm:$0xff] }
 0x33e   : > { %v1816_v54 = vsub.f32 %v5367_v24, %v1751_v22  ;;  %v2001_v11 = vadd.f32 %v3195_v13, %v2000_v38  ;;  %3220 = vpow2.f32 %v1935_v55  ;;  %v2005_v15 = vadd.f32 %v3201_v21, %v3199_v5  ;;  %v3205_v39 = vpop.eup %3204  ;;  %v5378_v55 = vld [vmem:[#allocation34_spill] sm:$0xff]  ;;  %v1642_v38 = vld [vmem:[#allocation3 + $0x8] sm:$0xff]  ;;  %v5383_v24 = vld [vmem:[#allocation37_spill] sm:$0xff] }
 0x33f   : > { %v1939_v7 = vmul.f32 1.442695, %v1814_v25  ;;  %v1941_v40 = vmul.f32 1.442695, %v1815_v4  ;;  %3222 = vpow2.f32 %v1937_v27  ;;  %1998 = vadd.xlane.f32.xlu0 %v1997_v6  ;;  %v5370_v23 = vsub.f32 %v5368_v36, %v5369_v3  ;;  %v1643_v21 = vld [vmem:[#allocation3 + $0x10] sm:$0xff]  ;;  %v5396_v36 = vld [vmem:[#allocation46_spill] sm:$0xff] }
 0x340   : > { %v2002_v31 = vadd.f32 %v3197_v57, %v2001_v11  ;;  %v1943_v34 = vmul.f32 1.442695, %v1816_v54  ;;  %v3207_v60 = vpop.eup %3206  ;;  %v2006_v2 = vadd.f32 %v3203_v14, %v2005_v15  ;;  %v5373_v51 = vsub.f32 %v5371_v47, %v5372_v52  ;;  %v5384_v54 = vld [vmem:[#allocation38_spill] sm:$0xff]  ;;  %v5386_v14 = vld [vmem:[#allocation39_spill] sm:$0xff] }
 0x341   : > { %3224 = vpow2.f32 %v1939_v7  ;;  %v1609_v43 = vmul.f32 1.442695, %v5370_v23  ;;  %v5376_v62 = vsub.f32 %v5374_v20, %v5375_v56  ;;  %v5379_v8 = vsub.f32 %v5377_v0, %v5378_v55  ;;  %v5398_v20 = vld [vmem:[#allocation47_spill] sm:$0xff]  ;;  %v5399_v56 = vld [vmem:[#allocation48_spill] sm:$0xff] }
 0x342   : > { %2003 = vadd.xlane.f32.xlu1 %v2002_v31  ;;  %v3209_v18 = vpop.eup %3208  ;;  %3226 = vpow2.f32 %v1941_v40  ;;  %v2007_v29 = vadd.f32 %v3205_v39, %v2006_v2  ;;  %v1611_v44 = vmul.f32 1.442695, %v5373_v51  ;;  %v5382_v25 = vsub.f32 %v5380_v48, %v5381_v46  ;;  %v5387_v31 = vld [vmem:[#allocation40_spill] sm:$0xff] }
 0x343   : > { %v3211_v28 = vpop.eup %3210  ;;  %v2010_v35 = vadd.f32 %v3209_v18, %v3207_v60  ;;  %3228 = vpow2.f32 %v1943_v34  ;;  %v1613_v32 = vmul.f32 1.442695, %v5376_v62  ;;  %v1615_v22 = vmul.f32 1.442695, %v5379_v8  ;;  %v1644_v18 = vld [vmem:[#allocation3 + $0x18] sm:$0xff]  ;;  %v1647_v51 = vld [vmem:[#allocation3 + $0x30] sm:$0xff] }
 0x344   : > { %v3213_v37 = vpop.eup %3212  ;;  %2008 = vadd.xlane.f32.xlu0 %v2007_v29  ;;  %3230 = vpow2.f32 %v1609_v43  ;;  %v1617_v30 = vmul.f32 1.442695, %v5382_v25  ;;  %v5385_v27 = vsub.f32 %v5383_v24, %v5384_v54  ;;  %v5388_v15 = vsub.f32 %v5386_v14, %v5387_v31  ;;  %v5389_v29 = vld [vmem:[#allocation41_spill] sm:$0xff] }
 0x345   : > { %v3215_v61 = vpop.eup %3214  ;;  %v2011_v9 = vadd.f32 %v3211_v28, %v2010_v35  ;;  %3232 = vpow2.f32 %v1611_v44  ;;  %v5390_v35 = vld [vmem:[#allocation42_spill] sm:$0xff]  ;;  %v5400_v62 = vsub.f32 %v5398_v20, %v5399_v56 }
 0x346   : > { %v3217_v19 = vpop.eup %3216  ;;  %3234 = vpow2.f32 %v1613_v32  ;;  %v1619_v7 = vmul.f32 1.442695, %v5385_v27  ;;  %v1621_v39 = vmul.f32 1.442695, %v5388_v15  ;;  %v1650_v15 = vld [vmem:[#allocation3 + $0x48] sm:$0xff] }
 0x347   : > { %v3219_v41 = vpop.eup %3218  ;;  %v2012_v26 = vadd.f32 %v3213_v37, %v2011_v9  ;;  %v2015_v16 = vadd.f32 %v3217_v19, %v3215_v61  ;;  %3236 = vpow2.f32 %v1615_v22  ;;  %v5391_v37 = vsub.f32 %v5389_v29, %v5390_v35  ;;  %v1648_v22 = vld [vmem:[#allocation3 + $0x38] sm:$0xff]  ;;  %v1651_v35 = vld [vmem:[#allocation3 + $0x50] sm:$0xff] }
 0x348   : > { %v3221_v50 = vpop.eup %3220  ;;  %3238 = vpow2.f32 %v1617_v30  ;;  %v1629_v32 = vmul.f32 1.442695, %v5400_v62 }
 0x349   : > { %v3223_v17 = vpop.eup %3222  ;;  %2013 = vadd.xlane.f32.xlu1 %v2012_v26  ;;  %v2016_v59 = vadd.f32 %v3219_v41, %v2015_v16  ;;  %3240 = vpow2.f32 %v1619_v7  ;;  %v1623_v61 = vmul.f32 1.442695, %v5391_v37  ;;  %v1645_v26 = vld [vmem:[#allocation3 + $0x20] sm:$0xff] }
 0x34a   : > { %3242 = vpow2.f32 %v1621_v39 }
 0x34b   : > { %v3225_v53 = vpop.eup %3224  ;;  %v2017_v12 = vadd.f32 %v3221_v50, %v2016_v59  ;;  %3244 = vpow2.f32 %v1623_v61  ;;  %v5392_v50 = vld [vmem:[#allocation43_spill] sm:$0xff] }
 0x34c   : > { %v2020_v58 = vadd.f32 %v3225_v53, %v3223_v17  ;;  %v3227_v63 = vpop.eup %3226  ;;  %v5393_v17 = vld [vmem:[#allocation44_spill] sm:$0xff] }
 0x34d   : > { %2018 = vadd.xlane.f32.xlu0 %v2017_v12  ;;  %v3229_v10 = vpop.eup %3228  ;;  %v5394_v59 = vsub.f32 %v5392_v50, %v5393_v17 }
 0x34e   : > { %v2021_v49 = vadd.f32 %v3227_v63, %v2020_v58  ;;  %v3231_v1 = vpop.eup %3230 }
 0x34f   : > { %v1657_v4 = vmul.f32 %v3231_v1, %v1641_v45  ;;  %v3233_v13 = vpop.eup %3232  ;;  %v1625_v53 = vmul.f32 1.442695, %v5394_v59  ;;  %v5401_v1 = vld [vmem:[#allocation49_spill] sm:$0xff]  ;;  %v5402_v45 = vld [vmem:[#allocation50_spill] sm:$0xff] }
 0x350   : > { %v2022_v33 = vadd.f32 %v3229_v10, %v2021_v49  ;;  %v1658_v5 = vmul.f32 %v3233_v13, %v1642_v38  ;;  %v3235_v6 = vpop.eup %3234  ;;  %v1646_v49 = vld [vmem:[#allocation3 + $0x28] sm:$0xff]  ;;  %v5403_v48 = vsub.f32 %v5401_v1, %v5402_v45 }
 0x351   : > { %v1659_v34 = vmul.f32 %v3235_v6, %v1643_v21  ;;  %v3237_v60 = vpop.eup %3236  ;;  %3246 = vpow2.f32 %v1625_v53  ;;  %v5404_v38 = vld [vmem:[#allocation51_spill] sm:$0xff]  ;;  %v5408_v21 = vld [vmem:[#allocation54_spill] sm:$0xff] }
 0x352   : > { %2023 = vadd.xlane.f32.xlu1 %v2022_v33  ;;  %v1660_v9 = vmul.f32 %v3237_v60, %v1644_v18  ;;  %v3239_v19 = vpop.eup %3238  ;;  %v5395_v33 = vld [vmem:[#allocation45_spill] sm:$0xff]  ;;  %v1631_v46 = vmul.f32 1.442695, %v5403_v48  ;;  %v5410_v60 = vld [vmem:[#allocation55_spill] sm:$0xff] }
 0x353   : > { %v1661_v12 = vmul.f32 %v3239_v19, %v1645_v26  ;;  %v3241_v58 = vpop.eup %3240  ;;  %v5397_v3 = vsub.f32 %v5395_v33, %v5396_v36  ;;  %v5414_v26 = vld [vmem:[#allocation58_spill] sm:$0xff] }
 0x354   : > { %v1662_v43 = vmul.f32 %v3241_v58, %v1646_v49  ;;  %v3243_v47 = vpop.eup %3242 }
 0x355   : > { %v1627_v23 = vmul.f32 1.442695, %v5397_v3  ;;  %v1663_v0 = vmul.f32 %v3243_v47, %v1647_v51  ;;  %v3245_v55 = vpop.eup %3244  ;;  %v1654_v3 = vld [vmem:[#allocation3 + $0x68] sm:$0xff]  ;;  %v1655_v51 = vld [vmem:[#allocation3 + $0x70] sm:$0xff] }
 0x356   : > { %v1664_v30 = vmul.f32 %v3245_v55, %v1648_v22 }
 0x357   : > { %3248 = vpow2.f32 %v1627_v23 }
 0x358   : > { %3250 = vpow2.f32 %v1629_v32  ;;  %v1656_v32 = vld [vmem:[#allocation3 + $0x78] sm:$0xff] }
 0x359   : > { %3252 = vpow2.f32 %v1631_v46 }
 0x39d   : > { %v1949_v42 = vpop.xlane.xlu1 %1948 }
 0x39e   : > { %v2025_v57 = vadd.f32 %v1949_v42, %v1657_v4  ;;  %v3247_v4 = vpop.eup %3246  ;;  %v1649_v42 = vld [vmem:[#allocation3 + $0x40] sm:$0xff] }
 0x39f   : > { %v1665_v7 = vmul.f32 %v3247_v4, %v1649_v42  ;;  %v3249_v6 = vpop.eup %3248 }
 0x3a0   : > { %2042 = vst.msk [vmem:[#allocation3] sm:$0xff] %vm5211_vm1, %v2025_v57  ;;  %v5405_v57 = vld [vmem:[#allocation52_spill] sm:$0xff]  ;;  %v1666_v39 = vmul.f32 %v3249_v6, %v1650_v15  ;;  %v2079_v6 = vld [vmem:[#allocation2 + $0x8] sm:$0xff] (!%p2632_p10) }
 0x3a1   : > { %v1954_v11 = vpop.xlane.xlu0 %1953  ;;  %v5406_v24 = vsub.f32 %v5404_v38, %v5405_v57 }
 0x3a2   : > { %v2026_v40 = vadd.f32 %v1954_v11, %v1658_v5  ;;  %v5407_v11 = vld [vmem:[#allocation53_spill] sm:$0xff] }
 0x3a3   : > { %v1633_v54 = vmul.f32 1.442695, %v5406_v24 }
 0x3a4   : > { %2043 = vst.msk [vmem:[#allocation3 + $0x8] sm:$0xff] %vm5211_vm1, %v2026_v40  ;;  %v5409_v40 = vsub.f32 %v5407_v11, %v5408_v21 }
 0x3a5   : > { %v1959_v2 = vpop.xlane.xlu0 %1958  ;;  %3254 = vpow2.f32 %v1633_v54 }
 0x3a6   : > { %v2027_v28 = vadd.f32 %v1959_v2, %v1659_v34  ;;  %v1635_v14 = vmul.f32 1.442695, %v5409_v40  ;;  %v3251_v34 = vpop.eup %3250  ;;  %v5411_v2 = vld [vmem:[#allocation56_spill] sm:$0xff] }
 0x3a7   : > { %v5412_v18 = vsub.f32 %v5410_v60, %v5411_v2  ;;  %v3253_v61 = vpop.eup %3252  ;;  %v1667_v19 = vmul.f32 %v3251_v34, %v1651_v35  ;;  %v2094_v1 = vld [vmem:[#allocation3] sm:$0xff] (!%p2632_p10)  ;;  %v2080_v40 = vld [vmem:[#allocation2 + $0x10] sm:$0xff] (!%p2632_p10) }
 0x3a8   : > { %2044 = vst.msk [vmem:[#allocation3 + $0x10] sm:$0xff] %vm5211_vm1, %v2027_v28  ;;  %3256 = vpow2.f32 %v1635_v14 }
 0x3a9   : > { %v1637_v28 = vmul.f32 1.442695, %v5412_v18  ;;  %v2082_v18 = vld [vmem:[#allocation2 + $0x20] sm:$0xff] (!%p2632_p10) }
 0x3aa   : > { %v1964_v41 = vpop.xlane.xlu1 %1963 }
 0x3ab   : > { %v2028_v16 = vadd.f32 %v1964_v41, %v1660_v9  ;;  %v1652_v9 = vld [vmem:[#allocation3 + $0x58] sm:$0xff]  ;;  %3258 = vpow2.f32 %v1637_v28  ;;  %v2095_v45 = vld [vmem:[#allocation3 + $0x8] sm:$0xff] (!%p2632_p10) }
 0x3ac   : > { %v5413_v41 = vld [vmem:[#allocation57_spill] sm:$0xff]  ;;  %v1668_v53 = vmul.f32 %v3253_v61, %v1652_v9  ;;  %v2083_v61 = vld [vmem:[#allocation2 + $0x28] sm:$0xff] (!%p2632_p10) }
 0x3ad   : > { %2045 = vst.msk [vmem:[#allocation3 + $0x18] sm:$0xff] %vm5211_vm1, %v2028_v16  ;;  %v5415_v16 = vsub.f32 %v5413_v41, %v5414_v26 }
 0x3af   : > { %v1969_v63 = vpop.xlane.xlu0 %1968  ;;  %v1639_v50 = vmul.f32 1.442695, %v5415_v16  ;;  %v2096_v48 = vld [vmem:[#allocation3 + $0x10] sm:$0xff] (!%p2632_p10) }
 0x3b0   : > { %v2029_v10 = vadd.f32 %v1969_v63, %v1661_v12  ;;  %v3255_v12 = vpop.eup %3254  ;;  %v1653_v63 = vld [vmem:[#allocation3 + $0x60] sm:$0xff] }
 0x3b1   : > { %3260 = vpow2.f32 %v1639_v50 }
 0x3b2   : > { %2046 = vst.msk [vmem:[#allocation3 + $0x20] sm:$0xff] %vm5211_vm1, %v2029_v10  ;;  %v1669_v10 = vmul.f32 %v3255_v12, %v1653_v63  ;;  %v3257_v33 = vpop.eup %3256  ;;  %3262 = vlog2.f32 (!%p2632_p10), %v2094_v1 }
 0x3b3   : > { %v1974_v52 = vpop.xlane.xlu1 %1973  ;;  %3264 = vlog2.f32 (!%p2632_p10), %v2095_v45 }
 0x3b4   : > { %v2030_v44 = vadd.f32 %v1974_v52, %v1662_v43  ;;  %v1670_v43 = vmul.f32 %v3257_v33, %v1654_v3  ;;  %v2097_v46 = vld [vmem:[#allocation3 + $0x18] sm:$0xff] (!%p2632_p10)  ;;  %3266 = vlog2.f32 (!%p2632_p10), %v2096_v48  ;;  %v2084_v3 = vld [vmem:[#allocation2 + $0x30] sm:$0xff] (!%p2632_p10) }
 0x3b5   : > { %v3259_v47 = vpop.eup %3258  ;;  %3268 = vlog2.f32 (!%p2632_p10), %v2097_v46 }
 0x3b6   : > { %2047 = vst.msk [vmem:[#allocation3 + $0x28] sm:$0xff] %vm5211_vm1, %v2030_v44  ;;  %v1671_v20 = vmul.f32 %v3259_v47, %v1655_v51  ;;  %v2085_v47 = vld [vmem:[#allocation2 + $0x38] sm:$0xff] (!%p2632_p10)  ;;  %v2087_v51 = vld [vmem:[#allocation2 + $0x48] sm:$0xff] (!%p2632_p10) }
 0x3b8   : > { %v1979_v8 = vpop.xlane.xlu0 %1978 }
 0x3b9   : > { %v2031_v25 = vadd.f32 %v1979_v8, %v1663_v0 }
 0x3bb   : > { %2048 = vst.msk [vmem:[#allocation3 + $0x30] sm:$0xff] %vm5211_vm1, %v2031_v25  ;;  %v3261_v56 = vpop.eup %3260  ;;  %v2098_v25 = vld [vmem:[#allocation3 + $0x20] sm:$0xff] (!%p2632_p10) }
 0x3bc   : > { %v1672_v55 = vmul.f32 %v3261_v56, %v1656_v32  ;;  %3270 = vlog2.f32 (!%p2632_p10), %v2098_v25  ;;  %v3263_v54 = vpop.eup (!%p2632_p10), %3262 }
 0x3bd   : > { %v1984_v13 = vpop.xlane.xlu1 %1983 }
 0x3be   : > { %v2032_v27 = vadd.f32 %v1984_v13, %v1664_v30  ;;  %v2099_v30 = vld [vmem:[#allocation3 + $0x28] sm:$0xff] (!%p2632_p10) }
 0x3bf   : > { %3272 = vlog2.f32 (!%p2632_p10), %v2099_v30 }
 0x3c0   : > { %2049 = vst.msk [vmem:[#allocation3 + $0x38] sm:$0xff] %vm5211_vm1, %v2032_v27  ;;  %v2078_v27 = vld [vmem:[#allocation2] sm:$0xff] (!%p2632_p10) }
 0x3c2   : > { %v1989_v5 = vpop.xlane.xlu0 %1988  ;;  %v2100_v4 = vld [vmem:[#allocation3 + $0x30] sm:$0xff] (!%p2632_p10) }
 0x3c3   : > { %v2033_v31 = vadd.f32 %v1989_v5, %v1665_v7  ;;  %3274 = vlog2.f32 (!%p2632_p10), %v2100_v4  ;;  %v3265_v7 = vpop.eup (!%p2632_p10), %3264  ;;  %v2111_v5 = vmul.f32 (!%p2632_p10), 0.6931472, %v3263_v54  ;;  %v2088_v54 = vld [vmem:[#allocation2 + $0x50] sm:$0xff] (!%p2632_p10) }
 0x3c4   : > { %v3267_v11 = vpop.eup (!%p2632_p10), %3266  ;;  %v2113_v21 = vmul.f32 (!%p2632_p10), 0.6931472, %v3265_v7 }
 0x3c5   : > { %2050 = vst.msk [vmem:[#allocation3 + $0x40] sm:$0xff] %vm5211_vm1, %v2033_v31  ;;  %v3269_v14 = vpop.eup (!%p2632_p10), %3268  ;;  %v4794_v31 = vadd.f32 (!%p2632_p10), %v2111_v5, %v2078_v27  ;;  %v2115_v15 = vmul.f32 (!%p2632_p10), 0.6931472, %v3267_v11  ;;  %v2089_v27 = vld [vmem:[#allocation2 + $0x58] sm:$0xff] (!%p2632_p10) }
 0x3c6   : > { %v3271_v34 = vpop.eup (!%p2632_p10), %3270  ;;  %v4796_v60 = vadd.f32 (!%p2632_p10), %v2113_v21, %v2079_v6  ;;  %v2117_v2 = vmul.f32 (!%p2632_p10), 0.6931472, %v3269_v14 }
 0x3c7   : > { %v2101_v13 = vld [vmem:[#allocation3 + $0x38] sm:$0xff] (!%p2632_p10)  ;;  %v4799_v35 = vadd.f32 (!%p2632_p10), %v2115_v15, %v2080_v40  ;;  %vm2158_vm3 = vcmp.gt.f32.partialorder (!%p2632_p10), %v4794_v31, 20.0 }
 0x3c8   : > { %3276 = vlog2.f32 (!%p2632_p10), %v2101_v13  ;;  %v2175_v41 = vmin.f32 (!%p2632_p10), %v4796_v60, 20.0  ;;  %vm2159_vm5 = vcmp.gt.f32.partialorder (!%p2632_p10), %v4796_v60, 20.0 }
 0x3c9   : > { %v1994_v29 = vpop.xlane.xlu1 %1993  ;;  %v3273_v28 = vpop.eup (!%p2632_p10), %3272  ;;  %vm2160_vm6 = vcmp.gt.f32.partialorder (!%p2632_p10), %v4799_v35, 20.0 }
 0x3ca   : > { %v2034_v37 = vadd.f32 %v1994_v29, %v1666_v39  ;;  %v2081_v39 = vld [vmem:[#allocation2 + $0x18] sm:$0xff] (!%p2632_p10)  ;;  %v2174_v29 = vmin.f32 (!%p2632_p10), %v4794_v31, 20.0  ;;  %v2121_v16 = vmul.f32 (!%p2632_p10), 0.6931472, %v3273_v28 }
 0x3cb   : > { %v4802_v26 = vadd.f32 (!%p2632_p10), %v2117_v2, %v2081_v39 }
 0x3cc   : > { %2051 = vst.msk [vmem:[#allocation3 + $0x48] sm:$0xff] %vm5211_vm1, %v2034_v37  ;;  %v1999_v17 = vpop.xlane.xlu0 %1998  ;;  %v2102_v42 = vld [vmem:[#allocation3 + $0x40] sm:$0xff] (!%p2632_p10)  ;;  %v2119_v37 = vmul.f32 (!%p2632_p10), 0.6931472, %v3271_v34 }
 0x3cd   : > { %v2035_v59 = vadd.f32 %v1999_v17, %v1667_v19  ;;  %3278 = vlog2.f32 (!%p2632_p10), %v2102_v42  ;;  %v3275_v19 = vpop.eup (!%p2632_p10), %3274  ;;  %v2190_v17 = vmul.f32 (!%p2632_p10), 1.442695, %v2174_v29  ;;  %v2177_v63 = vmin.f32 (!%p2632_p10), %v4802_v26, 20.0 }
 0x3ce   : > { %v2123_v56 = vmul.f32 (!%p2632_p10), 0.6931472, %v3275_v19  ;;  %vm2161_vm8 = vcmp.gt.f32.partialorder (!%p2632_p10), %v4802_v26, 20.0 }
 0x3cf   : > { %v2004_v58 = vpop.xlane.xlu1 %2003  ;;  %2052 = vst.msk [vmem:[#allocation3 + $0x50] sm:$0xff] %vm5211_vm1, %v2035_v59  ;;  %v2176_v59 = vmin.f32 (!%p2632_p10), %v4799_v35, 20.0 }
 0x3d0   : > { %v2036_v49 = vadd.f32 %v2004_v58, %v1668_v53  ;;  %v4805_v53 = vadd.f32 (!%p2632_p10), %v2119_v37, %v2082_v18  ;;  %v2192_v58 = vmul.f32 (!%p2632_p10), 1.442695, %v2175_v41 }
 0x3d1   : > { %v2009_v36 = vpop.xlane.xlu0 %2008  ;;  %v2194_v33 = vmul.f32 (!%p2632_p10), 1.442695, %v2176_v59 }
 0x3d2   : > { %2053 = vst.msk [vmem:[#allocation3 + $0x58] sm:$0xff] %vm5211_vm1, %v2036_v49  ;;  %v2037_v23 = vadd.f32 %v2009_v36, %v1669_v10  ;;  %v3277_v50 = vpop.eup (!%p2632_p10), %3276  ;;  %v4808_v49 = vadd.f32 (!%p2632_p10), %v2121_v16, %v2083_v61  ;;  %v2178_v36 = vmin.f32 (!%p2632_p10), %v4805_v53, 20.0  ;;  %vm2162_vm10 = vcmp.gt.f32.partialorder (!%p2632_p10), %v4805_v53, 20.0 }
 0x3d3   : > { %v2103_v38 = vld [vmem:[#allocation3 + $0x48] sm:$0xff] (!%p2632_p10) }
 0x3d4   : > { %2054 = vst.msk [vmem:[#allocation3 + $0x60] sm:$0xff] %vm5211_vm1, %v2037_v23  ;;  %3280 = vlog2.f32 (!%p2632_p10), %v2103_v38  ;;  %v2196_v23 = vmul.f32 (!%p2632_p10), 1.442695, %v2177_v63  ;;  %vm2163_vm12 = vcmp.gt.f32.partialorder (!%p2632_p10), %v4808_v49, 20.0 }
 0x3d6   : > { %v2014_v52 = vpop.xlane.xlu1 %2013  ;;  %v2104_v57 = vld [vmem:[#allocation3 + $0x50] sm:$0xff] (!%p2632_p10) }
 0x3d7   : > { %v2038_v44 = vadd.f32 %v2014_v52, %v1670_v43  ;;  %3282 = vlog2.f32 (!%p2632_p10), %v2104_v57  ;;  %v3279_v12 = vpop.eup (!%p2632_p10), %3278  ;;  %v2179_v43 = vmin.f32 (!%p2632_p10), %v4808_v49, 20.0  ;;  %v2086_v52 = vld [vmem:[#allocation2 + $0x40] sm:$0xff] (!%p2632_p10) }
 0x3d9   : > { %2055 = vst.msk [vmem:[#allocation3 + $0x68] sm:$0xff] %vm5211_vm1, %v2038_v44  ;;  %v2105_v24 = vld [vmem:[#allocation3 + $0x58] sm:$0xff] (!%p2632_p10) }
 0x3da   : > { %v2019_v62 = vpop.xlane.xlu0 %2018  ;;  %3284 = vlog2.f32 (!%p2632_p10), %v2105_v24 }
 0x3db   : > { %v2039_v0 = vadd.f32 %v2019_v62, %v1671_v20  ;;  %v2106_v9 = vld [vmem:[#allocation3 + $0x60] sm:$0xff] (!%p2632_p10)  ;;  %v2198_v20 = vmul.f32 (!%p2632_p10), 1.442695, %v2178_v36  ;;  %v2125_v62 = vmul.f32 (!%p2632_p10), 0.6931472, %v3277_v50 }
 0x3dc   : > { %2077 = sbr.rel (%p2632_p10) target bundleno = 1093 (0x445), region = 52  ;;  %3286 = vlog2.f32 (!%p2632_p10), %v2106_v9 }
 0x3dd   : > { %2056 = vst.msk [vmem:[#allocation3 + $0x70] sm:$0xff] %vm5211_vm1, %v2039_v0  ;;  %3288 = vpow2.f32 (!%p2632_p10), %v2190_v17  ;;  %v2200_v0 = vmul.f32 (!%p2632_p10), 1.442695, %v2179_v43  ;;  %v4814_v1 = vadd.f32 (!%p2632_p10), %v2125_v62, %v2085_v47 }
 0x3de   : > { %v3281_v10 = vpop.eup (!%p2632_p10), %3280  ;;  %3290 = vpow2.f32 (!%p2632_p10), %v2192_v58 }
 0x3df   : > { %v2024_v8 = vpop.xlane.xlu1 %2023  ;;  %3292 = vpow2.f32 (!%p2632_p10), %v2194_v33  ;;  %v2181_v13 = vmin.f32 (!%p2632_p10), %v4814_v1, 20.0  ;;  %vm2165_vm0 = vcmp.gt.f32.partialorder (!%p2632_p10), %v4814_v1, 20.0 }
 0x3e0   : > { %v2040_v22 = vadd.f32 %v2024_v8, %v1672_v55  ;;  %3294 = vpow2.f32 (!%p2632_p10), %v2196_v23  ;;  %v2127_v55 = vmul.f32 (!%p2632_p10), 0.6931472, %v3279_v12  ;;  %v2129_v8 = vmul.f32 (!%p2632_p10), 0.6931472, %v3281_v10  ;;  %v2107_v45 = vld [vmem:[#allocation3 + $0x68] sm:$0xff] (!%p2632_p10) }
 0x3e1   : > { %v3283_v44 = vpop.eup (!%p2632_p10), %3282  ;;  %3296 = vpow2.f32 (!%p2632_p10), %v2198_v20  ;;  %v2204_v5 = vmul.f32 (!%p2632_p10), 1.442695, %v2181_v13 }
 0x3e2   : > { %2057 = vst.msk [vmem:[#allocation3 + $0x78] sm:$0xff] %vm5211_vm1, %v2040_v22  ;;  %v4812_v22 = vadd.f32 (!%p2632_p10), %v2123_v56, %v2084_v3  ;;  %v4816_v48 = vadd.f32 (!%p2632_p10), %v2127_v55, %v2086_v52  ;;  %v4818_v46 = vadd.f32 (!%p2632_p10), %v2129_v8, %v2087_v51  ;;  %v2131_v25 = vmul.f32 (!%p2632_p10), 0.6931472, %v3283_v44 }
 0x3e3   : > { %3298 = vpow2.f32 %v2200_v0 }
 0x3e4   : > { %v3285_v32 = vpop.eup %3284  ;;  %v2108_v30 = vld [vmem:[#allocation3 + $0x70] sm:$0xff]  ;;  %v2180_v4 = vmin.f32 %v4812_v22, 20.0  ;;  %v2182_v57 = vmin.f32 %v4816_v48, 20.0  ;;  %v2183_v24 = vmin.f32 %v4818_v46, 20.0  ;;  %3300 = vlog2.f32 %v2107_v45 }
 0x3e5   : > { %v2133_v42 = vmul.f32 0.6931472, %v3285_v32  ;;  %3302 = vlog2.f32 %v2108_v30  ;;  %v4824_v14 = vadd.f32 %v2131_v25, %v2088_v54  ;;  %vm2164_vm15 = vcmp.gt.f32.partialorder %v4812_v22, 20.0 }
 0x3e6   : > { %v2202_v7 = vmul.f32 1.442695, %v2180_v4  ;;  %v3287_v6 = vpop.eup %3286  ;;  %v2206_v11 = vmul.f32 1.442695, %v2182_v57  ;;  %v2208_v40 = vmul.f32 1.442695, %v2183_v24 }
 0x3e7   : > { %v3289_v21 = vpop.eup %3288  ;;  %v4826_v15 = vadd.f32 %v2133_v42, %v2089_v27  ;;  %v4828_v16 = vmul.f32 0.6931472, %v3287_v6  ;;  %v2184_v12 = vmin.f32 %v4824_v14, 20.0 }
 0x3e8   : > { %v3291_v39 = vpop.eup %3290  ;;  %v2222_v34 = vadd.f32 1.0, %v3289_v21  ;;  %v2225_v2 = vmul.f32 -0.5, %v3289_v21  ;;  %v2228_v18 = vand.u32 2147483647, %v3289_v21 }
 0x3e9   : > { %v2109_v38 = vld [vmem:[#allocation3 + $0x78] sm:$0xff]  ;;  %v3293_v28 = vpop.eup %3292  ;;  %v2231_v29 = vadd.f32 1.0, %v3291_v39  ;;  %v2234_v37 = vmul.f32 -0.5, %v3291_v39  ;;  %v2237_v61 = vand.u32 2147483647, %v3291_v39 }
 0x3ea   : > { %3304 = vlog2.f32 %v2109_v38  ;;  %v3295_v9 = vpop.eup %3294  ;;  %v2226_v19 = vadd.f32 1.0, %v2225_v2  ;;  %v2240_v41 = vadd.f32 1.0, %v3293_v28  ;;  %v2243_v59 = vmul.f32 -0.5, %v3293_v28 }
 0x3eb   : > { %3306 = vpow2.f32 %v2202_v7  ;;  %v3297_v50 = vpop.eup %3296  ;;  %v2235_v17 = vadd.f32 1.0, %v2234_v37  ;;  %vm4831_vm2 = vcmp.lt.f32.partialorder %v2228_v18, 0.0004427343  ;;  %v2246_v63 = vand.u32 2147483647, %v3293_v28 }
 0x3ec   : > { %3308 = vpow2.f32 %v2204_v5  ;;  %v2249_v10 = vadd.f32 1.0, %v3295_v9  ;;  %vm4836_vm4 = vcmp.lt.f32.partialorder %v2237_v61, 0.0004427343  ;;  %v2244_v3 = vadd.f32 1.0, %v2243_v59 }
 0x3ed   : > { %3310 = vpow2.f32 %v2206_v11  ;;  %v3299_v33 = vpop.eup %3298  ;;  %v2252_v23 = vmul.f32 -0.5, %v3295_v9  ;;  %v2255_v43 = vand.u32 2147483647, %v3295_v9  ;;  %v2227_v52 = vmul.f32 %v3289_v21, %v2226_v19 }
 0x3ee   : > { %3312 = vlog2.f32 %v2222_v34  ;;  %v4840_v47 = vpop.eup %3300  ;;  %v2258_v51 = vadd.f32 1.0, %v3297_v50  ;;  %v2261_v44 = vmul.f32 -0.5, %v3297_v50  ;;  %v2236_v56 = vmul.f32 %v3291_v39, %v2235_v17 }
 0x3ef   : > { %3314 = vlog2.f32 %v2231_v29  ;;  %v4843_v20 = vpop.eup %3302  ;;  %vm4846_vm7 = vcmp.lt.f32.partialorder %v2246_v63, 0.0004427343  ;;  %v2253_v32 = vadd.f32 1.0, %v2252_v23  ;;  %v2264_v0 = vand.u32 2147483647, %v3297_v50 }
 0x3f0   : > { %3316 = vlog2.f32 %v2240_v41  ;;  %v2262_v8 = vadd.f32 1.0, %v2261_v44  ;;  %v2267_v45 = vadd.f32 1.0, %v3299_v33  ;;  %v2270_v25 = vmul.f32 -0.5, %v3299_v33 }
 0x3f1   : > { %3318 = vlog2.f32 %v2249_v10  ;;  %v2245_v4 = vmul.f32 %v3293_v28, %v2244_v3  ;;  %vm4853_vm9 = vcmp.lt.f32.partialorder %v2255_v43, 0.0004427343  ;;  %v2273_v42 = vand.u32 2147483647, %v3299_v33 }
 0x3f2   : > { %3320 = vlog2.f32 %v2258_v51  ;;  %v2254_v57 = vmul.f32 %v3295_v9, %v2253_v32  ;;  %v2271_v24 = vadd.f32 1.0, %v2270_v25  ;;  %vm4860_vm11 = vcmp.lt.f32.partialorder %v2264_v0, 0.0004427343 }
 0x3f3   : > { %3322 = vpow2.f32 %v2208_v40  ;;  %v2263_v39 = vmul.f32 %v3297_v50, %v2262_v8  ;;  %vm4865_vm13 = vcmp.lt.f32.partialorder %v2273_v42, 0.0004427343  ;;  %v2210_v42 = vmul.f32 1.442695, %v2184_v12 }
 0x3f4   : > { %v4850_v55 = vpop.eup %3304  ;;  %3324 = vlog2.f32 %v2267_v45  ;;  %v2272_v28 = vmul.f32 %v3299_v33, %v2271_v24 }
 0x3f5   : > { %v3307_v30 = vpop.eup %3306 }
 0x3f6   : > { %v3309_v38 = vpop.eup %3308  ;;  %v2276_v54 = vadd.f32 1.0, %v3307_v30  ;;  %v2279_v5 = vmul.f32 -0.5, %v3307_v30  ;;  %v2282_v6 = vand.u32 2147483647, %v3307_v30 }
 0x3f7   : > { %v4857_v27 = vpop.eup %3310  ;;  %v2285_v11 = vadd.f32 1.0, %v3309_v38  ;;  %v2288_v40 = vmul.f32 -0.5, %v3309_v38  ;;  %v2291_v34 = vand.u32 2147483647, %v3309_v38 }
 0x3f8   : > { %v3313_v21 = vpop.eup %3312  ;;  %3326 = vlog2.f32 %v2276_v54  ;;  %v2280_v9 = vadd.f32 1.0, %v2279_v5  ;;  %vm4869_vm14 = vcmp.lt.f32.partialorder %v2282_v6, 0.0004427343  ;;  %v2294_v41 = vadd.f32 1.0, %v4857_v27 }
 0x3f9   : > { %v3315_v2 = vpop.eup %3314  ;;  %v2224_v18 = vmul.f32 0.6931472, %v3313_v21  ;;  %3328 = vlog2.f32 %v2285_v11  ;;  %v2289_v59 = vadd.f32 1.0, %v2288_v40  ;;  %v2297_v63 = vmul.f32 -0.5, %v4857_v27 }
 0x3fa   : > { %v3317_v37 = vpop.eup %3316  ;;  %v2233_v61 = vmul.f32 0.6931472, %v3315_v2  ;;  %vm4884_vm1 = vcmp.lt.f32.partialorder %v2291_v34, 0.0004427343  ;;  %3330 = vlog2.f32 %v2294_v41  ;;  %v2281_v44 = vmul.f32 %v3307_v30, %v2280_v9  ;;  %v2091_v41 = vld [vmem:[#allocation2 + $0x68] sm:$0xff] }
 0x3fb   : > { %v2230_v50 = vsel %vm4831_vm2, %v2227_v52, %v2224_v18  ;;  %v2242_v17 = vmul.f32 0.6931472, %v3317_v37  ;;  %v3319_v10 = vpop.eup %3318  ;;  %v2290_v45 = vmul.f32 %v3309_v38, %v2289_v59  ;;  %vm2166_vm2 = vcmp.gt.f32.partialorder %v4816_v48, 20.0 }
 0x3fc   : > { %v2366_v33 = vsel %vm2158_vm3, %v4794_v31, %v2230_v50  ;;  %v2239_v3 = vsel %vm4836_vm4, %v2236_v56, %v2233_v61  ;;  %v2251_v52 = vmul.f32 0.6931472, %v3319_v10  ;;  %v3321_v51 = vpop.eup %3320  ;;  %v2298_v56 = vadd.f32 1.0, %v2297_v63 }
 0x3fd   : > { %3332 = vtanh.f32 %v2366_v33  ;;  %v2367_v58 = vsel %vm2159_vm5, %v4796_v60, %v2239_v3  ;;  %v2248_v43 = vsel %vm4846_vm7, %v2245_v4, %v2242_v17  ;;  %v4896_v32 = vpop.eup %3322  ;;  %v2260_v8 = vmul.f32 0.6931472, %v3321_v51 }
 0x3fe   : > { %3334 = vtanh.f32 %v2367_v58  ;;  %v2368_v36 = vsel %vm2160_vm6, %v4799_v35, %v2248_v43  ;;  %v2257_v0 = vsel %vm4853_vm9, %v2254_v57, %v2251_v52  ;;  %v3325_v62 = vpop.eup %3324  ;;  %v2300_v4 = vand.u32 2147483647, %v4857_v27  ;;  %v2092_v52 = vld [vmem:[#allocation2 + $0x70] sm:$0xff] }
 0x3ff   : > { %3336 = vtanh.f32 %v2368_v36  ;;  %v2369_v25 = vsel %vm2161_vm8, %v4802_v26, %v2257_v0  ;;  %v2303_v30 = vadd.f32 1.0, %v4896_v32  ;;  %v2266_v13 = vsel %vm4860_vm11, %v2263_v39, %v2260_v8  ;;  %v2090_v39 = vld [vmem:[#allocation2 + $0x60] sm:$0xff] }
 0x400   : > { %3338 = vtanh.f32 %v2369_v25  ;;  %v2269_v57 = vmul.f32 0.6931472, %v3325_v62  ;;  %v2306_v38 = vmul.f32 -0.5, %v4896_v32  ;;  %v2370_v54 = vsel %vm2162_vm10, %v4805_v53, %v2266_v13 }
 0x401   : > { %v2299_v5 = vmul.f32 %v4857_v27, %v2298_v56  ;;  %3340 = vlog2.f32 %v2303_v30  ;;  %v2185_v6 = vmin.f32 %v4826_v15, 20.0  ;;  %v2309_v21 = vand.u32 2147483647, %v4896_v32 }
 0x402   : > { %v3327_v24 = vpop.eup %3326  ;;  %3342 = vtanh.f32 %v2370_v54  ;;  %v2275_v12 = vsel %vm4865_vm13, %v2272_v28, %v2269_v57  ;;  %vm4922_vm3 = vcmp.lt.f32.partialorder %v2300_v4, 0.0004427343  ;;  %v2307_v18 = vadd.f32 1.0, %v2306_v38 }
 0x403   : > { %v3329_v11 = vpop.eup %3328  ;;  %v2278_v7 = vmul.f32 0.6931472, %v3327_v24  ;;  %v2371_v40 = vsel %vm2163_vm12, %v4808_v49, %v2275_v12  ;;  %3344 = vpow2.f32 %v2210_v42  ;;  %v2212_v28 = vmul.f32 1.442695, %v2185_v6  ;;  %v2093_v6 = vld [vmem:[#allocation2 + $0x78] sm:$0xff] }
 0x404   : > { %v2287_v34 = vmul.f32 0.6931472, %v3329_v11  ;;  %3346 = vtanh.f32 %v2371_v40  ;;  %v3331_v29 = vpop.eup %3330  ;;  %v4934_v9 = vadd.f32 %v4828_v16, %v2090_v39  ;;  %v2137_v50 = vmul.f32 0.6931472, %v4840_v47 }
 0x405   : > { %v2284_v27 = vsel %vm4869_vm14, %v2281_v44, %v2278_v7  ;;  %v2296_v59 = vmul.f32 0.6931472, %v3331_v29  ;;  %vm4940_vm4 = vcmp.lt.f32.partialorder %v2309_v21, 0.0004427343  ;;  %v2139_v3 = vmul.f32 0.6931472, %v4843_v20 }
 0x406   : > { %v2372_v37 = vsel %vm2164_vm15, %v4812_v22, %v2284_v27  ;;  %v2293_v61 = vsel %vm4884_vm1, %v2290_v45, %v2287_v34  ;;  %v2186_v16 = vmin.f32 %v4934_v9, 20.0  ;;  %v4950_v43 = vadd.f32 %v2137_v50, %v2091_v41 }
 0x407   : > { %v3333_v17 = vpop.eup %3332  ;;  %3348 = vtanh.f32 %v2372_v37  ;;  %v2373_v19 = vsel %vm2165_vm0, %v4814_v1, %v2293_v61  ;;  %v2302_v58 = vsel %vm4922_vm3, %v2299_v5, %v2296_v59  ;;  %v2308_v8 = vmul.f32 %v4896_v32, %v2307_v18 }
 0x408   : > { %v3335_v10 = vpop.eup %3334  ;;  %v2398_v33 = vmul.f32 %v3333_v17, %v4794_v31  ;;  %3350 = vtanh.f32 %v2373_v19  ;;  %v2374_v44 = vsel %vm2166_vm2, %v4816_v48, %v2302_v58  ;;  %v2214_v56 = vmul.f32 1.442695, %v2186_v16 }
 0x409   : > { %v3337_v47 = vpop.eup %3336  ;;  %v2399_v23 = vmul.f32 %v3335_v10, %v4796_v60  ;;  %3352 = vpow2.f32 %v2212_v28  ;;  %v2187_v45 = vmin.f32 %v4950_v43, 20.0  ;;  %vm5436_vm1 = vcmask 7168  }
 0x40a   : > { %v2414_v51 = vmul.f32 %v2398_v33, %v4794_v31  ;;  %v2400_v36 = vmul.f32 %v3337_v47, %v4799_v35  ;;  %v3339_v20 = vpop.eup %3338  ;;  %3354 = vtanh.f32 %v2374_v44  ;;  %v4966_v4 = vadd.f32 %v2139_v3, %v2092_v52  ;;  %vm5437_vm5 = vmmov %vm5436_vm1 }
 0x40b   : > { %v2415_v0 = vmul.f32 %v2399_v23, %v4796_v60  ;;  %v3341_v62 = vpop.eup %3340  ;;  %v2401_v25 = vmul.f32 %v3339_v20, %v4802_v26  ;;  %3356 = vpow2.f32 %v2214_v56  ;;  %vm2167_vm6 = vcmp.gt.f32.partialorder %v4818_v46, 20.0  ;;  %vm5438_vm7 = vmmov %vm5436_vm1 }
 0x40c   : > { %2430 = vst.msk [vmem:[%s5103_s3] sm:$0xff] %vm5436_vm1, %v2414_v51  ;;  %v2416_v31 = vmul.f32 %v2400_v36, %v4799_v35  ;;  %v3343_v30 = vpop.eup %3342  ;;  %v2305_v60 = vmul.f32 0.6931472, %v3341_v62  ;;  %v2216_v32 = vmul.f32 1.442695, %v2187_v45  ;;  %v2188_v57 = vmin.f32 %v4966_v4, 20.0  ;;  %vm5439_vm8 = vmmov %vm5436_vm1 }
 0x40d   : > { %2431 = vst.msk [vmem:[%s5103_s3 + $0x8] sm:$0xff] %vm5437_vm5, %v2415_v0  ;;  %v3345_v42 = vpop.eup %3344  ;;  %v2417_v35 = vmul.f32 %v2401_v25, %v4802_v26  ;;  %v2402_v13 = vmul.f32 %v3343_v30, %v4805_v53  ;;  %v2141_v38 = vmul.f32 0.6931472, %v4850_v55  ;;  %vm5440_vm9 = vmmov %vm5436_vm1  ;;  %vm2168_vm15 = vcmp.gt.f32.partialorder %v4824_v14, 20.0 }
 0x40e   : > { %2432 = vst.msk [vmem:[%s5103_s3 + $0x10] sm:$0xff] %vm5438_vm7, %v2416_v31  ;;  %v3347_v24 = vpop.eup %3346  ;;  %v2311_v54 = vsel %vm4940_vm4, %v2308_v8, %v2305_v60  ;;  %v2312_v5 = vadd.f32 1.0, %v3345_v42  ;;  %3358 = vpow2.f32 %v2216_v32  ;;  %v2218_v7 = vmul.f32 1.442695, %v2188_v57  ;;  %vm5441_vm10 = vmmov %vm5436_vm1 }
 0x40f   : > { %2433 = vst.msk [vmem:[%s5103_s3 + $0x18] sm:$0xff] %vm5439_vm8, %v2417_v35  ;;  %v2418_v11 = vmul.f32 %v2402_v13, %v4805_v53  ;;  %v2403_v26 = vmul.f32 %v3347_v24, %v4808_v49  ;;  %v2375_v12 = vsel %vm2167_vm6, %v4818_v46, %v2311_v54  ;;  %v4998_v40 = vadd.f32 %v2141_v38, %v2093_v6  ;;  %vm5442_vm11 = vmmov %vm5436_vm1 }
 0x410   : > { %3360 = vtanh.f32 %v2375_v12  ;;  %v2315_v27 = vmul.f32 -0.5, %v3345_v42  ;;  %vm5443_vm12 = vmmov %vm5436_vm1  ;;  %v2318_v59 = vand.u32 2147483647, %v3345_v42  ;;  %vm2169_vm3 = vcmp.gt.f32.partialorder %v4826_v15, 20.0 }
 0x411   : > { %v3349_v55 = vpop.eup %3348  ;;  %2434 = vst.msk [vmem:[%s5103_s3 + $0x20] sm:$0xff] %vm5440_vm9, %v2418_v11  ;;  %v2419_v39 = vmul.f32 %v2403_v26, %v4808_v49  ;;  %3362 = vlog2.f32 %v2312_v5  ;;  %v2189_v37 = vmin.f32 %v4998_v40, 20.0  ;;  %vm5444_vm13 = vmmov %vm5436_vm1  ;;  %vm2171_vm6 = vcmp.gt.f32.partialorder %v4950_v43, 20.0 }
 0x412   : > { %v3351_v21 = vpop.eup %3350  ;;  %v2404_v53 = vmul.f32 %v3349_v55, %v4812_v22  ;;  %3364 = vpow2.f32 %v2218_v7  ;;  %vm5023_vm14 = vcmp.lt.f32.partialorder %v2318_v59, 0.0004427343  ;;  %vm5447_vm0 = vmmov %vm5436_vm1  ;;  %vm2170_vm1 = vcmp.gt.f32.partialorder %v4934_v9, 20.0 }
 0x413   : > { %v3353_v34 = vpop.eup %3352  ;;  %v2405_v2 = vmul.f32 %v3351_v21, %v4814_v1  ;;  %2435 = vst.msk [vmem:[%s5103_s3 + $0x28] sm:$0xff] %vm5441_vm10, %v2419_v39  ;;  %vm2172_vm8 = vcmp.gt.f32.partialorder %v4966_v4, 20.0  ;;  %vm5448_vm9 = vmmov %vm5447_vm0 }
 0x414   : > { %v2420_v18 = vmul.f32 %v2404_v53, %v4812_v22  ;;  %v2321_v28 = vadd.f32 1.0, %v3353_v34  ;;  %v3355_v29 = vpop.eup %3354  ;;  %v2316_v22 = vadd.f32 1.0, %v2315_v27  ;;  %v2324_v50 = vmul.f32 -0.5, %v3353_v34 }
 0x415   : > { %v2421_v49 = vmul.f32 %v2405_v2, %v4814_v1  ;;  %v3357_v61 = vpop.eup %3356  ;;  %v2406_v41 = vmul.f32 %v3355_v29, %v4816_v48  ;;  %v2220_v1 = vmul.f32 1.442695, %v2189_v37 }
 0x416   : > { %2436 = vst.msk [vmem:[%s5103_s3 + $0x30] sm:$0xff] %vm5442_vm11, %v2420_v18  ;;  %3366 = vlog2.f32 %v2321_v28  ;;  %v2330_v17 = vadd.f32 1.0, %v3357_v61  ;;  %v2333_v10 = vmul.f32 -0.5, %v3357_v61  ;;  %v2317_v16 = vmul.f32 %v3345_v42, %v2316_v22 }
 0x417   : > { %2437 = vst.msk [vmem:[%s5103_s3 + $0x38] sm:$0xff] %vm5443_vm12, %v2421_v49  ;;  %v2422_v19 = vmul.f32 %v2406_v41, %v4816_v48  ;;  %v2325_v3 = vadd.f32 1.0, %v2324_v50  ;;  %v2327_v48 = vand.u32 2147483647, %v3353_v34  ;;  %v2336_v62 = vand.u32 2147483647, %v3357_v61  ;;  %vm5449_vm12 = vmmov %vm5447_vm0 }
 0x418   : > { %3368 = vlog2.f32 %v2330_v17  ;;  %v3359_v63 = vpop.eup %3358  ;;  %v2334_v56 = vadd.f32 1.0, %v2333_v10  ;;  %vm2173_vm11 = vcmp.gt.f32.partialorder %v4998_v40, 20.0 }
 0x419   : > { %2438 = vst.msk [vmem:[%s5103_s3 + $0x40] sm:$0xff] %vm5444_vm13, %v2422_v19  ;;  %3370 = vpow2.f32 %v2220_v1  ;;  %v2339_v47 = vadd.f32 1.0, %v3359_v63  ;;  %v2342_v20 = vmul.f32 -0.5, %v3359_v63  ;;  %v2326_v45 = vmul.f32 %v3353_v34, %v2325_v3  ;;  %vm5450_vm13 = vmmov %vm5447_vm0 }
 0x41a   : > { %v3361_v33 = vpop.eup %3360  ;;  %vm2328_vm2 = vcmp.lt.f32.partialorder %v2327_v48, 0.0004427343  ;;  %v2335_v60 = vmul.f32 %v3357_v61, %v2334_v56  ;;  %vm2337_vm4 = vcmp.lt.f32.partialorder %v2336_v62, 0.0004427343  ;;  %v2345_v13 = vand.u32 2147483647, %v3359_v63 }
 0x41b   : > { %v3363_v23 = vpop.eup %3362  ;;  %v2407_v58 = vmul.f32 %v3361_v33, %v4818_v46  ;;  %3372 = vlog2.f32 %v2339_v47  ;;  %v2343_v32 = vadd.f32 1.0, %v2342_v20 }
 0x41c   : > { %v3365_v51 = vpop.eup %3364  ;;  %v2314_v36 = vmul.f32 0.6931472, %v3363_v23  ;;  %vm2346_vm5 = vcmp.lt.f32.partialorder %v2345_v13, 0.0004427343 }
 0x41d   : > { %v2423_v44 = vmul.f32 %v2407_v58, %v4818_v46  ;;  %v2348_v0 = vadd.f32 1.0, %v3365_v51  ;;  %v2351_v30 = vmul.f32 -0.5, %v3365_v51  ;;  %v2344_v11 = vmul.f32 %v3359_v63, %v2343_v32 }
 0x41e   : > { %v2320_v8 = vsel %vm5023_vm14, %v2317_v16, %v2314_v36  ;;  %v2354_v26 = vand.u32 2147483647, %v3365_v51  ;;  %vm5451_vm14 = vmmov %vm5447_vm0 }
 0x41f   : > { %2439 = vst.msk [vmem:[%s5103_s3 + $0x48] sm:$0xff] %vm5447_vm0, %v2423_v44  ;;  %v2376_v25 = vsel %vm2168_vm15, %v4824_v14, %v2320_v8  ;;  %3374 = vlog2.f32 %v2348_v0  ;;  %v2352_v54 = vadd.f32 1.0, %v2351_v30  ;;  %vm5452_vm15 = vmmov %vm5447_vm0 }
 0x420   : > { %v3367_v31 = vpop.eup %3366  ;;  %3376 = vtanh.f32 %v2376_v25  ;;  %vm2355_vm7 = vcmp.lt.f32.partialorder %v2354_v26, 0.0004427343 }
 0x421   : > { %v2323_v46 = vmul.f32 0.6931472, %v3367_v31  ;;  %v2353_v39 = vmul.f32 %v3365_v51, %v2352_v54 }
 0x422   : > { %v3369_v42 = vpop.eup %3368 }
 0x423   : > { %v2329_v35 = vsel %vm2328_vm2, %v2326_v45, %v2323_v46  ;;  %v3371_v57 = vpop.eup %3370  ;;  %v2332_v24 = vmul.f32 0.6931472, %v3369_v42 }
 0x424   : > { %v2377_v38 = vsel %vm2169_vm3, %v4826_v15, %v2329_v35  ;;  %v2357_v5 = vadd.f32 1.0, %v3371_v57  ;;  %v2360_v21 = vmul.f32 -0.5, %v3371_v57  ;;  %v2363_v37 = vand.u32 2147483647, %v3371_v57 }
 0x425   : > { %3378 = vtanh.f32 %v2377_v38  ;;  %v2338_v6 = vsel %vm2337_vm4, %v2335_v60, %v2332_v24  ;;  %v3373_v12 = vpop.eup %3372 }
 0x426   : > { %v2378_v55 = vsel %vm2170_vm1, %v4934_v9, %v2338_v6  ;;  %3380 = vlog2.f32 %v2357_v5  ;;  %v2341_v7 = vmul.f32 0.6931472, %v3373_v12  ;;  %v2361_v29 = vadd.f32 1.0, %v2360_v21 }
 0x427   : > { %3382 = vtanh.f32 %v2378_v55  ;;  %vm2364_vm10 = vcmp.lt.f32.partialorder %v2363_v37, 0.0004427343 }
 0x428   : > { %v2347_v34 = vsel %vm2346_vm5, %v2344_v11, %v2341_v7  ;;  %v2362_v17 = vmul.f32 %v3371_v57, %v2361_v29 }
 0x429   : > { %v3375_v53 = vpop.eup %3374  ;;  %v2379_v27 = vsel %vm2171_vm6, %v4950_v43, %v2347_v34 }
 0x42a   : > { %v3377_v2 = vpop.eup %3376  ;;  %v2350_v18 = vmul.f32 0.6931472, %v3375_v53  ;;  %3384 = vtanh.f32 %v2379_v27 }
 0x42b   : > { %v2408_v28 = vmul.f32 %v3377_v2, %v4824_v14 }
 0x42c   : > { %v2356_v49 = vsel %vm2355_vm7, %v2353_v39, %v2350_v18 }
 0x42d   : > { %v2424_v61 = vmul.f32 %v2408_v28, %v4824_v14  ;;  %v2380_v41 = vsel %vm2172_vm8, %v4966_v4, %v2356_v49 }
 0x42e   : > { %3386 = vtanh.f32 %v2380_v41 }
 0x42f   : > { %v3379_v22 = vpop.eup %3378  ;;  %2440 = vst.msk [vmem:[%s5103_s3 + $0x50] sm:$0xff] %vm5448_vm9, %v2424_v61 }
 0x430   : > { %v2409_v50 = vmul.f32 %v3379_v22, %v4826_v15  ;;  %v3381_v1 = vpop.eup %3380 }
 0x431   : > { %v3383_v19 = vpop.eup %3382  ;;  %v2359_v14 = vmul.f32 0.6931472, %v3381_v1 }
 0x432   : > { %v2425_v59 = vmul.f32 %v2409_v50, %v4826_v15  ;;  %v2410_v63 = vmul.f32 %v3383_v19, %v4934_v9 }
 0x433   : > { %v2365_v10 = vsel %vm2364_vm10, %v2362_v17, %v2359_v14 }
 0x434   : > { %2441 = vst.msk [vmem:[%s5103_s3 + $0x58] sm:$0xff] %vm5449_vm12, %v2425_v59  ;;  %v2426_v33 = vmul.f32 %v2410_v63, %v4934_v9  ;;  %v2381_v16 = vsel %vm2173_vm11, %v4998_v40, %v2365_v10  ;;  %v3385_v3 = vpop.eup %3384 }
 0x435   : > { %3388 = vtanh.f32 %v2381_v16  ;;  %v2411_v15 = vmul.f32 %v3385_v3, %v4950_v43 }
 0x436   : > { %2442 = vst.msk [vmem:[%s5103_s3 + $0x60] sm:$0xff] %vm5450_vm13, %v2426_v33 }
 0x437   : > { %v2427_v23 = vmul.f32 %v2411_v15, %v4950_v43 }
 0x438   : > { %v3387_v47 = vpop.eup %3386 }
 0x439   : > { %v2412_v58 = vmul.f32 %v3387_v47, %v4966_v4  ;;  %2443 = vst.msk [vmem:[%s5103_s3 + $0x68] sm:$0xff] %vm5451_vm14, %v2427_v23 }
 0x43b   : > { %v2428_v9 = vmul.f32 %v2412_v58, %v4966_v4 }
 0x43d   : > { %2444 = vst.msk [vmem:[%s5103_s3 + $0x70] sm:$0xff] %vm5452_vm15, %v2428_v9 }
 0x43f   : > { %v3389_v52 = vpop.eup %3388 }
 0x440   : > { %v2413_v48 = vmul.f32 %v3389_v52, %v4998_v40 }
 0x442   : > { %v2429_v51 = vmul.f32 %v2413_v48, %v4998_v40 }
 0x444   : > { %2445 = vst.msk [vmem:[%s5103_s3 + $0x78] sm:$0xff] %vm5447_vm0, %v2429_v51 }
 0x445 PF: > { %s17_s17 = sadd.s32 1, %s3532_s17   ;;  %s5453_s12 = smov %s3516_s13 }
 0x446   : > { %p14_p0 = scmp.ge.s32.totalorder %s17_s17, 4   ;;  %s5454_s13 = smov %s3520_s14 }
 0x447   : > { %s5455_s14 = smov %s3610_s24  ;;  %s5456_s15 = smov %s3528_s16 }
 0x448   : > { %s5457_s16 = smov %s5459_s18  ;;  %16 = sbr.rel (!%p14_p0) target bundleno = 5 (0x5), region = 97 }
 0x44f   :  { %2468 = vsyncpa [#allocation5], 1 }
 0x450   :  { %2470 = vsyncpa [#allocation5 + $0x1], 1 }
 0x451   :  { %2471 = vsyncpa [#allocation7], 1 }
 0x452   :  { %2473 = vsyncpa [#allocation7 + $0x1], 1 }

</bundles_post_ra>
